<compile_context>
chip_gen: v7x
topology: tpu7x:2x2x1
jax: 0.10.0
libtpu: 0.0.40
codegen_flags: <defaults>
</compile_context>

<pallas_src>
import functools

import jax
import jax.numpy as jnp
from jax.experimental import pallas as pl
from jax.experimental.pallas import tpu as pltpu


def _round_up(x, m):
    return (x + m - 1) // m * m


def basic_block_kernel(x_ref, w01a_ref, w2a_ref, b1_ref,
                       w01b_ref, w2b_ref, b2_ref, out_ref, acc_ref,
                       *, H, W, Cp, compute_dtype, pack_k):
    """One batch element per grid step.

    x_ref    : (1, H, W, Cp)  f32 input (channels zero-padded to Cp)
    w01*_ref : (3, 2*Cp, Cp)  BN-scale-folded weights, taps kx=0,1 stacked on K
    w2*_ref  : (3, Cp, Cp)    BN-scale-folded weights, tap kx=2
    b*_ref   : (1, Cp)        folded BatchNorm bias (scale lives in weights)
    out_ref  : (1, H, W, Cp)
    acc_ref  : (HW, Cp) f32   VMEM conv accumulator scratch
    """
    HW = H * W
    xf = x_ref[0].reshape(HW, Cp)                      # f32: conv1 input + residual

    # Column (x) position of every flattened row; 0/1 masks that zero the
    # pixels wrapped around by the sublane rotations below.
    xpos = jax.lax.broadcasted_iota(jnp.int32, (HW, 1), 0) % W
    mask_l = (xpos != 0).astype(jnp.float32)           # validity of in[., x-1]
    mask_r = (xpos != (W - 1)).astype(jnp.float32)     # validity of in[., x+1]

    def conv3x3(inp_f32, w01_ref, w2_ref):
        # inp_f32: (HW, Cp) f32.  Returns (HW, Cp) f32 conv output.
        # dx shifts: XLU sublane rotate + column mask (no unaligned W-slices).
        xs0 = (pltpu.roll(inp_f32, shift=1, axis=0) * mask_l).astype(compute_dtype)
        xs1 = inp_f32.astype(compute_dtype)
        xs2 = (pltpu.roll(inp_f32, shift=HW - 1, axis=0) * mask_r).astype(compute_dtype)
        if pack_k:
            # K=256 push for the 2x256^2 MXU (v6e / v7x).
            x01 = jnp.concatenate([xs0, xs1], axis=1)  # (HW, 2*Cp)

        acc_ref[...] = jnp.zeros_like(acc_ref)
        for ky in range(3):                            # dy = ky - 1
            if pack_k:
                part = jnp.dot(x01, w01_ref[ky],
                               preferred_element_type=jnp.float32)
            else:
                w01 = w01_ref[ky]                      # (2*Cp, Cp)
                part = (jnp.dot(xs0, w01[:Cp],
                                preferred_element_type=jnp.float32)
                        + jnp.dot(xs1, w01[Cp:],
                                  preferred_element_type=jnp.float32))
            part = part + jnp.dot(xs2, w2_ref[ky],
                                  preferred_element_type=jnp.float32)
            # dy handling: accumulate into a row-offset slice of the scratch.
            # W is a multiple of 8, so all offsets stay sublane-aligned.
            if ky == 0:        # out[y] += part[y-1]
                acc_ref[pl.ds(W, HW - W), :] += part[:HW - W, :]
            elif ky == 1:
                acc_ref[...] += part
            else:              # out[y] += part[y+1]
                acc_ref[pl.ds(0, HW - W), :] += part[W:, :]
        return acc_ref[...]

    # conv1 (BN1 scale folded in) + bias + relu
    o1 = jnp.maximum(conv3x3(xf, w01a_ref, w2a_ref) + b1_ref[...], 0.0)
    # conv2 (BN2 scale folded in) + bias + residual + relu
    y = jnp.maximum(conv3x3(o1, w01b_ref, w2b_ref) + b2_ref[...] + xf, 0.0)
    out_ref[0] = y.reshape(H, W, Cp).astype(out_ref.dtype)


def _fold_conv_bn(w_oihw, gamma, beta, mean, var, C, Cp, eps, compute_dtype):
    """Fold BN (running stats) scale into conv weights in f32, pad, pack taps."""
    s = gamma / jnp.sqrt(var + eps)                         # (C,) f32
    b = beta - mean * s
    w = jnp.transpose(w_oihw, (2, 3, 1, 0)).astype(jnp.float32)   # OIHW -> HWIO
    w = w * s[None, None, None, :]                          # scale on out channels
    w = jnp.pad(w, ((0, 0), (0, 0), (0, Cp - C), (0, Cp - C))).astype(compute_dtype)
    w01 = jnp.concatenate([w[:, 0], w[:, 1]], axis=1)       # (3, 2*Cp, Cp)
    w2 = w[:, 2]                                            # (3, Cp, Cp)
    bp = jnp.pad(b, (0, Cp - C)).reshape(1, Cp).astype(jnp.float32)
    return w01, w2, bp


def basic_block_forward_nhwc(x_nhwc, w1_oihw, g1, be1, m1, v1,
                             w2_oihw, g2, be2, m2, v2, *, eps=1e-5,
                             compute_dtype=jnp.bfloat16, pack_k=True,
                             out_dtype=jnp.float32):
    """NHWC-native BasicBlock.

    x_nhwc: (N, H, W, Cp) f32, channels already zero-padded to Cp (multiple of
    128).  Returns (N, H, W, Cp) in out_dtype — keep this layout across chained
    blocks so transposes / channel un-padding happen only at the net boundary.
    pack_k=True uses K=256 MXU pushes (v6e/v7x); pass False on v5e.
    """
    N, H, W, Cp = x_nhwc.shape
    C = w1_oihw.shape[1]
    assert w1_oihw.shape[0] == C, "no-downsample BasicBlock needs inplanes == planes"
    assert Cp % 128 == 0 and Cp >= C
    assert W % 8 == 0, "pad W to a multiple of 8 for sublane-aligned row shifts"

    w01a, w2a, b1 = _fold_conv_bn(w1_oihw, g1, be1, m1, v1, C, Cp, eps, compute_dtype)
    w01b, w2b, b2 = _fold_conv_bn(w2_oihw, g2, be2, m2, v2, C, Cp, eps, compute_dtype)

    kern = functools.partial(basic_block_kernel, H=H, W=W, Cp=Cp,
                             compute_dtype=compute_dtype, pack_k=pack_k)

    return pl.pallas_call(
        kern,
        out_shape=jax.ShapeDtypeStruct((N, H, W, Cp), out_dtype),
        grid_spec=pltpu.PrefetchScalarGridSpec(
            num_scalar_prefetch=0,
            grid=(N,),
            in_specs=[
                pl.BlockSpec((1, H, W, Cp), lambda n: (n, 0, 0, 0)),
                pl.BlockSpec((3, 2 * Cp, Cp), lambda n: (0, 0, 0)),
                pl.BlockSpec((3, Cp, Cp), lambda n: (0, 0, 0)),
                pl.BlockSpec((1, Cp), lambda n: (0, 0)),
                pl.BlockSpec((3, 2 * Cp, Cp), lambda n: (0, 0, 0)),
                pl.BlockSpec((3, Cp, Cp), lambda n: (0, 0, 0)),
                pl.BlockSpec((1, Cp), lambda n: (0, 0)),
            ],
            out_specs=pl.BlockSpec((1, H, W, Cp), lambda n: (n, 0, 0, 0)),
            scratch_shapes=[pltpu.VMEM((H * W, Cp), jnp.float32)],
        ),
        compiler_params=pltpu.CompilerParams(
            dimension_semantics=("parallel",),
        ),
    )(x_nhwc, w01a, w2a, b1, w01b, w2b, b2)


def basic_block_forward(x_nchw, w1, g1, be1, m1, v1, w2, g2, be2, m2, v2,
                        eps=1e-5, compute_dtype=jnp.bfloat16, pack_k=True):
    """NCHW convenience wrapper (does the layout plumbing once)."""
    N, C, H, W = x_nchw.shape
    Cp = max(128, _round_up(C, 128))
    x_nhwc = jnp.pad(jnp.transpose(x_nchw, (0, 2, 3, 1)).astype(jnp.float32),
                     ((0, 0), (0, 0), (0, 0), (0, Cp - C)))
    out = basic_block_forward_nhwc(x_nhwc, w1, g1, be1, m1, v1,
                                   w2, g2, be2, m2, v2, eps=eps,
                                   compute_dtype=compute_dtype, pack_k=pack_k,
                                   out_dtype=jnp.float32)
    return jnp.transpose(out[..., :C], (0, 3, 1, 2))


def basic_block_reference(x, w1, g1, be1, m1, v1, w2, g2, be2, m2, v2, eps=1e-5):
    """Pure-JAX reference (NCHW), mirrors the PyTorch forward in eval mode."""
    def conv(z, w):
        return jax.lax.conv_general_dilated(
            z, w, window_strides=(1, 1), padding=((1, 1), (1, 1)),
            dimension_numbers=("NCHW", "OIHW", "NCHW"))

    def bn(z, g, b, m, v):
        s = g / jnp.sqrt(v + eps)
        return z * s[None, :, None, None] + (b - m * s)[None, :, None, None]

    o = jnp.maximum(bn(conv(x, w1), g1, be1, m1, v1), 0.0)
    o = bn(conv(o, w2), g2, be2, m2, v2)
    return jnp.maximum(o + x, 0.0)


if __name__ == "__main__":
    # Small shapes: N=2, inplanes=planes=8, H=W=16 (stride=1, no downsample).
    N, C, H, W = 2, 8, 16, 16
    key = jax.random.PRNGKey(0)
    ks = jax.random.split(key, 11)

    x = jax.random.normal(ks[0], (N, C, H, W), jnp.float32)

    w1 = jax.random.normal(ks[1], (C, C, 3, 3), jnp.float32) * 0.1
    g1 = 1.0 + 0.1 * jax.random.normal(ks[2], (C,), jnp.float32)
    be1 = 0.1 * jax.random.normal(ks[3], (C,), jnp.float32)
    m1 = 0.1 * jax.random.normal(ks[4], (C,), jnp.float32)
    v1 = jnp.abs(jax.random.normal(ks[5], (C,), jnp.float32)) + 0.5

    w2 = jax.random.normal(ks[6], (C, C, 3, 3), jnp.float32) * 0.1
    g2 = 1.0 + 0.1 * jax.random.normal(ks[7], (C,), jnp.float32)
    be2 = 0.1 * jax.random.normal(ks[8], (C,), jnp.float32)
    m2 = 0.1 * jax.random.normal(ks[9], (C,), jnp.float32)
    v2 = jnp.abs(jax.random.normal(ks[10], (C,), jnp.float32)) + 0.5

    ref = basic_block_reference(x, w1, g1, be1, m1, v1, w2, g2, be2, m2, v2)

    # Default path: bf16 operands/weights + K=256 packing (v6e/v7x style),
    # f32 accumulation + epilogue.
    out_bf16 = basic_block_forward(x, w1, g1, be1, m1, v1, w2, g2, be2, m2, v2)
    out_bf16 = jax.block_until_ready(out_bf16)
    assert out_bf16.shape == (N, C, H, W)
    assert jnp.allclose(out_bf16, ref, atol=5e-2, rtol=5e-2), (
        f"bf16 max abs err {jnp.max(jnp.abs(out_bf16 - ref))}")

    # f32 operands + K=128 per-tap matmuls (v5e-style path), tight tolerance.
    out_f32 = basic_block_forward(x, w1, g1, be1, m1, v1, w2, g2, be2, m2, v2,
                                  compute_dtype=jnp.float32, pack_k=False)
    out_f32 = jax.block_until_ready(out_f32)
    assert jnp.allclose(out_f32, ref, atol=1e-4, rtol=1e-4), (
        f"f32 max abs err {jnp.max(jnp.abs(out_f32 - ref))}")

    print("KERNEL_OK")
</pallas_src>

<mosaic_0001>
module attributes {stable_mosaic.version = 11 : i64} {
  func.func @basic_block_kernel(%arg0: i32, %arg1: memref<1x16x16x128xf32, #tpu.memory_space<vmem>>, %arg2: memref<3x256x128xbf16, #tpu.memory_space<vmem>>, %arg3: memref<3x128x128xbf16, #tpu.memory_space<vmem>>, %arg4: memref<1x128xf32, #tpu.memory_space<vmem>>, %arg5: memref<3x256x128xbf16, #tpu.memory_space<vmem>>, %arg6: memref<3x128x128xbf16, #tpu.memory_space<vmem>>, %arg7: memref<1x128xf32, #tpu.memory_space<vmem>>, %arg8: memref<1x16x16x128xf32, #tpu.memory_space<vmem>>, %arg9: memref<256x128xf32, #tpu.memory_space<vmem>>) attributes {dimension_semantics = [#tpu.dimension_semantics<parallel>], iteration_bounds = array<i64: 2>, scalar_prefetch = 0 : i64, scratch_operands = 1 : i64, tpu.core_type = #tpu.core_type<tc>, window_params = [{transform_indices = @transform_0, window_bounds = array<i64: 1, 16, 16, 128>}, {pipeline_mode = #tpu.pipeline_mode<synchronous>, transform_indices = @transform_1, window_bounds = array<i64: 3, 256, 128>}, {pipeline_mode = #tpu.pipeline_mode<synchronous>, transform_indices = @transform_2, window_bounds = array<i64: 3, 128, 128>}, {pipeline_mode = #tpu.pipeline_mode<synchronous>, transform_indices = @transform_3, window_bounds = array<i64: 1, 128>}, {pipeline_mode = #tpu.pipeline_mode<synchronous>, transform_indices = @transform_4, window_bounds = array<i64: 3, 256, 128>}, {pipeline_mode = #tpu.pipeline_mode<synchronous>, transform_indices = @transform_5, window_bounds = array<i64: 3, 128, 128>}, {pipeline_mode = #tpu.pipeline_mode<synchronous>, transform_indices = @transform_6, window_bounds = array<i64: 1, 128>}, {transform_indices = @transform_7, window_bounds = array<i64: 1, 16, 16, 128>}]} {
    %c0 = arith.constant 0 : index
    %c0_0 = arith.constant 0 : index
    %c0_1 = arith.constant 0 : index
    %c0_2 = arith.constant 0 : index
    %0 = vector.load %arg1[%c0, %c0_0, %c0_1, %c0_2] : memref<1x16x16x128xf32, #tpu.memory_space<vmem>>, vector<1x16x16x128xf32>
    %1 = vector.shape_cast %0 : vector<1x16x16x128xf32> to vector<16x16x128xf32>
    %2 = vector.shape_cast %1 : vector<16x16x128xf32> to vector<256x128xf32>
    %3 = tpu.iota {dimensions = array<i32: 0>} : vector<256x1xi32>
    %c16_i32 = arith.constant 16 : i32
    %c0_i32 = arith.constant 0 : i32
    %4 = arith.cmpi eq, %c16_i32, %c0_i32 : i32
    %c1_i32 = arith.constant 1 : i32
    %5 = arith.select %4, %c1_i32, %c16_i32 : i32
    %6 = vector.broadcast %5 : i32 to vector<256x1xi32>
    %7 = arith.remsi %3, %6 : vector<256x1xi32>
    %c0_i32_3 = arith.constant 0 : i32
    %8 = vector.broadcast %c0_i32_3 : i32 to vector<256x1xi32>
    %9 = arith.cmpi ne, %7, %8 : vector<256x1xi32>
    %c0_i32_4 = arith.constant 0 : i32
    %10 = vector.broadcast %c0_i32_4 : i32 to vector<256x1xi32>
    %11 = arith.cmpi slt, %7, %10 : vector<256x1xi32>
    %c0_i32_5 = arith.constant 0 : i32
    %12 = arith.cmpi slt, %5, %c0_i32_5 : i32
    %13 = vector.broadcast %12 : i1 to vector<256x1xi1>
    %14 = vector.broadcast %13 : vector<256x1xi1> to vector<256x1xi1>
    %15 = arith.xori %11, %14 : vector<256x1xi1>
    %16 = arith.andi %15, %9 : vector<256x1xi1>
    %17 = vector.broadcast %5 : i32 to vector<256x1xi32>
    %18 = arith.addi %7, %17 : vector<256x1xi32>
    %19 = arith.select %16, %18, %7 : vector<256x1xi1>, vector<256x1xi32>
    %c0_i32_6 = arith.constant 0 : i32
    %20 = vector.broadcast %c0_i32_6 : i32 to vector<256x1xi32>
    %21 = arith.cmpi ne, %19, %20 : vector<256x1xi32>
    %22 = arith.extui %21 : vector<256x1xi1> to vector<256x1xi32>
    %23 = arith.sitofp %22 : vector<256x1xi32> to vector<256x1xf32>
    %c15_i32 = arith.constant 15 : i32
    %24 = vector.broadcast %c15_i32 : i32 to vector<256x1xi32>
    %25 = arith.cmpi ne, %19, %24 : vector<256x1xi32>
    %26 = arith.extui %25 : vector<256x1xi1> to vector<256x1xi32>
    %27 = arith.sitofp %26 : vector<256x1xi32> to vector<256x1xf32>
    %c1_i32_7 = arith.constant 1 : i32
    %28 = tpu.dynamic_rotate %2 by %c1_i32_7 dim 0 : vector<256x128xf32>, i32 -> vector<256x128xf32>
    %29 = vector.broadcast %23 : vector<256x1xf32> to vector<256x128xf32>
    %30 = arith.mulf %28, %29 : vector<256x128xf32>
    %31 = arith.truncf %30 : vector<256x128xf32> to vector<256x128xbf16>
    %32 = arith.truncf %2 : vector<256x128xf32> to vector<256x128xbf16>
    %c255_i32 = arith.constant 255 : i32
    %33 = tpu.dynamic_rotate %2 by %c255_i32 dim 0 : vector<256x128xf32>, i32 -> vector<256x128xf32>
    %34 = vector.broadcast %27 : vector<256x1xf32> to vector<256x128xf32>
    %35 = arith.mulf %33, %34 : vector<256x128xf32>
    %36 = arith.truncf %35 : vector<256x128xf32> to vector<256x128xbf16>
    %37 = tpu.concatenate %31, %32 in 1 : vector<256x128xbf16>, vector<256x128xbf16> -> vector<256x256xbf16>
    %cst = arith.constant 0.000000e+00 : f32
    %38 = vector.broadcast %cst : f32 to vector<256x128xf32>
    %c0_8 = arith.constant 0 : index
    %c0_9 = arith.constant 0 : index
    %39 = vector.load %arg9[%c0_8, %c0_9] : memref<256x128xf32, #tpu.memory_space<vmem>>, vector<256x128xf32>
    tpu.vector_store %arg9[%c0_8, %c0_9], %38 {strides = array<i32>} : memref<256x128xf32, #tpu.memory_space<vmem>>, vector<256x128xf32>,
    %c0_10 = arith.constant 0 : index
    %c0_11 = arith.constant 0 : index
    %c0_12 = arith.constant 0 : index
    %40 = vector.load %arg2[%c0_10, %c0_11, %c0_12] : memref<3x256x128xbf16, #tpu.memory_space<vmem>>, vector<1x256x128xbf16>
    %41 = vector.shape_cast %40 : vector<1x256x128xbf16> to vector<256x128xbf16>
    %cst_13 = arith.constant dense<0.000000e+00> : vector<256x128xf32>
    %42 = tpu.matmul %37, %41, %cst_13 {dimension_numbers = #tpu.dot_dimension_numbers<[1], [0], [0], [1], [0, 0, 1, 1], [], []>} : vector<256x256xbf16>, vector<256x128xbf16>, vector<256x128xf32> -> vector<256x128xf32>
    %c0_14 = arith.constant 0 : index
    %c0_15 = arith.constant 0 : index
    %c0_16 = arith.constant 0 : index
    %43 = vector.load %arg3[%c0_14, %c0_15, %c0_16] : memref<3x128x128xbf16, #tpu.memory_space<vmem>>, vector<1x128x128xbf16>
    %44 = vector.shape_cast %43 : vector<1x128x128xbf16> to vector<128x128xbf16>
    %cst_17 = arith.constant dense<0.000000e+00> : vector<256x128xf32>
    %45 = tpu.matmul %36, %44, %cst_17 {dimension_numbers = #tpu.dot_dimension_numbers<[1], [0], [0], [1], [0, 0, 1, 1], [], []>} : vector<256x128xbf16>, vector<128x128xbf16>, vector<256x128xf32> -> vector<256x128xf32>
    %46 = arith.addf %42, %45 : vector<256x128xf32>
    %c16 = arith.constant 16 : index
    %c0_18 = arith.constant 0 : index
    %47 = vector.load %arg9[%c16, %c0_18] : memref<256x128xf32, #tpu.memory_space<vmem>>, vector<240x128xf32>
    %48 = vector.extract_strided_slice %46 {offsets = [0, 0], sizes = [240, 128], strides = [1, 1]} : vector<256x128xf32> to vector<240x128xf32>
    %49 = arith.addf %47, %48 : vector<240x128xf32>
    %c16_19 = arith.constant 16 : index
    %c0_20 = arith.constant 0 : index
    %50 = vector.load %arg9[%c16_19, %c0_20] : memref<256x128xf32, #tpu.memory_space<vmem>>, vector<240x128xf32>
    tpu.vector_store %arg9[%c16_19, %c0_20], %49 {strides = array<i32>} : memref<256x128xf32, #tpu.memory_space<vmem>>, vector<240x128xf32>,
    %c1 = arith.constant 1 : index
    %c0_21 = arith.constant 0 : index
    %c0_22 = arith.constant 0 : index
    %51 = vector.load %arg2[%c1, %c0_21, %c0_22] : memref<3x256x128xbf16, #tpu.memory_space<vmem>>, vector<1x256x128xbf16>
    %52 = vector.shape_cast %51 : vector<1x256x128xbf16> to vector<256x128xbf16>
    %cst_23 = arith.constant dense<0.000000e+00> : vector<256x128xf32>
    %53 = tpu.matmul %37, %52, %cst_23 {dimension_numbers = #tpu.dot_dimension_numbers<[1], [0], [0], [1], [0, 0, 1, 1], [], []>} : vector<256x256xbf16>, vector<256x128xbf16>, vector<256x128xf32> -> vector<256x128xf32>
    %c1_24 = arith.constant 1 : index
    %c0_25 = arith.constant 0 : index
    %c0_26 = arith.constant 0 : index
    %54 = vector.load %arg3[%c1_24, %c0_25, %c0_26] : memref<3x128x128xbf16, #tpu.memory_space<vmem>>, vector<1x128x128xbf16>
    %55 = vector.shape_cast %54 : vector<1x128x128xbf16> to vector<128x128xbf16>
    %cst_27 = arith.constant dense<0.000000e+00> : vector<256x128xf32>
    %56 = tpu.matmul %36, %55, %cst_27 {dimension_numbers = #tpu.dot_dimension_numbers<[1], [0], [0], [1], [0, 0, 1, 1], [], []>} : vector<256x128xbf16>, vector<128x128xbf16>, vector<256x128xf32> -> vector<256x128xf32>
    %57 = arith.addf %53, %56 : vector<256x128xf32>
    %c0_28 = arith.constant 0 : index
    %c0_29 = arith.constant 0 : index
    %58 = vector.load %arg9[%c0_28, %c0_29] : memref<256x128xf32, #tpu.memory_space<vmem>>, vector<256x128xf32>
    %59 = arith.addf %58, %57 : vector<256x128xf32>
    %c0_30 = arith.constant 0 : index
    %c0_31 = arith.constant 0 : index
    %60 = vector.load %arg9[%c0_30, %c0_31] : memref<256x128xf32, #tpu.memory_space<vmem>>, vector<256x128xf32>
    tpu.vector_store %arg9[%c0_30, %c0_31], %59 {strides = array<i32>} : memref<256x128xf32, #tpu.memory_space<vmem>>, vector<256x128xf32>,
    %c2 = arith.constant 2 : index
    %c0_32 = arith.constant 0 : index
    %c0_33 = arith.constant 0 : index
    %61 = vector.load %arg2[%c2, %c0_32, %c0_33] : memref<3x256x128xbf16, #tpu.memory_space<vmem>>, vector<1x256x128xbf16>
    %62 = vector.shape_cast %61 : vector<1x256x128xbf16> to vector<256x128xbf16>
    %cst_34 = arith.constant dense<0.000000e+00> : vector<256x128xf32>
    %63 = tpu.matmul %37, %62, %cst_34 {dimension_numbers = #tpu.dot_dimension_numbers<[1], [0], [0], [1], [0, 0, 1, 1], [], []>} : vector<256x256xbf16>, vector<256x128xbf16>, vector<256x128xf32> -> vector<256x128xf32>
    %c2_35 = arith.constant 2 : index
    %c0_36 = arith.constant 0 : index
    %c0_37 = arith.constant 0 : index
    %64 = vector.load %arg3[%c2_35, %c0_36, %c0_37] : memref<3x128x128xbf16, #tpu.memory_space<vmem>>, vector<1x128x128xbf16>
    %65 = vector.shape_cast %64 : vector<1x128x128xbf16> to vector<128x128xbf16>
    %cst_38 = arith.constant dense<0.000000e+00> : vector<256x128xf32>
    %66 = tpu.matmul %36, %65, %cst_38 {dimension_numbers = #tpu.dot_dimension_numbers<[1], [0], [0], [1], [0, 0, 1, 1], [], []>} : vector<256x128xbf16>, vector<128x128xbf16>, vector<256x128xf32> -> vector<256x128xf32>
    %67 = arith.addf %63, %66 : vector<256x128xf32>
    %c0_39 = arith.constant 0 : index
    %c0_40 = arith.constant 0 : index
    %68 = vector.load %arg9[%c0_39, %c0_40] : memref<256x128xf32, #tpu.memory_space<vmem>>, vector<240x128xf32>
    %69 = vector.extract_strided_slice %67 {offsets = [16, 0], sizes = [240, 128], strides = [1, 1]} : vector<256x128xf32> to vector<240x128xf32>
    %70 = arith.addf %68, %69 : vector<240x128xf32>
    %c0_41 = arith.constant 0 : index
    %c0_42 = arith.constant 0 : index
    %71 = vector.load %arg9[%c0_41, %c0_42] : memref<256x128xf32, #tpu.memory_space<vmem>>, vector<240x128xf32>
    tpu.vector_store %arg9[%c0_41, %c0_42], %70 {strides = array<i32>} : memref<256x128xf32, #tpu.memory_space<vmem>>, vector<240x128xf32>,
    %c0_43 = arith.constant 0 : index
    %c0_44 = arith.constant 0 : index
    %72 = vector.load %arg9[%c0_43, %c0_44] : memref<256x128xf32, #tpu.memory_space<vmem>>, vector<256x128xf32>
    %c0_45 = arith.constant 0 : index
    %c0_46 = arith.constant 0 : index
    %73 = vector.load %arg4[%c0_45, %c0_46] : memref<1x128xf32, #tpu.memory_space<vmem>>, vector<1x128xf32>
    %74 = vector.broadcast %73 : vector<1x128xf32> to vector<256x128xf32>
    %75 = arith.addf %72, %74 : vector<256x128xf32>
    %cst_47 = arith.constant 0.000000e+00 : f32
    %76 = vector.broadcast %cst_47 : f32 to vector<256x128xf32>
    %77 = arith.maximumf %75, %76 : vector<256x128xf32>
    %c1_i32_48 = arith.constant 1 : i32
    %78 = tpu.dynamic_rotate %77 by %c1_i32_48 dim 0 : vector<256x128xf32>, i32 -> vector<256x128xf32>
    %79 = vector.broadcast %23 : vector<256x1xf32> to vector<256x128xf32>
    %80 = arith.mulf %78, %79 : vector<256x128xf32>
    %81 = arith.truncf %80 : vector<256x128xf32> to vector<256x128xbf16>
    %82 = arith.truncf %77 : vector<256x128xf32> to vector<256x128xbf16>
    %c255_i32_49 = arith.constant 255 : i32
    %83 = tpu.dynamic_rotate %77 by %c255_i32_49 dim 0 : vector<256x128xf32>, i32 -> vector<256x128xf32>
    %84 = vector.broadcast %27 : vector<256x1xf32> to vector<256x128xf32>
    %85 = arith.mulf %83, %84 : vector<256x128xf32>
    %86 = arith.truncf %85 : vector<256x128xf32> to vector<256x128xbf16>
    %87 = tpu.concatenate %81, %82 in 1 : vector<256x128xbf16>, vector<256x128xbf16> -> vector<256x256xbf16>
    %cst_50 = arith.constant 0.000000e+00 : f32
    %88 = vector.broadcast %cst_50 : f32 to vector<256x128xf32>
    %c0_51 = arith.constant 0 : index
    %c0_52 = arith.constant 0 : index
    %89 = vector.load %arg9[%c0_51, %c0_52] : memref<256x128xf32, #tpu.memory_space<vmem>>, vector<256x128xf32>
    tpu.vector_store %arg9[%c0_51, %c0_52], %88 {strides = array<i32>} : memref<256x128xf32, #tpu.memory_space<vmem>>, vector<256x128xf32>,
    %c0_53 = arith.constant 0 : index
    %c0_54 = arith.constant 0 : index
    %c0_55 = arith.constant 0 : index
    %90 = vector.load %arg5[%c0_53, %c0_54, %c0_55] : memref<3x256x128xbf16, #tpu.memory_space<vmem>>, vector<1x256x128xbf16>
    %91 = vector.shape_cast %90 : vector<1x256x128xbf16> to vector<256x128xbf16>
    %cst_56 = arith.constant dense<0.000000e+00> : vector<256x128xf32>
    %92 = tpu.matmul %87, %91, %cst_56 {dimension_numbers = #tpu.dot_dimension_numbers<[1], [0], [0], [1], [0, 0, 1, 1], [], []>} : vector<256x256xbf16>, vector<256x128xbf16>, vector<256x128xf32> -> vector<256x128xf32>
    %c0_57 = arith.constant 0 : index
    %c0_58 = arith.constant 0 : index
    %c0_59 = arith.constant 0 : index
    %93 = vector.load %arg6[%c0_57, %c0_58, %c0_59] : memref<3x128x128xbf16, #tpu.memory_space<vmem>>, vector<1x128x128xbf16>
    %94 = vector.shape_cast %93 : vector<1x128x128xbf16> to vector<128x128xbf16>
    %cst_60 = arith.constant dense<0.000000e+00> : vector<256x128xf32>
    %95 = tpu.matmul %86, %94, %cst_60 {dimension_numbers = #tpu.dot_dimension_numbers<[1], [0], [0], [1], [0, 0, 1, 1], [], []>} : vector<256x128xbf16>, vector<128x128xbf16>, vector<256x128xf32> -> vector<256x128xf32>
    %96 = arith.addf %92, %95 : vector<256x128xf32>
    %c16_61 = arith.constant 16 : index
    %c0_62 = arith.constant 0 : index
    %97 = vector.load %arg9[%c16_61, %c0_62] : memref<256x128xf32, #tpu.memory_space<vmem>>, vector<240x128xf32>
    %98 = vector.extract_strided_slice %96 {offsets = [0, 0], sizes = [240, 128], strides = [1, 1]} : vector<256x128xf32> to vector<240x128xf32>
    %99 = arith.addf %97, %98 : vector<240x128xf32>
    %c16_63 = arith.constant 16 : index
    %c0_64 = arith.constant 0 : index
    %100 = vector.load %arg9[%c16_63, %c0_64] : memref<256x128xf32, #tpu.memory_space<vmem>>, vector<240x128xf32>
    tpu.vector_store %arg9[%c16_63, %c0_64], %99 {strides = array<i32>} : memref<256x128xf32, #tpu.memory_space<vmem>>, vector<240x128xf32>,
    %c1_65 = arith.constant 1 : index
    %c0_66 = arith.constant 0 : index
    %c0_67 = arith.constant 0 : index
    %101 = vector.load %arg5[%c1_65, %c0_66, %c0_67] : memref<3x256x128xbf16, #tpu.memory_space<vmem>>, vector<1x256x128xbf16>
    %102 = vector.shape_cast %101 : vector<1x256x128xbf16> to vector<256x128xbf16>
    %cst_68 = arith.constant dense<0.000000e+00> : vector<256x128xf32>
    %103 = tpu.matmul %87, %102, %cst_68 {dimension_numbers = #tpu.dot_dimension_numbers<[1], [0], [0], [1], [0, 0, 1, 1], [], []>} : vector<256x256xbf16>, vector<256x128xbf16>, vector<256x128xf32> -> vector<256x128xf32>
    %c1_69 = arith.constant 1 : index
    %c0_70 = arith.constant 0 : index
    %c0_71 = arith.constant 0 : index
    %104 = vector.load %arg6[%c1_69, %c0_70, %c0_71] : memref<3x128x128xbf16, #tpu.memory_space<vmem>>, vector<1x128x128xbf16>
    %105 = vector.shape_cast %104 : vector<1x128x128xbf16> to vector<128x128xbf16>
    %cst_72 = arith.constant dense<0.000000e+00> : vector<256x128xf32>
    %106 = tpu.matmul %86, %105, %cst_72 {dimension_numbers = #tpu.dot_dimension_numbers<[1], [0], [0], [1], [0, 0, 1, 1], [], []>} : vector<256x128xbf16>, vector<128x128xbf16>, vector<256x128xf32> -> vector<256x128xf32>
    %107 = arith.addf %103, %106 : vector<256x128xf32>
    %c0_73 = arith.constant 0 : index
    %c0_74 = arith.constant 0 : index
    %108 = vector.load %arg9[%c0_73, %c0_74] : memref<256x128xf32, #tpu.memory_space<vmem>>, vector<256x128xf32>
    %109 = arith.addf %108, %107 : vector<256x128xf32>
    %c0_75 = arith.constant 0 : index
    %c0_76 = arith.constant 0 : index
    %110 = vector.load %arg9[%c0_75, %c0_76] : memref<256x128xf32, #tpu.memory_space<vmem>>, vector<256x128xf32>
    tpu.vector_store %arg9[%c0_75, %c0_76], %109 {strides = array<i32>} : memref<256x128xf32, #tpu.memory_space<vmem>>, vector<256x128xf32>,
    %c2_77 = arith.constant 2 : index
    %c0_78 = arith.constant 0 : index
    %c0_79 = arith.constant 0 : index
    %111 = vector.load %arg5[%c2_77, %c0_78, %c0_79] : memref<3x256x128xbf16, #tpu.memory_space<vmem>>, vector<1x256x128xbf16>
    %112 = vector.shape_cast %111 : vector<1x256x128xbf16> to vector<256x128xbf16>
    %cst_80 = arith.constant dense<0.000000e+00> : vector<256x128xf32>
    %113 = tpu.matmul %87, %112, %cst_80 {dimension_numbers = #tpu.dot_dimension_numbers<[1], [0], [0], [1], [0, 0, 1, 1], [], []>} : vector<256x256xbf16>, vector<256x128xbf16>, vector<256x128xf32> -> vector<256x128xf32>
    %c2_81 = arith.constant 2 : index
    %c0_82 = arith.constant 0 : index
    %c0_83 = arith.constant 0 : index
    %114 = vector.load %arg6[%c2_81, %c0_82, %c0_83] : memref<3x128x128xbf16, #tpu.memory_space<vmem>>, vector<1x128x128xbf16>
    %115 = vector.shape_cast %114 : vector<1x128x128xbf16> to vector<128x128xbf16>
    %cst_84 = arith.constant dense<0.000000e+00> : vector<256x128xf32>
    %116 = tpu.matmul %86, %115, %cst_84 {dimension_numbers = #tpu.dot_dimension_numbers<[1], [0], [0], [1], [0, 0, 1, 1], [], []>} : vector<256x128xbf16>, vector<128x128xbf16>, vector<256x128xf32> -> vector<256x128xf32>
    %117 = arith.addf %113, %116 : vector<256x128xf32>
    %c0_85 = arith.constant 0 : index
    %c0_86 = arith.constant 0 : index
    %118 = vector.load %arg9[%c0_85, %c0_86] : memref<256x128xf32, #tpu.memory_space<vmem>>, vector<240x128xf32>
    %119 = vector.extract_strided_slice %117 {offsets = [16, 0], sizes = [240, 128], strides = [1, 1]} : vector<256x128xf32> to vector<240x128xf32>
    %120 = arith.addf %118, %119 : vector<240x128xf32>
    %c0_87 = arith.constant 0 : index
    %c0_88 = arith.constant 0 : index
    %121 = vector.load %arg9[%c0_87, %c0_88] : memref<256x128xf32, #tpu.memory_space<vmem>>, vector<240x128xf32>
    tpu.vector_store %arg9[%c0_87, %c0_88], %120 {strides = array<i32>} : memref<256x128xf32, #tpu.memory_space<vmem>>, vector<240x128xf32>,
    %c0_89 = arith.constant 0 : index
    %c0_90 = arith.constant 0 : index
    %122 = vector.load %arg9[%c0_89, %c0_90] : memref<256x128xf32, #tpu.memory_space<vmem>>, vector<256x128xf32>
    %c0_91 = arith.constant 0 : index
    %c0_92 = arith.constant 0 : index
    %123 = vector.load %arg7[%c0_91, %c0_92] : memref<1x128xf32, #tpu.memory_space<vmem>>, vector<1x128xf32>
    %124 = vector.broadcast %123 : vector<1x128xf32> to vector<256x128xf32>
    %125 = arith.addf %122, %124 : vector<256x128xf32>
    %126 = arith.addf %125, %2 : vector<256x128xf32>
    %cst_93 = arith.constant 0.000000e+00 : f32
    %127 = vector.broadcast %cst_93 : f32 to vector<256x128xf32>
    %128 = arith.maximumf %126, %127 : vector<256x128xf32>
    %129 = vector.shape_cast %128 : vector<256x128xf32> to vector<16x16x128xf32>
    %c0_94 = arith.constant 0 : index
    %c0_95 = arith.constant 0 : index
    %c0_96 = arith.constant 0 : index
    %c0_97 = arith.constant 0 : index
    %130 = vector.load %arg8[%c0_94, %c0_95, %c0_96, %c0_97] : memref<1x16x16x128xf32, #tpu.memory_space<vmem>>, vector<1x16x16x128xf32>
    %131 = vector.shape_cast %130 : vector<1x16x16x128xf32> to vector<16x16x128xf32>
    %132 = vector.shape_cast %129 : vector<16x16x128xf32> to vector<1x16x16x128xf32>
    tpu.vector_store %arg8[%c0_94, %c0_95, %c0_96, %c0_97], %132 {strides = array<i32>} : memref<1x16x16x128xf32, #tpu.memory_space<vmem>>, vector<1x16x16x128xf32>,
    return
  }
  func.func @transform_0(%arg0: i32) -> (i32, i32, i32, i32) {
    %c0_i32 = arith.constant 0 : i32
    %c0_i32_0 = arith.constant 0 : i32
    %c0_i32_1 = arith.constant 0 : i32
    %c0_i32_2 = arith.constant 0 : i32
    return %arg0, %c0_i32, %c0_i32_0, %c0_i32_1 : i32, i32, i32, i32
  }
  func.func @transform_1(%arg0: i32) -> (i32, i32, i32) {
    %c0_i32 = arith.constant 0 : i32
    %c0_i32_0 = arith.constant 0 : i32
    %c0_i32_1 = arith.constant 0 : i32
    %c0_i32_2 = arith.constant 0 : i32
    return %c0_i32, %c0_i32_0, %c0_i32_1 : i32, i32, i32
  }
  func.func @transform_2(%arg0: i32) -> (i32, i32, i32) {
    %c0_i32 = arith.constant 0 : i32
    %c0_i32_0 = arith.constant 0 : i32
    %c0_i32_1 = arith.constant 0 : i32
    %c0_i32_2 = arith.constant 0 : i32
    return %c0_i32, %c0_i32_0, %c0_i32_1 : i32, i32, i32
  }
  func.func @transform_3(%arg0: i32) -> (i32, i32) {
    %c0_i32 = arith.constant 0 : i32
    %c0_i32_0 = arith.constant 0 : i32
    %c0_i32_1 = arith.constant 0 : i32
    return %c0_i32, %c0_i32_0 : i32, i32
  }
  func.func @transform_4(%arg0: i32) -> (i32, i32, i32) {
    %c0_i32 = arith.constant 0 : i32
    %c0_i32_0 = arith.constant 0 : i32
    %c0_i32_1 = arith.constant 0 : i32
    %c0_i32_2 = arith.constant 0 : i32
    return %c0_i32, %c0_i32_0, %c0_i32_1 : i32, i32, i32
  }
  func.func @transform_5(%arg0: i32) -> (i32, i32, i32) {
    %c0_i32 = arith.constant 0 : i32
    %c0_i32_0 = arith.constant 0 : i32
    %c0_i32_1 = arith.constant 0 : i32
    %c0_i32_2 = arith.constant 0 : i32
    return %c0_i32, %c0_i32_0, %c0_i32_1 : i32, i32, i32
  }
  func.func @transform_6(%arg0: i32) -> (i32, i32) {
    %c0_i32 = arith.constant 0 : i32
    %c0_i32_0 = arith.constant 0 : i32
    %c0_i32_1 = arith.constant 0 : i32
    return %c0_i32, %c0_i32_0 : i32, i32
  }
  func.func @transform_7(%arg0: i32) -> (i32, i32, i32, i32) {
    %c0_i32 = arith.constant 0 : i32
    %c0_i32_0 = arith.constant 0 : i32
    %c0_i32_1 = arith.constant 0 : i32
    %c0_i32_2 = arith.constant 0 : i32
    return %arg0, %c0_i32, %c0_i32_0, %c0_i32_1 : i32, i32, i32, i32
  }
}

</mosaic_0001>

<bundles_post_ra>
// kernel: tpu_custom_call.1
= control target key start
LH: loop header
LB: loop body
LE: loop exit
PB: predicated region body
PF: predicated region fallthrough
CT: control target
= control target key end

     0   :  { %12 = vsyncpa [#allocation4], 0  ;;  %s9851_s0 = inlined_call_operand.hbm [shape: f32[2,16,16,128], index: 0, kind: input, shape index: {}]   ;;  %s9852_s1 = inlined_call_operand.hbm [shape: bf16[3,256,128], index: 1, kind: input, shape index: {}]   ;;  %s9853_s2 = inlined_call_operand.hbm [shape: bf16[3,128,128], index: 2, kind: input, shape index: {}]   ;;  %s9854_s3 = inlined_call_operand.vmem [shape: f32[1,128], index: 3, kind: input, shape index: {}]   ;;  %s9855_s4 = inlined_call_operand.hbm [shape: bf16[3,256,128], index: 4, kind: input, shape index: {}]   ;;  %s9856_s5 = inlined_call_operand.hbm [shape: bf16[3,128,128], index: 5, kind: input, shape index: {}]   ;;  %s9857_s6 = inlined_call_operand.vmem [shape: f32[1,128], index: 6, kind: input, shape index: {}]   ;;  %s9858_s7 = inlined_call_operand.hbm [shape: f32[2,16,16,128], index: 7, kind: output, shape index: {}]  }
   0x1   :  { %14 = vsyncpa [#allocation4 + $0x1], 0 }
   0x2   :  { %15 = vsyncpa [#allocation7], 0 }
   0x3   :  { %16 = vsyncpa [#allocation10], 0 }
   0x4   :  { %17 = vsyncpa [#allocation5], 0 }
   0x5   :  { %19 = vsyncpa [#allocation5 + $0x1], 0  ;;  %s7432_s24 = smov 0   ;;  %s7434_s25 = smov 0  }
   0x6   :  { %s7436_s26 = smov 0   ;;  %s7438_s27 = smov 0  }
   0x7 LB: > { %s7453_s28 = sadd.s32 4294967295, %s7377_s27   ;;  %s5566_s29 = sadd.s32 4294967294, %s7377_s27   ;;  %s7377_s27 = sphi %s7438_s27, %s10285_s27   ;;  %s7373_s26 = sphi %s7436_s26, %s10284_s26   ;;  %s7369_s25 = sphi %s7434_s25, %s10283_s25   ;;  %s7365_s24 = sphi %s7432_s24, %s10282_s24  }
   0x8   : > { %p45_p0 = scmp.ne.s32.totalorder %s7369_s25, %s7365_s24  ;;  %p9859_p1 = scmp.eq.s32.totalorder %s7453_s28, 0 }
   0x9   : > { %p201_p3 = scmp.eq.s32.totalorder %s5566_s29, 1  ;;  %p5567_p5 = scmp.ge.s32.totalorder %s7377_s27, 1 }
   0xa   : > { %p7462_p4 = por %p9859_p1, %p45_p0  ;;  %p208_p7 = scmp.lt.s32.totalorder %s7377_s27, 3 }
   0xb   : > { %p7467_p6 = por %p201_p3, %p45_p0  ;;  %s7379_s10 = smov [#allocation6]  }
   0xc   : > { %s9933_s30 = scalar_select %p7462_p4, 1, 0 }
   0xd   : > { %s9934_s8 = scalar_select %p7467_p6, 1, 0 }
   0xe   : > { %p7472_p8 = pnand %p5567_p5, %p208_p7  ;;  %s220_s11 = sshll.u32 %s7379_s10, 4  ;;  %s7476_s11 = int_to_ptr.vmem [resolvable:$true] %s220_s11 }
   0xf   : > { %9935 = sst [smem:[#allocation17_spill]] %s9934_s8  ;;  %s7380_s13 = smov [#allocation9]  }
  0x10   : > { %s9936_s9 = scalar_select %p7472_p8, 1, 0 }
  0x11   : > { %p6892_p9 = pneg %p7472_p8  ;;  %s249_s14 = sshll.u32 %s7380_s13, 4  ;;  %s7487_s14 = int_to_ptr.vmem [resolvable:$true] %s249_s14 }
  0x12   : > { %s7381_s15 = smov [#allocation8]   ;;  %s7161_s19 = scalar_lea.hbm %s9852_s1, 6144 }
  0x13   : > { %p7483_p11 = pnand %p6892_p9, %p9859_p1  ;;  %s7489_s16 = sshll.u32 %s7381_s15, 4  ;;  %s234_s16 = int_to_ptr.vmem [resolvable:$true] %s7489_s16 }
  0x14   : > { %p7162_p12 = scmp.ne.s32.totalorder %s9852_s1, %s7161_s19  ;;  %p7168_p5 = scmp.lt.u32.totalorder %s7161_s19, %s9852_s1 }
  0x15   : > { %p7499_p13 = pneg %p7483_p11 }
  0x17   : > { %p7164_p0 = pnand %p7499_p13, %p7162_p12 }
  0x19   : > { %p7165_p3 = pneg %p7164_p0 }
  0x1b   : > { %p7170_p7 = pnand %p7168_p5, %p7165_p3 }
  0x1d   : > { %7173 = shalt.err (!%p7170_p7)
}
  0x1e   : > { %s7174_s10 = scalar_lea.vmem %s7476_s11, 6144  ;;  %p7182_p2 = scmp.lt.s32.totalorder %s7476_s11, %s7476_s11 }
  0x1f   : > { %p7175_p9 = scmp.ne.s32.totalorder %s7476_s11, %s7174_s10  ;;  %p7183_p6 = scmp.lt.s32.totalorder %s7174_s10, %s7174_s10 }
  0x21   : > { %p7177_p10 = pnand %p7175_p9, %p7499_p13  ;;  %p7184_p12 = por %p7183_p6, %p7182_p2 }
  0x23   : > { %p7178_p1 = pneg %p7177_p10 }
  0x25   : > { %p7185_p0 = pnand %p7184_p12, %p7178_p1 }
  0x27   : > { %7188 = shalt.err (!%p7185_p0)
}
  0x28   : > { %s7382_s13 = smov 64   ;;  %s7383_s15 = smov 4  }
  0x29   : > { %6895 = dma.hbm_to_vmem [thread:$0]  (!%p7483_p11), %s9852_s1, 6144, %s7476_s11, [#allocation7], %s7382_s13, %s7382_s13, %s7383_s15  }
  0x2a   : > { %s7189_s21 = scalar_lea.hbm %s9855_s4, 6144 }
  0x2b   : > { %p7190_p1 = scmp.ne.s32.totalorder %s9855_s4, %s7189_s21  ;;  %p7196_p10 = scmp.lt.u32.totalorder %s7189_s21, %s9855_s4 }
  0x2d   : > { %p7192_p2 = pnand %p7190_p1, %p7499_p13 }
  0x2f   : > { %p7193_p6 = pneg %p7192_p2 }
  0x31   : > { %p7198_p3 = pnand %p7196_p10, %p7193_p6 }
  0x33   : > { %7201 = shalt.err (!%p7198_p3)
}
  0x34   : > { %s7202_s11 = scalar_lea.vmem %s7487_s14, 6144  ;;  %p7210_p12 = scmp.lt.s32.totalorder %s7487_s14, %s7487_s14 }
  0x35   : > { %p7203_p5 = scmp.ne.s32.totalorder %s7487_s14, %s7202_s11  ;;  %p7211_p0 = scmp.lt.s32.totalorder %s7202_s11, %s7202_s11 }
  0x37   : > { %p7205_p7 = pnand %p7203_p5, %p7499_p13  ;;  %p7212_p1 = por %p7211_p0, %p7210_p12 }
  0x39   : > { %p7206_p9 = pneg %p7205_p7 }
  0x3b   : > { %p7213_p2 = pnand %p7212_p1, %p7206_p9 }
  0x3d   : > { %7216 = shalt.err (!%p7213_p2)
}
  0x3e   : > { %6901 = dma.hbm_to_vmem [thread:$0]  (!%p7483_p11), %s9855_s4, 6144, %s7487_s14, [#allocation10], %s7382_s13, %s7382_s13, %s7383_s15  }
  0x3f   : > { %s7217_s20 = scalar_lea.hbm %s9853_s2, 3072 }
  0x40   : > { %p7218_p6 = scmp.ne.s32.totalorder %s9853_s2, %s7217_s20  ;;  %p7224_p5 = scmp.lt.u32.totalorder %s7217_s20, %s9853_s2 }
  0x42   : > { %p7220_p10 = pnand %p7218_p6, %p7499_p13 }
  0x44   : > { %p7221_p3 = pneg %p7220_p10 }
  0x46   : > { %p7226_p7 = pnand %p7224_p5, %p7221_p3 }
  0x48   : > { %7229 = shalt.err (!%p7226_p7)
}
  0x49   : > { %s7230_s11 = scalar_lea.vmem %s234_s16, 3072  ;;  %p7238_p1 = scmp.lt.s32.totalorder %s234_s16, %s234_s16 }
  0x4a   : > { %p7231_p9 = scmp.ne.s32.totalorder %s234_s16, %s7230_s11  ;;  %p7239_p2 = scmp.lt.s32.totalorder %s7230_s11, %s7230_s11 }
  0x4c   : > { %p7233_p12 = pnand %p7231_p9, %p7499_p13  ;;  %p7240_p4 = por %p7239_p2, %p7238_p1 }
  0x4e   : > { %p7234_p0 = pneg %p7233_p12 }
  0x50   : > { %p7241_p8 = pnand %p7240_p4, %p7234_p0 }
  0x52   : > { %7244 = shalt.err (!%p7241_p8)
}
  0x53   : > { %6898 = dma.hbm_to_vmem [thread:$0]  (!%p7483_p11), %s9853_s2, 3072, %s234_s16, [#allocation7], %s7382_s13, %s7382_s13, %s7383_s15  }
  0x54   : > { %s7384_s17 = smov [#allocation11]   ;;  %s7245_s21 = scalar_lea.hbm %s9856_s5, 3072 }
  0x55   : > { %s262_s18 = sshll.u32 %s7384_s17, 4  ;;  %p7246_p4 = scmp.ne.s32.totalorder %s9856_s5, %s7245_s21  ;;  %s263_s18 = int_to_ptr.vmem [resolvable:$true] %s262_s18 }
  0x56   : > { %p7252_p10 = scmp.lt.u32.totalorder %s7245_s21, %s9856_s5 }
  0x57   : > { %p7248_p8 = pnand %p7246_p4, %p7499_p13 }
  0x59   : > { %p7249_p6 = pneg %p7248_p8 }
  0x5b   : > { %p7254_p3 = pnand %p7252_p10, %p7249_p6 }
  0x5d   : > { %7257 = shalt.err (!%p7254_p3)
}
  0x5e   : > { %s7258_s16 = scalar_lea.vmem %s263_s18, 3072  ;;  %p7266_p12 = scmp.lt.s32.totalorder %s263_s18, %s263_s18 }
  0x5f   : > { %p7259_p5 = scmp.ne.s32.totalorder %s263_s18, %s7258_s16  ;;  %p7267_p0 = scmp.lt.s32.totalorder %s7258_s16, %s7258_s16 }
  0x61   : > { %p7261_p7 = pnand %p7259_p5, %p7499_p13  ;;  %p7268_p1 = por %p7267_p0, %p7266_p12 }
  0x63   : > { %p7262_p9 = pneg %p7261_p7 }
  0x65   : > { %p7269_p2 = pnand %p7268_p1, %p7262_p9 }
  0x67   : > { %7272 = shalt.err (!%p7269_p2)
}
  0x68   : > { %6904 = dma.hbm_to_vmem [thread:$0]  (!%p7483_p11), %s9856_s5, 3072, %s263_s18, [#allocation10], %s7382_s13, %s7382_s13, %s7383_s15  }
  0x69   : > { %s7593_s22 = sadd.s32 1, %s7377_s27   ;;  %s32_s12 = sadd.s32 1, %s7373_s26 }
  0x6a   : > { %s29_s17 = ssub.s32 %s7377_s27, %s7593_s22  ;;  %p39_p13 = scmp.ne.s32.totalorder %s7373_s26, %s7369_s25 }
  0x6b   : > { %p30_p4 = scmp.eq.s32.totalorder %s29_s17, 0  ;;  %p40_p8 = scmp.eq.s32.totalorder %s7377_s27, 0 }
  0x6c   : > { %p9939_p6 = scmp.eq.s32.totalorder %s7453_s28, 1  ;;  %p6917_p3 = scmp.lt.s32.totalorder %s7377_s27, 2 }
  0x6d   : > { %s7609_s20 = scalar_select %p30_p4, %s7373_s26, %s32_s12  }
  0x6e   : > { %p7603_p10 = por %p9939_p6, %p39_p13  ;;  %p41_p5 = por %p40_p8, %p39_p13 }
  0x6f   : > { %s279_s21 = sand.u32 1, %s7373_s26   ;;  %s5766_s13 = sshll.u32 %s7377_s27, 12 }
  0x70   : > { %s5573_s23 = sshll.u32 %s279_s21, 8  ;;  %s7616_s29 = scalar_lea.hbm %s9851_s0, %s5766_s13 }
  0x71   : > { %s283_s10 = scalar_lea.vmem [#allocation3], %s5573_s23  ;;  %p7620_p11 = pnand %p6917_p3, %p41_p5 }
  0x72   : > { %s290_s11 = sshll.u32 %s283_s10, 4  ;;  %s7624_s14 = scalar_lea.sflag [#allocation4], %s279_s21  ;;  %s7618_s11 = int_to_ptr.vmem [resolvable:$true] %s290_s11 }
  0x73   : > { %s7273_s8 = scalar_lea.hbm %s7616_s29, 4096  ;;  %p7275_p9 = pneg %p7620_p11 }
  0x74   : > { %p7274_p7 = scmp.ne.s32.totalorder %s7616_s29, %s7273_s8  ;;  %s7278_s23 = scalar_lea.hbm %s9851_s0, 8192 }
  0x75   : > { %p7279_p1 = scmp.lt.u32.totalorder %s7616_s29, %s9851_s0  ;;  %p7280_p2 = scmp.lt.u32.totalorder %s7278_s23, %s7273_s8 }
  0x76   : > { %p7276_p12 = pnand %p7275_p9, %p7274_p7  ;;  %p7282_p4 = scmp.lt.u32.totalorder %s7273_s8, %s7616_s29 }
  0x77   : > { %p7281_p13 = por %p7280_p2, %p7279_p1 }
  0x78   : > { %p7277_p0 = pneg %p7276_p12 }
  0x79   : > { %p7283_p8 = por %p7282_p4, %p7281_p13 }
  0x7b   : > { %p7284_p6 = pnand %p7283_p8, %p7277_p0 }
  0x7d   : > { %7287 = shalt.err (!%p7284_p6)
}
  0x7e   : > { %s7288_s21 = scalar_lea.vmem %s7618_s11, 4096  ;;  %s7385_s18 = smov [#allocation3]  }
  0x7f   : > { %p7289_p3 = scmp.ne.s32.totalorder %s7618_s11, %s7288_s21  ;;  %s7293_s10 = sshll.u32 %s7385_s18, 4  ;;  %s7294_s10 = int_to_ptr.vmem [resolvable:$false] %s7293_s10 }
  0x80   : > { %s7295_s12 = scalar_lea.vmem %s7294_s10, 8192  ;;  %p7296_p12 = scmp.lt.s32.totalorder %s7618_s11, %s7294_s10 }
  0x81   : > { %p7291_p5 = pnand %p7289_p3, %p7275_p9  ;;  %p7297_p1 = scmp.lt.s32.totalorder %s7295_s12, %s7288_s21 }
  0x83   : > { %p7292_p7 = pneg %p7291_p5  ;;  %p7298_p2 = por %p7297_p1, %p7296_p12 }
  0x85   : > { %p7299_p13 = pnand %p7298_p2, %p7292_p7 }
  0x87   : > { %7302 = shalt.err (!%p7299_p13)
}
  0x88   : > { %s7386_s8 = smov 128   ;;  %s7387_s17 = smov 8  }
  0x89   : > { %6908 = dma.hbm_to_vmem [thread:$0]  (!%p7620_p11), %s7616_s29, 4096, %s7618_s11, %s7624_s14, %s7386_s8, %s7386_s8, %s7387_s17  }
  0x8a   : > { %p9942_p9 = scmp.ne.s32.totalorder %s9936_s9, 0 }
  0x8c   : > { %302 = sbr.rel (%p9942_p9) target bundleno = 1367 (0x557), region = 48 }
  0x93   : > { %s7655_s23 = sand.u32 1, %s7369_s25   ;;  %p9943_p0 = scmp.ne.s32.totalorder %s9933_s30, 0 }
  0x94   : > { %s5577_s13 = sshll.u32 %s7655_s23, 8  ;;  %s305_s15 = scalar_lea.sflag [#allocation4], %s7655_s23 }
  0x95   : > { %s7661_s21 = scalar_lea.vmem [#allocation3], %s5577_s13 }
  0x96   : > { %7348 = dma.done.wait (%p9943_p0), %s305_s15, 4096  }
  0x97   : > { %7350 = vsyncadd (%p9943_p0), %s305_s15, 4294963200  ;;  %p9944_p11 = scmp.eq.s32.totalorder %s7453_s28, 0 }
  0x99   : > { %7352 = dma.done.wait (%p9944_p11), [#allocation7], 9216   ;;  %p9945_p4 = pmov %p9944_p11 }
  0x9b   : > { %7354 = vsyncadd (%p9945_p4), [#allocation7], 4294958080  ;;  %p9946_p8 = pmov %p9945_p4 }
  0x9c   : > { %p9947_p6 = pmov %p9945_p4 }
  0x9d   : > { %7356 = dma.done.wait (%p9946_p8), [#allocation10], 9216  }
  0x9e   : > { %7358 = vsyncadd (%p9947_p6), [#allocation10], 4294958080  ;;  %v388_v0 = vlaneseq  ;;  %v6966_v1 = vld [vmem:[#allocation8] sm:$0xff]   ;;  %v6968_v4 = vld [vmem:[#allocation8 + $0x8] sm:$0xff]   ;;  %v9864_v20 = vmov 0.0   ;;  %s9598_s18 = scalar_lea.vmem [#allocation12], %s5577_s13 }
  0x9f   : > { %v6967_v2 = vld [vmem:[#allocation8 + $0x40] sm:$0xff]   ;;  %6584 = vmatprep.subr.bf16.mxu1 %v6966_v1  ;;  %v6969_v5 = vld [vmem:[#allocation8 + $0x48] sm:$0xff]   ;;  %v6970_v6 = vld [vmem:[#allocation8 + $0x10] sm:$0xff]   ;;  %s5767_s10 = sshll.u32 %s7453_s28, 12  ;;  %s5455_s12 = sshll.u32 %s9598_s18, 4  ;;  %s9805_s12 = int_to_ptr.vmem [resolvable:$true] %s5455_s12 }
  0xa0   : > { %v7675_v3 = vshrl.u32 %v388_v0, 7  ;;  %6632 = vmatprep.subr.bf16.mxu0 %v6967_v2  ;;  %6585 = vmatpush3.bf16.msra.mxu1 %v6966_v1  ;;  %v6971_v7 = vld [vmem:[#allocation8 + $0x50] sm:$0xff]   ;;  %v6972_v9 = vld [vmem:[#allocation8 + $0x18] sm:$0xff]   ;;  %v6974_v12 = vld [vmem:[#allocation8 + $0x20] sm:$0xff]   ;;  %s9803_s13 = scalar_lea.hbm %s9858_s7, %s5767_s10  ;;  %s5442_s15 = scalar_lea.sflag [#allocation5], %s7655_s23 }
  0xa1   : > { %6633 = vmatpush3.bf16.msra.mxu0 %v6967_v2  ;;  %6586 = vmatprep.subr.bf16.mxu1 %v6968_v4  ;;  %v6973_v10 = vld [vmem:[#allocation8 + $0x58] sm:$0xff]   ;;  %v6975_v14 = vld [vmem:[#allocation8 + $0x60] sm:$0xff]   ;;  %v6976_v16 = vld [vmem:[#allocation8 + $0x28] sm:$0xff]   ;;  %s7303_s30 = scalar_lea.vmem %s9805_s12, 4096  ;;  %s7389_s28 = smov [#allocation12]  }
  0xa2   : > { %9948 = vst [vmem:[#allocation18_spill] sm:$0xff] %v7675_v3  ;;  %6634 = vmatprep.subr.bf16.mxu0 %v6969_v5  ;;  %v390_v8 = vadd.s32 8, %v7675_v3  ;;  %v392_v13 = vadd.s32 24, %v7675_v3  ;;  %v394_v15 = vadd.s32 40, %v7675_v3  ;;  %vm1158_vm1 = vcmp.lt.s32.totalorder %v7675_v3, 7  ;;  %v7682_v17 = vld [vmem:[%s7661_s21] sm:$0xff]  ;;  %p7304_p3 = scmp.ne.s32.totalorder %s9805_s12, %s7303_s30 }
  0xa3   : > { %v7685_v18 = vld [vmem:[%s7661_s21 + $0x8] sm:$0xff]  ;;  %v7688_v19 = vld [vmem:[%s7661_s21 + $0x10] sm:$0xff]  ;;  %v396_v23 = vadd.s32 56, %v7675_v3  ;;  %v9863_v25 = vrot.slane %v7682_v17, 1  ;;  %v7698_v28 = vld [vmem:[%s7661_s21 + $0x18] sm:$0xff]  ;;  %v398_v39 = vadd.s32 72, %v7675_v3 }
  0xa4   : > { %6587 = vmatpush3.bf16.msra.mxu1 %v6968_v4  ;;  %v432_v11 = vand.u32 15, %v390_v8  ;;  %v446_v22 = vand.u32 15, %v392_v13  ;;  %v6977_v24 = vld [vmem:[#allocation8 + $0x68] sm:$0xff]   ;;  %v1127_v26 = vrot.slane %v7685_v18, 1  ;;  %v1128_v27 = vrot.slane %v7688_v19, 1  ;;  %v7701_v29 = vld [vmem:[%s7661_s21 + $0x20] sm:$0xff]  ;;  %p7305_p5 = pnand %p7304_p3, %p7603_p10 }
  0xa5   : > { %6635 = vmatpush3.bf16.msra.mxu0 %v6969_v5  ;;  %6588 = vmatprep.subr.bf16.mxu1 %v6970_v6  ;;  %v460_v30 = vand.u32 15, %v394_v15  ;;  %v1129_v33 = vrot.slane %v7698_v28, 1  ;;  %v1130_v34 = vrot.slane %v7701_v29, 1  ;;  %v6978_v35 = vld [vmem:[#allocation8 + $0x30] sm:$0xff]   ;;  %v7713_v37 = vld [vmem:[%s7661_s21 + $0x28] sm:$0xff]  ;;  %v474_v43 = vand.u32 15, %v396_v23 }
  0xa6   : > { %6636 = vmatprep.subr.bf16.mxu0 %v6971_v7  ;;  %vm902_vm0 = vcmp.ne.s32.totalorder %v432_v11, 15  ;;  %v1188_v31 = vsel %vm1158_vm1, %v1127_v26, %v1128_v27  ;;  %v1189_v32 = vsel %vm1158_vm1, %v9863_v25, %v1127_v26  ;;  %vm904_vm2 = vcmp.ne.s32.totalorder %v446_v22, 15  ;;  %v7716_v38 = vld [vmem:[%s7661_s21 + $0x30] sm:$0xff]  ;;  %v6980_v46 = vld [vmem:[#allocation8 + $0x38] sm:$0xff]   ;;  %v7737_v52 = vld [vmem:[%s7661_s21 + $0x40] sm:$0xff]  ;;  %p7306_p7 = pneg %p7305_p5 }
  0xa7   : > { %v7691_v21 = vsel %vm902_vm0, 1.0, %v9864_v20  ;;  %v6979_v40 = vld [vmem:[#allocation8 + $0x70] sm:$0xff]   ;;  %v1131_v41 = vrot.slane %v7713_v37, 1  ;;  %v1132_v42 = vrot.slane %v7716_v38, 1  ;;  %vm7723_vm3 = vcmp.ne.s32.totalorder %v460_v30, 15  ;;  %v6981_v50 = vld [vmem:[#allocation8 + $0x78] sm:$0xff]  }
  0xa8   : > { %6589 = vmatpush3.bf16.msra.mxu1 %v6970_v6  ;;  %9949 = vst [vmem:[#allocation19_spill] sm:$0xff] %v7691_v21  ;;  %v1192_v36 = vmul.f32 %v7691_v21, %v1188_v31  ;;  %v7728_v47 = vsel %vm904_vm2, 1.0, %v9864_v20  ;;  %v1186_v48 = vsel %vm1158_vm1, %v1129_v33, %v1130_v34  ;;  %v400_v49 = vadd.s32 88, %v7675_v3  ;;  %v7734_v51 = vld [vmem:[%s7661_s21 + $0x38] sm:$0xff]  ;;  %v7758_v59 = vld [vmem:[%s7661_s21 + $0x48] sm:$0xff]  ;;  %v7761_v60 = vld [vmem:[%s7661_s21 + $0x50] sm:$0xff] }
  0xa9   : > { %6637 = vmatpush3.bf16.msra.mxu0 %v6971_v7  ;;  %6590 = vmatprep.subr.bf16.mxu1 %v6972_v9  ;;  %9952 = vst [vmem:[#allocation20_spill] sm:$0xff] %v7728_v47  ;;  %v488_v53 = vand.u32 15, %v398_v39  ;;  %v402_v54 = vadd.s32 104, %v7675_v3  ;;  %v7741_v55 = vadd.s32 120, %v7675_v3  ;;  %v7747_v56 = vsel %vm7723_vm3, 1.0, %v9864_v20  ;;  %v6982_v2 = vld [vmem:[#allocation6 + $0x40] sm:$0xff]  }
  0xaa   : > { %6638 = vmatprep.subr.bf16.mxu0 %v6973_v10  ;;  %v7721_v44 = vpack.c.bf16 %v1192_v36, %v1189_v32  ;;  %9953 = vst [vmem:[#allocation21_spill] sm:$0xff] %v7747_v56  ;;  %v1184_v57 = vsel %vm1158_vm1, %v1131_v41, %v1132_v42  ;;  %vm7753_vm4 = vcmp.ne.s32.totalorder %v474_v43, 15  ;;  %v1194_v61 = vmul.f32 %v7728_v47, %v1186_v48  ;;  %v6983_v11 = vld [vmem:[#allocation6] sm:$0xff]   ;;  %v6984_v23 = vld [vmem:[#allocation6 + $0x48] sm:$0xff]   ;;  %v6986_v39 = vld [vmem:[#allocation6 + $0x50] sm:$0xff]  }
  0xab   : > { %v1187_v62 = vsel %vm1158_vm1, %v1128_v27, %v1129_v33  ;;  %v1133_v63 = vrot.slane %v7734_v51, 1  ;;  %v1134_v0 = vrot.slane %v7737_v52, 1  ;;  %v502_v1 = vand.u32 15, %v400_v49  ;;  %v7790_v15 = vld [vmem:[%s7661_s21 + $0x60] sm:$0xff]  ;;  %v7803_v26 = vld [vmem:[%s7661_s21 + $0x68] sm:$0xff]  ;;  %v7809_v33 = vld [vmem:[%s7661_s21 + $0x70] sm:$0xff] }
  0xac   : > { %6591 = vmatpush3.bf16.msra.mxu1 %v6972_v9  ;;  %6600 = vmatprep.mubr.bf16.mxu1 %v7721_v44  ;;  %v1196_v4 = vmul.f32 %v7747_v56, %v1184_v57  ;;  %vm910_vm5 = vcmp.ne.s32.totalorder %v488_v53, 15  ;;  %v1135_v5 = vrot.slane %v7758_v59, 1  ;;  %v1136_v6 = vrot.slane %v7761_v60, 1  ;;  %v6985_v31 = vld [vmem:[#allocation6 + $0x8] sm:$0xff]   ;;  %v7829_v48 = vld [vmem:[%s7661_s21 + $0x80] sm:$0xff]  ;;  %v7008_v25 = vld [vmem:[#allocation6 + $0x78] sm:$0xff]  }
  0xad   : > { %6639 = vmatpush3.bf16.msra.mxu0 %v6973_v10  ;;  %6592 = vmatprep.subr.bf16.mxu1 %v6974_v12  ;;  %v1185_v7 = vsel %vm1158_vm1, %v1130_v34, %v1131_v41  ;;  %v516_v8 = vand.u32 15, %v402_v54  ;;  %v7774_v9 = vpack.c.bf16 %v1194_v61, %v1187_v62  ;;  %v7777_v10 = vld [vmem:[%s7661_s21 + $0x58] sm:$0xff]  ;;  %v1182_v13 = vsel %vm1158_vm1, %v1133_v63, %v1134_v0  ;;  %v7837_v53 = vld [vmem:[%s7661_s21 + $0x88] sm:$0xff]  ;;  %v6993_v54 = vld [vmem:[#allocation6 + $0x80] sm:$0xff]  }
  0xae   : > { %6640 = vmatprep.subr.bf16.mxu0 %v6975_v14  ;;  %6648 = vmatprep.mubr.bf16.mxu0 %v7721_v44  ;;  %vm7792_vm6 = vcmp.ne.s32.totalorder %v502_v1, 15  ;;  %v7796_v22 = vpack.c.bf16 %v1196_v4, %v1185_v7  ;;  %v530_v27 = vand.u32 15, %v7741_v55  ;;  %v406_v30 = vadd.s32 136, %v7675_v3  ;;  %v6994_v57 = vld [vmem:[#allocation6 + $0xc8] sm:$0xff]   ;;  %v6987_v4 = vld [vmem:[#allocation6 + $0x10] sm:$0xff]  }
  0xaf   : > { %v1137_v32 = vrot.slane %v7777_v10, 1  ;;  %vm7811_vm7 = vcmp.ne.s32.totalorder %v516_v8, 15  ;;  %v1138_v36 = vrot.slane %v7790_v15, 1  ;;  %v1183_v41 = vsel %vm1158_vm1, %v1132_v42, %v1133_v63  ;;  %v7840_v42 = vld [vmem:[%s7661_s21 + $0x90] sm:$0xff]  ;;  %v6995_v62 = vld [vmem:[#allocation6 + $0x88] sm:$0xff]  }
  0xb0   : > { %6593 = vmatpush3.bf16.msra.mxu1 %v6974_v12  ;;  %v7782_v12 = vsel %vm7753_vm4, 1.0, %v9864_v20  ;;  %v1139_v45 = vrot.slane %v7803_v26, 1  ;;  %v1181_v49 = vsel %vm1158_vm1, %v1134_v0, %v1135_v5  ;;  %v7845_v55 = vsel %vm7792_vm6, 1.0, %v9864_v20 }
  0xb1   : > { %6641 = vmatpush3.bf16.msra.mxu0 %v6975_v14  ;;  %6594 = vmatprep.subr.bf16.mxu1 %v6976_v16  ;;  %9956 = vst [vmem:[#allocation22_spill] sm:$0xff] %v7782_v12  ;;  %v7787_v14 = vsel %vm910_vm5, 1.0, %v9864_v20  ;;  %9962 = vst [vmem:[#allocation24_spill] sm:$0xff] %v7845_v55  ;;  %v408_v61 = vadd.s32 152, %v7675_v3  ;;  %v1178_v0 = vsel %vm1158_vm1, %v1137_v32, %v1138_v36  ;;  %v7857_v1 = vsel %vm7811_vm7, 1.0, %v9864_v20 }
  0xb2   : > { %6642 = vmatprep.subr.bf16.mxu0 %v6977_v24  ;;  %9957 = vst [vmem:[#allocation23_spill] sm:$0xff] %v7787_v14  ;;  %9963 = vst [vmem:[#allocation25_spill] sm:$0xff] %v7857_v1  ;;  %vm7863_vm8 = vcmp.ne.s32.totalorder %v530_v27, 15  ;;  %v7877_v27 = vld [vmem:[%s7661_s21 + $0xa0] sm:$0xff]  ;;  %v412_v7 = vadd.s32 184, %v7675_v3  ;;  %vm1029_vm3 = vcmp.lt.s32.totalorder %v7675_v3, 1 }
  0xb3   : > { %v558_v34 = vand.u32 15, %v408_v61  ;;  %v7907_v61 = vld [vmem:[%s7661_s21 + $0xa8] sm:$0xff] }
  0xb4   : > { %6595 = vmatpush3.bf16.msra.mxu1 %v6976_v16  ;;  %v1143_v16 = vrot.slane %v7837_v53, 1  ;;  %v7000_v53 = vld [vmem:[#allocation6 + $0xd8] sm:$0xff]  }
  0xb5   : > { %6643 = vmatpush3.bf16.msra.mxu0 %v6977_v24  ;;  %6596 = vmatprep.subr.bf16.mxu1 %v6978_v35  ;;  %v1180_v24 = vsel %vm1158_vm1, %v1135_v5, %v1136_v6  ;;  %vm7913_vm10 = vcmp.ne.s32.totalorder %v558_v34, 15 }
  0xb6   : > { %6644 = vmatprep.subr.bf16.mxu0 %v6979_v40  ;;  %v1200_v43 = vmul.f32 %v7787_v14, %v1180_v24  ;;  %v1202_v24 = vmul.f32 %v7845_v55, %v1178_v0  ;;  %v7004_v0 = vld [vmem:[#allocation6 + $0x30] sm:$0xff]  }
  0xb7   : > { %v7111_v55 = vld [vmem:[%s7661_s21 + $0x50] sm:$0xff] }
  0xb8   : > { %6597 = vmatpush3.bf16.msra.mxu1 %v6978_v35  ;;  %v1198_v35 = vmul.f32 %v7782_v12, %v1182_v13  ;;  %v7850_v63 = vpack.c.bf16 %v1200_v43, %v1181_v49  ;;  %v6988_v13 = vld [vmem:[#allocation6 + $0x58] sm:$0xff]   ;;  %v6990_v43 = vld [vmem:[#allocation6 + $0x60] sm:$0xff]  }
  0xb9   : > { %6645 = vmatpush3.bf16.msra.mxu0 %v6979_v40  ;;  %6598 = vmatprep.subr.bf16.mxu1 %v6980_v46  ;;  %v6991_v40 = vld [vmem:[#allocation6 + $0xc0] sm:$0xff]  }
  0xba   : > { %6646 = vmatprep.subr.bf16.mxu0 %v6981_v50  ;;  %v7847_v58 = vpack.c.bf16 %v1198_v35, %v1183_v41  ;;  %v1179_v35 = vsel %vm1158_vm1, %v1136_v6, %v1137_v32  ;;  %v1177_v41 = vsel %vm1158_vm1, %v1138_v36, %v1139_v45  ;;  %v7895_v6 = vsel %vm7863_vm8, 1.0, %v9864_v20 }
  0xbb   : > { %v7890_v49 = vpack.c.bf16 %v1202_v24, %v1179_v35  ;;  %9966 = vst [vmem:[#allocation26_spill] sm:$0xff] %v7895_v6  ;;  %v7001_v24 = vld [vmem:[#allocation6 + $0x98] sm:$0xff]   ;;  %v1147_v35 = vrot.slane %v7907_v61, 1  ;;  %v7002_v61 = vld [vmem:[#allocation6 + $0x70] sm:$0xff]  }
  0xbc   : > { %6599 = vmatpush3.bf16.msra.mxu1 %v6980_v46  ;;  %v7826_v46 = vld [vmem:[%s7661_s21 + $0x78] sm:$0xff] }
  0xbd   : > { %6647 = vmatpush3.bf16.msra.mxu0 %v6981_v50  ;;  %5792 = vmatprep.subr.bf16.mxu1 %v6982_v2  ;;  %v1140_v50 = vrot.slane %v7809_v33, 1  ;;  %v544_v2 = vand.u32 15, %v406_v30  ;;  %v1141_v8 = vrot.slane %v7826_v46, 1  ;;  %v6989_v30 = vld [vmem:[#allocation6 + $0x18] sm:$0xff]   ;;  %v410_v46 = vadd.s32 168, %v7675_v3 }
  0xbe   : > { %5928 = vmatprep.subr.bf16.mxu0 %v6991_v40  ;;  %v6997_v40 = vld [vmem:[#allocation6 + $0xd0] sm:$0xff]   ;;  %v586_v33 = vand.u32 15, %v412_v7 }
  0xbf   : > { %6601 = vmatmul.mubr.bf16.vlgmr.msra.gmra.mrb[0].mxu1 %v7774_v9  ;;  %v1176_v5 = vsel %vm1158_vm1, %v1139_v45, %v1140_v50  ;;  %vm918_vm9 = vcmp.ne.s32.totalorder %v544_v2, 15  ;;  %v6992_v2 = vld [vmem:[#allocation6 + $0x20] sm:$0xff]   ;;  %v7961_v7 = vld [vmem:[%s7661_s21 + $0xd0] sm:$0xff] }
  0xc0   : > { %6649 = vmatmul.mubr.bf16.vlgmr.msra.gmra.mrb[0].mxu0 %v7774_v9  ;;  %5793 = vmatpush3.bf16.msra.mxu1 %v6983_v11  ;;  %v1142_v11 = vrot.slane %v7829_v48, 1  ;;  %v6999_v48 = vld [vmem:[#allocation6 + $0x90] sm:$0xff]   ;;  %v7902_v36 = vsel %vm918_vm9, 1.0, %v9864_v20  ;;  %vm7972_vm12 = vcmp.ne.s32.totalorder %v586_v33, 15 }
  0xc1   : > { %6604 = vmatprep.mubr.bf16.mxu1 %v7796_v22  ;;  %6652 = vmatprep.mubr.bf16.mxu0 %v7796_v22  ;;  %9967 = vst [vmem:[#allocation27_spill] sm:$0xff] %v7902_v36 }
  0xc2   : > { %5794 = vmatprep.subr.bf16.mxu1 %v6984_v23  ;;  %5929 = vmatpush3.bf16.msra.mxu0 %v6993_v54  ;;  %v1144_v23 = vrot.slane %v7840_v42, 1  ;;  %v1174_v32 = vsel %vm1158_vm1, %v1141_v8, %v1142_v11  ;;  %v1152_v42 = vrot.slane %v7961_v7, 1 }
  0xc3   : > { %5930 = vmatprep.subr.bf16.mxu0 %v6994_v57  ;;  %v9866_v57 = vrot.slane %v7877_v27, 1  ;;  %v1206_v34 = vmul.f32 %v7895_v6, %v1174_v32  ;;  %v1173_v32 = vsel %vm1158_vm1, %v1142_v11, %v1143_v16  ;;  %v7006_v11 = vld [vmem:[#allocation6 + $0xe8] sm:$0xff]   ;;  %v8166_v6 = vpack.c.bf16 %v7713_v37, %v7701_v29 }
  0xc4   : > { %5795 = vmatpush3.bf16.msra.mxu1 %v6985_v31  ;;  %v7874_v31 = vld [vmem:[%s7661_s21 + $0x98] sm:$0xff] }
  0xc5   : > { %5796 = vmatprep.subr.bf16.mxu1 %v6986_v39  ;;  %v1204_v39 = vmul.f32 %v7857_v1, %v1176_v5  ;;  %v1145_v45 = vrot.slane %v7874_v31, 1  ;;  %v572_v5 = vand.u32 15, %v410_v46  ;;  %v7934_v46 = vld [vmem:[%s7661_s21 + $0xb8] sm:$0xff] }
  0xc6   : > { %5931 = vmatpush3.bf16.msra.mxu0 %v6995_v62  ;;  %v1172_v62 = vsel %vm1158_vm1, %v1143_v16, %v1144_v23 }
  0xc7   : > { %6605 = vmatmul.mubr.bf16.gmra.mrb[4].mxu1 %v7847_v58  ;;  %5932 = vmatprep.subr.bf16.mxu0 %v6997_v40  ;;  %v7899_v54 = vpack.c.bf16 %v1204_v39, %v1177_v41  ;;  %v7003_v39 = vld [vmem:[#allocation6 + $0xe0] sm:$0xff]   ;;  %v1175_v40 = vsel %vm1158_vm1, %v1140_v50, %v1141_v8  ;;  %v1208_v41 = vmul.f32 %v7902_v36, %v1172_v62  ;;  %vm922_vm11 = vcmp.ne.s32.totalorder %v572_v5, 15  ;;  %v7958_v5 = vld [vmem:[%s7661_s21 + $0xc8] sm:$0xff] }
  0xc8   : > { %6653 = vmatmul.mubr.bf16.gmra.mrb[4].mxu0 %v7847_v58  ;;  %6608 = vmatprep.mubr.bf16.mxu1 %v7850_v63  ;;  %v7005_v50 = vld [vmem:[#allocation6 + $0xa0] sm:$0xff]   ;;  %v7942_v8 = vpack.c.bf16 %v1206_v34, %v1175_v40  ;;  %v1170_v62 = vsel %vm1158_vm1, %v1145_v45, %v9866_v57  ;;  %v7965_v34 = vsel %vm922_vm11, 1.0, %v9864_v20  ;;  %v1149_v40 = vrot.slane %v7934_v46, 1 }
  0xc9   : > { %6656 = vmatprep.mubr.bf16.mxu0 %v7850_v63  ;;  %5797 = vmatpush3.bf16.msra.mxu1 %v6987_v4  ;;  %v7918_v4 = vld [vmem:[%s7661_s21 + $0xb0] sm:$0xff]  ;;  %v7950_v16 = vpack.c.bf16 %v1208_v41, %v1173_v32  ;;  %9971 = vst [vmem:[#allocation29_spill] sm:$0xff] %v7965_v34  ;;  %v7007_v41 = vld [vmem:[#allocation6 + $0xa8] sm:$0xff]   ;;  %v1171_v46 = vsel %vm1158_vm1, %v1144_v23, %v1145_v45  ;;  %v1151_v33 = vrot.slane %v7958_v5, 1  ;;  %v7010_v23 = vld [vmem:[#allocation6 + $0x38] sm:$0xff]   ;;  %v418_v45 = vadd.s32 232, %v7675_v3 }
  0xca   : > { %5798 = vmatprep.subr.bf16.mxu1 %v6988_v13  ;;  %5933 = vmatpush3.bf16.msra.mxu0 %v6999_v48  ;;  %v6996_v13 = vld [vmem:[#allocation6 + $0x68] sm:$0xff]   ;;  %v8030_v32 = vld [vmem:[%s7661_s21 + $0xf0] sm:$0xff] }
  0xcb   : > { %5934 = vmatprep.subr.bf16.mxu0 %v7000_v53  ;;  %v6998_v48 = vld [vmem:[#allocation6 + $0x28] sm:$0xff]   ;;  %v7940_v53 = vld [vmem:[%s7661_s21 + $0xc0] sm:$0xff] }
  0xcd   : > { %5799 = vmatpush3.bf16.msra.mxu1 %v6989_v30  ;;  %v414_v30 = vadd.s32 200, %v7675_v3 }
  0xce   : > { %5800 = vmatprep.subr.bf16.mxu1 %v6990_v43  ;;  %v1148_v43 = vrot.slane %v7918_v4, 1  ;;  %5935 = vmatpush3.bf16.msra.mxu0 %v7001_v24  ;;  %v416_v24 = vadd.s32 216, %v7675_v3 }
  0xcf   : > { %6609 = vmatmul.mubr.bf16.gmra.mrb[8].mxu1 %v7890_v49  ;;  %5936 = vmatprep.subr.bf16.mxu0 %v7003_v39 }
  0xd0   : > { %6657 = vmatmul.mubr.bf16.gmra.mrb[8].mxu0 %v7890_v49  ;;  %6612 = vmatprep.mubr.bf16.mxu1 %v7899_v54  ;;  %v1168_v39 = vsel %vm1158_vm1, %v1147_v35, %v1148_v43 }
  0xd1   : > { %6660 = vmatprep.mubr.bf16.mxu0 %v7899_v54  ;;  %5801 = vmatpush3.bf16.msra.mxu1 %v6992_v2  ;;  %v7955_v2 = vsel %vm7913_vm10, 1.0, %v9864_v20  ;;  %v7009_v20 = vld [vmem:[#allocation6 + $0xf0] sm:$0xff]  }
  0xd2   : > { %5802 = vmatprep.subr.bf16.mxu1 %v6996_v13  ;;  %9970 = vst [vmem:[#allocation28_spill] sm:$0xff] %v7955_v2  ;;  %v600_v13 = vand.u32 15, %v414_v30  ;;  %v1150_v30 = vrot.slane %v7940_v53, 1  ;;  %5937 = vmatpush3.bf16.msra.mxu0 %v7005_v50  ;;  %v1210_v57 = vmul.f32 %v7955_v2, %v1170_v62  ;;  %v7011_v50 = vld [vmem:[#allocation6 + $0xb0] sm:$0xff]   ;;  %v7015_v2 = vld [vmem:[#allocation8 + $0x88] sm:$0xff]  }
  0xd3   : > { %5938 = vmatprep.subr.bf16.mxu0 %v7006_v11  ;;  %v8003_v11 = vld [vmem:[%s7661_s21 + $0xd8] sm:$0xff] }
  0xd4   : > { %vm7988_vm13 = vcmp.ne.s32.totalorder %v600_v13, 15  ;;  %v8000_v62 = vpack.c.bf16 %v1210_v57, %v1171_v46  ;;  %v1166_v13 = vsel %vm1158_vm1, %v1149_v40, %v1150_v30  ;;  %v1164_v57 = vsel %vm1158_vm1, %v1151_v33, %v1152_v42 }
  0xd5   : > { %5803 = vmatpush3.bf16.msra.mxu1 %v6998_v48  ;;  %v1212_v48 = vmul.f32 %v7965_v34, %v1168_v39  ;;  %v8015_v39 = vld [vmem:[%s7661_s21 + $0xe0] sm:$0xff]  ;;  %v628_v46 = vand.u32 15, %v418_v45  ;;  %v1165_v4 = vsel %vm1158_vm1, %v1150_v30, %v1151_v33  ;;  %v420_v45 = vadd.s32 248, %v7675_v3 }
  0xd6   : > { %5804 = vmatprep.subr.bf16.mxu1 %v7002_v61  ;;  %v9976_v61 = vrot.slane %v7877_v27, 1  ;;  %5939 = vmatpush3.bf16.msra.mxu0 %v7007_v41  ;;  %v7012_v27 = vld [vmem:[#allocation6 + $0xf8] sm:$0xff]   ;;  %v8027_v41 = vld [vmem:[%s7661_s21 + $0xe8] sm:$0xff] }
  0xd7   : > { %6613 = vmatmul.mubr.bf16.gmra.mrb[12].mxu1 %v7942_v8  ;;  %5940 = vmatprep.subr.bf16.mxu0 %v7009_v20  ;;  %vm930_vm15 = vcmp.ne.s32.totalorder %v628_v46, 15  ;;  %v642_v46 = vand.u32 15, %v420_v45 }
  0xd8   : > { %6661 = vmatmul.mubr.bf16.gmra.mrb[12].mxu0 %v7942_v8  ;;  %6616 = vmatprep.mubr.bf16.mxu1 %v7950_v16  ;;  %v1169_v31 = vsel %vm1158_vm1, %v9976_v61, %v1147_v35  ;;  %v9977_v35 = vmov 0.0  }
  0xd9   : > { %6664 = vmatprep.mubr.bf16.mxu0 %v7950_v16  ;;  %5805 = vmatpush3.bf16.msra.mxu1 %v7004_v0  ;;  %v8005_v5 = vpack.c.bf16 %v1212_v48, %v1169_v31  ;;  %v8010_v7 = vsel %vm7972_vm12, 1.0, %v9977_v35  ;;  %v8017_v0 = vld [vmem:[#allocation8 + $0x80] sm:$0xff]   ;;  %v8022_v20 = vsel %vm7988_vm13, 1.0, %v9977_v35  ;;  %v7013_v48 = vld [vmem:[#allocation6 + $0xb8] sm:$0xff]   ;;  %v1153_v31 = vrot.slane %v8003_v11, 1 }
  0xda   : > { %5806 = vmatprep.subr.bf16.mxu1 %v7008_v25  ;;  %9978 = vst [vmem:[#allocation30_spill] sm:$0xff] %v8010_v7  ;;  %v614_v25 = vand.u32 15, %v416_v24  ;;  %9979 = vst [vmem:[#allocation31_spill] sm:$0xff] %v8022_v20  ;;  %5941 = vmatpush3.bf16.msra.mxu0 %v7011_v50  ;;  %v1167_v24 = vsel %vm1158_vm1, %v1148_v43, %v1149_v40  ;;  %v1214_v53 = vmul.f32 %v8010_v7, %v1166_v13 }
  0xdb   : > { %5942 = vmatprep.subr.bf16.mxu0 %v7012_v27  ;;  %v1216_v61 = vmul.f32 %v8022_v20, %v1164_v57  ;;  %v1155_v43 = vrot.slane %v8027_v41, 1  ;;  %v1156_v40 = vrot.slane %v8030_v32, 1  ;;  %v8060_v30 = vsel %vm930_vm15, 1.0, %v9977_v35  ;;  %v8065_v57 = vld [vmem:[%s7661_s21 + $0xf8] sm:$0xff] }
  0xdc   : > { %vm928_vm14 = vcmp.ne.s32.totalorder %v614_v25, 15  ;;  %v8050_v50 = vpack.c.bf16 %v1214_v53, %v1167_v24  ;;  %9981 = vst [vmem:[#allocation33_spill] sm:$0xff] %v8060_v30  ;;  %v1163_v24 = vsel %vm1158_vm1, %v1152_v42, %v1153_v31  ;;  %vm932_vm0 = vcmp.ne.s32.totalorder %v642_v46, 15 }
  0xdd   : > { %5807 = vmatpush3.bf16.msra.mxu1 %v7010_v23  ;;  %v1154_v23 = vrot.slane %v8015_v39, 1  ;;  %v8052_v27 = vpack.c.bf16 %v1216_v61, %v1165_v4  ;;  %v8055_v13 = vsel %vm928_vm14, 1.0, %v9977_v35  ;;  %v1160_v33 = vsel %vm1158_vm1, %v1155_v43, %v1156_v40 }
  0xde   : > { %6680 = vmatprep.subr.bf16.mxu1 %v8017_v0  ;;  %5943 = vmatpush3.bf16.msra.mxu0 %v7013_v48  ;;  %9980 = vst [vmem:[#allocation32_spill] sm:$0xff] %v8055_v13  ;;  %v1220_v53 = vmul.f32 %v8060_v30, %v1160_v33  ;;  %v1157_v61 = vrot.slane %v8065_v57, 1  ;;  %v9983_v20 = vrot.slane %v7682_v17, 1  ;;  %v997_v46 = vrot.slane %v7682_v17, 7 }
  0xdf   : > { %6617 = vmatmul.mubr.bf16.gmra.mrb[16].mxu1 %v8000_v62  ;;  %v1162_v25 = vsel %vm1158_vm1, %v1153_v31, %v1154_v23  ;;  %v1161_v4 = vsel %vm1158_vm1, %v1154_v23, %v1155_v43  ;;  %v425_v31 = vand.u32 15, %v7675_v3  ;;  %v9869_v23 = vrot.slane %v8065_v57, 7 }
  0xe0   : > { %6665 = vmatmul.mubr.bf16.gmra.mrb[16].mxu0 %v8000_v62  ;;  %6620 = vmatprep.mubr.bf16.mxu1 %v8005_v5  ;;  %v1218_v48 = vmul.f32 %v8055_v13, %v1162_v25  ;;  %v8080_v25 = vpack.c.bf16 %v1220_v53, %v1161_v4  ;;  %v8083_v13 = vsel %vm932_vm0, 1.0, %v9977_v35  ;;  %v1190_v42 = vsel %vm1158_vm1, %v1157_v61, %v9983_v20 }
  0xe1   : > { %6668 = vmatprep.mubr.bf16.mxu0 %v8005_v5  ;;  %9982 = vst [vmem:[#allocation34_spill] sm:$0xff] %v8083_v13  ;;  %v1222_v33 = vmul.f32 %v8083_v13, %v1190_v42  ;;  %v1159_v43 = vsel %vm1158_vm1, %v1156_v40, %v1157_v61  ;;  %vm805_vm2 = vcmp.ne.s32.totalorder %v425_v31, 0  ;;  %v391_v20 = vadd.s32 16, %v7675_v3 }
  0xe2   : > { %v8078_v45 = vpack.c.bf16 %v1218_v48, %v1163_v24  ;;  %v998_v24 = vrot.slane %v7685_v18, 7  ;;  %v8106_v53 = vpack.c.bf16 %v7685_v18, %v7682_v17  ;;  %v8109_v4 = vsel %vm805_vm2, 1.0, %v9977_v35 }
  0xe3   : > { %v8101_v48 = vpack.c.bf16 %v1222_v33, %v1159_v43  ;;  %9984 = vst [vmem:[#allocation35_spill] sm:$0xff] %v8109_v4  ;;  %v1061_v40 = vsel %vm1029_vm3, %v9869_v23, %v997_v46  ;;  %v393_v61 = vadd.s32 32, %v7675_v3  ;;  %v439_v42 = vand.u32 15, %v391_v20 }
  0xe4   : > { %v1062_v31 = vmul.f32 %v8109_v4, %v1061_v40  ;;  %v395_v33 = vadd.s32 48, %v7675_v3  ;;  %v1060_v17 = vsel %vm1029_vm3, %v997_v46, %v998_v24  ;;  %v999_v18 = vrot.slane %v7688_v19, 7 }
  0xe5   : > { %v453_v43 = vand.u32 15, %v393_v61  ;;  %vm807_vm4 = vcmp.ne.s32.totalorder %v439_v42, 0  ;;  %v1000_v20 = vrot.slane %v7698_v28, 7  ;;  %v1001_v23 = vrot.slane %v7701_v29, 7 }
  0xe6   : > { %v8127_v40 = vpack.c.bf16 %v1060_v17, %v1062_v31  ;;  %v467_v30 = vand.u32 15, %v395_v33  ;;  %v397_v7 = vadd.s32 64, %v7675_v3  ;;  %v8131_v34 = vsel %vm807_vm4, 1.0, %v9977_v35 }
  0xe7   : > { %6621 = vmatmul.mubr.bf16.gmra.mrb[20].mxu1 %v8050_v50  ;;  %9985 = vst [vmem:[#allocation36_spill] sm:$0xff] %v8131_v34  ;;  %v1059_v46 = vsel %vm1029_vm3, %v998_v24, %v999_v18  ;;  %vm809_vm5 = vcmp.ne.s32.totalorder %v453_v43, 0  ;;  %v8137_v61 = vpack.c.bf16 %v7698_v28, %v7688_v19  ;;  %v1002_v42 = vrot.slane %v7713_v37, 7  ;;  %v7016_v43 = vld [vmem:[#allocation8 + $0x90] sm:$0xff]   ;;  %v7017_v28 = vld [vmem:[#allocation8 + $0x98] sm:$0xff]   ;;  %v7018_v37 = vld [vmem:[#allocation8 + $0xa0] sm:$0xff]  }
  0xe8   : > { %6669 = vmatmul.mubr.bf16.gmra.mrb[20].mxu0 %v8050_v50  ;;  %6624 = vmatprep.mubr.bf16.mxu1 %v8052_v27  ;;  %v1003_v31 = vrot.slane %v7716_v38, 7  ;;  %v1004_v33 = vrot.slane %v7734_v51, 7  ;;  %v1064_v17 = vmul.f32 %v8131_v34, %v1059_v46  ;;  %v8145_v36 = vsel %vm809_vm5, 1.0, %v9977_v35 }
  0xe9   : > { %6672 = vmatprep.mubr.bf16.mxu0 %v8052_v27  ;;  %9986 = vst [vmem:[#allocation37_spill] sm:$0xff] %v8145_v36  ;;  %vm811_vm6 = vcmp.ne.s32.totalorder %v467_v30, 0  ;;  %v481_v24 = vand.u32 15, %v397_v7  ;;  %v1058_v19 = vsel %vm1029_vm3, %v999_v18, %v1000_v20  ;;  %v399_v7 = vadd.s32 80, %v7675_v3 }
  0xea   : > { %v8156_v30 = vsel %vm811_vm6, 1.0, %v9977_v35  ;;  %v8159_v46 = vpack.c.bf16 %v1058_v19, %v1064_v17  ;;  %v1056_v29 = vsel %vm1029_vm3, %v1001_v23, %v1002_v42 }
  0xeb   : > { %9987 = vst [vmem:[#allocation38_spill] sm:$0xff] %v8156_v30  ;;  %vm813_vm7 = vcmp.ne.s32.totalorder %v481_v24, 0  ;;  %v495_v19 = vand.u32 15, %v399_v7  ;;  %v401_v24 = vadd.s32 96, %v7675_v3  ;;  %v1055_v7 = vsel %vm1029_vm3, %v1002_v42, %v1003_v31 }
  0xec   : > { %v8171_v17 = vsel %vm813_vm7, 1.0, %v9977_v35  ;;  %v1068_v18 = vmul.f32 %v8156_v30, %v1055_v7  ;;  %v403_v42 = vadd.s32 112, %v7675_v3  ;;  %v7021_v7 = vld [vmem:[#allocation8 + $0xb8] sm:$0xff]  }
  0xed   : > { %9988 = vst [vmem:[#allocation39_spill] sm:$0xff] %v8171_v17  ;;  %vm8190_vm8 = vcmp.ne.s32.totalorder %v495_v19, 0  ;;  %v9991_v19 = vrot.slane %v7737_v52, 7  ;;  %v7112_v52 = vld [vmem:[%s7661_s21 + $0x58] sm:$0xff] }
  0xee   : > { %v8242_v14 = vpack.c.bf16 %v7112_v52, %v7111_v55  ;;  %v9999_v55 = vrot.slane %v7777_v10, 7 }
  0xef   : > { %6625 = vmatmul.mubr.bf16.gmra.mrb[24].mxu1 %v8078_v45 }
  0xf0   : > { %6673 = vmatmul.mubr.bf16.gmra.mrb[24].mxu0 %v8078_v45  ;;  %6628 = vmatprep.mubr.bf16.mxu1 %v8080_v25 }
  0xf1   : > { %6676 = vmatprep.mubr.bf16.mxu0 %v8080_v25 }
  0xf7   : > { %6629 = vmatmul.mubr.bf16.gmra.mrb[28].mxu1 %v8101_v48 }
  0xf8   : > { %6677 = vmatmul.mubr.bf16.gmra.mrb[28].mxu0 %v8101_v48  ;;  %1654 = vmatprep.mubr.bf16.mxu1 %v8106_v53 }
  0xf9   : > { %2258 = vmatprep.mubr.bf16.mxu0 %v8106_v53 }
  0xff   : > { %1655 = vmatmul.mubr.bf16.vlgmr.msra.gmra.mrb[32].mxu1 %v8127_v40 }
 0x100   : > { %2259 = vmatmul.mubr.bf16.vlgmr.msra.gmra.mrb[32].mxu0 %v8127_v40  ;;  %6681 = vmatpush3.bf16.msra.mxu1 %v8017_v0  ;;  %v1057_v0 = vsel %vm1029_vm3, %v1000_v20, %v1001_v23  ;;  %v7019_v20 = vld [vmem:[#allocation8 + $0xa8] sm:$0xff]  }
 0x101   : > { %1662 = vmatprep.mubr.bf16.mxu1 %v8137_v61  ;;  %2266 = vmatprep.mubr.bf16.mxu0 %v8137_v61  ;;  %v1066_v1 = vmul.f32 %v8145_v36, %v1057_v0  ;;  %v8186_v0 = vpack.c.bf16 %v7734_v51, %v7716_v38  ;;  %v1054_v38 = vsel %vm1029_vm3, %v1003_v31, %v1004_v33  ;;  %v7020_v51 = vld [vmem:[#allocation8 + $0xb0] sm:$0xff]  }
 0x102   : > { %6682 = vmatprep.subr.bf16.mxu1 %v7015_v2 }
 0x104   : > { %6683 = vmatpush3.bf16.msra.mxu1 %v7015_v2  ;;  %v8180_v2 = vpack.c.bf16 %v1056_v29, %v1066_v1  ;;  %v509_v1 = vand.u32 15, %v401_v24  ;;  %v7110_v24 = vld [vmem:[%s7661_s21 + $0x40] sm:$0xff] }
 0x105   : > { %6684 = vmatprep.subr.bf16.mxu1 %v7016_v43  ;;  %v8209_v29 = vpack.c.bf16 %v7758_v59, %v7110_v24 }
 0x106   : > { %vm8218_vm9 = vcmp.ne.s32.totalorder %v509_v1, 0 }
 0x107   : > { %1663 = vmatmul.mubr.bf16.gmra.mrb[36].mxu1 %v8159_v46 }
 0x108   : > { %2267 = vmatmul.mubr.bf16.gmra.mrb[36].mxu0 %v8159_v46  ;;  %1670 = vmatprep.mubr.bf16.mxu1 %v8166_v6 }
 0x109   : > { %2274 = vmatprep.mubr.bf16.mxu0 %v8166_v6  ;;  %6685 = vmatpush3.bf16.msra.mxu1 %v7016_v43  ;;  %v1009_v43 = vrot.slane %v7790_v15, 7  ;;  %v1053_v15 = vsel %vm1029_vm3, %v1004_v33, %v9991_v19 }
 0x10a   : > { %6686 = vmatprep.subr.bf16.mxu1 %v7017_v28  ;;  %v1070_v31 = vmul.f32 %v8171_v17, %v1053_v15  ;;  %v7022_v15 = vld [vmem:[#allocation6 + $0x140] sm:$0xff]  }
 0x10d   : > { %6687 = vmatpush3.bf16.msra.mxu1 %v7017_v28  ;;  %v8201_v28 = vpack.c.bf16 %v1054_v38, %v1068_v18  ;;  %v8216_v18 = vsel %vm8190_vm8, 1.0, %v9977_v35  ;;  %v523_v38 = vand.u32 15, %v403_v42 }
 0x10e   : > { %6688 = vmatprep.subr.bf16.mxu1 %v7018_v37  ;;  %9992 = vst [vmem:[#allocation40_spill] sm:$0xff] %v8216_v18 }
 0x10f   : > { %1671 = vmatmul.mubr.bf16.gmra.mrb[40].mxu1 %v8180_v2  ;;  %vm819_vm10 = vcmp.ne.s32.totalorder %v523_v38, 0  ;;  %v7114_v38 = vld [vmem:[%s7661_s21 + $0x60] sm:$0xff] }
 0x110   : > { %2275 = vmatmul.mubr.bf16.gmra.mrb[40].mxu0 %v8180_v2  ;;  %1678 = vmatprep.mubr.bf16.mxu1 %v8186_v0  ;;  %v8275_v52 = vsel %vm819_vm10, 1.0, %v9977_v35 }
 0x111   : > { %2282 = vmatprep.mubr.bf16.mxu0 %v8186_v0  ;;  %6689 = vmatpush3.bf16.msra.mxu1 %v7018_v37  ;;  %v1010_v37 = vrot.slane %v7803_v26, 7  ;;  %v9996_v26 = vrot.slane %v7761_v60, 7  ;;  %10002 = vst [vmem:[#allocation42_spill] sm:$0xff] %v8275_v52 }
 0x112   : > { %6690 = vmatprep.subr.bf16.mxu1 %v7019_v20 }
 0x113   : > { %v1048_v10 = vsel %vm1029_vm3, %v1009_v43, %v1010_v37 }
 0x115   : > { %6691 = vmatpush3.bf16.msra.mxu1 %v7019_v20  ;;  %v9995_v20 = vrot.slane %v7758_v59, 7  ;;  %v7113_v59 = vld [vmem:[%s7661_s21 + $0x70] sm:$0xff] }
 0x116   : > { %6692 = vmatprep.subr.bf16.mxu1 %v7020_v51 }
 0x117   : > { %1679 = vmatmul.mubr.bf16.gmra.mrb[44].mxu1 %v8201_v28  ;;  %v1052_v23 = vsel %vm1029_vm3, %v9991_v19, %v9995_v20  ;;  %v9997_v42 = vmov %v9995_v20  ;;  %v405_v19 = vadd.s32 128, %v7675_v3 }
 0x118   : > { %2283 = vmatmul.mubr.bf16.gmra.mrb[44].mxu0 %v8201_v28  ;;  %1686 = vmatprep.mubr.bf16.mxu1 %v8209_v29  ;;  %v8232_v1 = vpack.c.bf16 %v1052_v23, %v1070_v31  ;;  %v1051_v24 = vsel %vm1029_vm3, %v9997_v42, %v9996_v26  ;;  %v1011_v31 = vrot.slane %v7113_v59, 7  ;;  %v10001_v42 = vmov %v9999_v55 }
 0x119   : > { %2290 = vmatprep.mubr.bf16.mxu0 %v8209_v29  ;;  %6693 = vmatpush3.bf16.msra.mxu1 %v7020_v51  ;;  %v1072_v20 = vmul.f32 %v8216_v18, %v1051_v24  ;;  %v8249_v51 = vsel %vm8218_vm9, 1.0, %v9977_v35  ;;  %v1049_v24 = vsel %vm1029_vm3, %v10001_v42, %v1009_v43  ;;  %v7117_v42 = vld [vmem:[%s7661_s21 + $0x80] sm:$0xff] }
 0x11a   : > { %6694 = vmatprep.subr.bf16.mxu1 %v7021_v7  ;;  %9998 = vst [vmem:[#allocation41_spill] sm:$0xff] %v8249_v51  ;;  %v1074_v60 = vmul.f32 %v8249_v51, %v1049_v24  ;;  %v1013_v24 = vrot.slane %v7117_v42, 7  ;;  %v407_v51 = vadd.s32 144, %v7675_v3 }
 0x11d   : > { %6695 = vmatpush3.bf16.msra.mxu1 %v7021_v7  ;;  %v10000_v7 = vmov %v9996_v26 }
 0x11e   : > { %6064 = vmatprep.subr.bf16.mxu1 %v7022_v15  ;;  %v1050_v23 = vsel %vm1029_vm3, %v10000_v7, %v9999_v55  ;;  %v7115_v15 = vld [vmem:[%s7661_s21 + $0x68] sm:$0xff]  ;;  %v7116_v55 = vld [vmem:[%s7661_s21 + $0x78] sm:$0xff]  ;;  %v537_v7 = vand.u32 15, %v405_v19 }
 0x11f   : > { %1687 = vmatmul.mubr.bf16.gmra.mrb[48].mxu1 %v8232_v1  ;;  %v8262_v33 = vpack.c.bf16 %v1050_v23, %v1072_v20  ;;  %v8266_v26 = vpack.c.bf16 %v7115_v15, %v7114_v38  ;;  %v1012_v20 = vrot.slane %v7116_v55, 7  ;;  %v8283_v23 = vpack.c.bf16 %v1048_v10, %v1074_v60 }
 0x120   : > { %2291 = vmatmul.mubr.bf16.gmra.mrb[48].mxu0 %v8232_v1  ;;  %1694 = vmatprep.mubr.bf16.mxu1 %v8242_v14  ;;  %v8285_v38 = vpack.c.bf16 %v7116_v55, %v7113_v59  ;;  %v1047_v15 = vsel %vm1029_vm3, %v1010_v37, %v1011_v31  ;;  %vm821_vm11 = vcmp.ne.s32.totalorder %v537_v7, 0  ;;  %v7118_v59 = vld [vmem:[%s7661_s21 + $0x88] sm:$0xff] }
 0x121   : > { %2298 = vmatprep.mubr.bf16.mxu0 %v8242_v14  ;;  %v1076_v19 = vmul.f32 %v8275_v52, %v1047_v15  ;;  %v1046_v43 = vsel %vm1029_vm3, %v1011_v31, %v1012_v20  ;;  %v8301_v60 = vpack.c.bf16 %v7118_v59, %v7117_v42  ;;  %v8304_v55 = vsel %vm821_vm11, 1.0, %v9977_v35  ;;  %v7119_v42 = vld [vmem:[%s7661_s21 + $0x90] sm:$0xff] }
 0x122   : > { %10003 = vst [vmem:[#allocation43_spill] sm:$0xff] %v8304_v55  ;;  %v1014_v7 = vrot.slane %v7118_v59, 7  ;;  %v1045_v10 = vsel %vm1029_vm3, %v1012_v20, %v1013_v24  ;;  %v551_v15 = vand.u32 15, %v407_v51  ;;  %v409_v20 = vadd.s32 160, %v7675_v3  ;;  %v7120_v59 = vld [vmem:[%s7661_s21 + $0x98] sm:$0xff] }
 0x123   : > { %v8298_v37 = vpack.c.bf16 %v1046_v43, %v1076_v19  ;;  %v1078_v31 = vmul.f32 %v8304_v55, %v1045_v10  ;;  %v1015_v43 = vrot.slane %v7119_v42, 7  ;;  %v8320_v52 = vpack.c.bf16 %v7120_v59, %v7119_v42 }
 0x124   : > { %v1044_v19 = vsel %vm1029_vm3, %v1013_v24, %v1014_v7  ;;  %vm823_vm12 = vcmp.ne.s32.totalorder %v551_v15, 0  ;;  %v1016_v55 = vrot.slane %v7120_v59, 7  ;;  %v565_v18 = vand.u32 15, %v409_v20  ;;  %v7122_v59 = vld [vmem:[%s7661_s21 + $0xa8] sm:$0xff] }
 0x125   : > { %v8317_v51 = vpack.c.bf16 %v1044_v19, %v1078_v31  ;;  %v8323_v10 = vsel %vm823_vm12, 1.0, %v9977_v35  ;;  %v1043_v24 = vsel %vm1029_vm3, %v1014_v7, %v1015_v43  ;;  %v7121_v19 = vld [vmem:[%s7661_s21 + $0xa0] sm:$0xff]  ;;  %v411_v7 = vadd.s32 176, %v7675_v3 }
 0x126   : > { %10004 = vst [vmem:[#allocation44_spill] sm:$0xff] %v8323_v10  ;;  %v1080_v15 = vmul.f32 %v8323_v10, %v1043_v24  ;;  %v1042_v31 = vsel %vm1029_vm3, %v1015_v43, %v1016_v55  ;;  %v1017_v42 = vrot.slane %v7121_v19, 7  ;;  %vm825_vm13 = vcmp.ne.s32.totalorder %v565_v18, 0 }
 0x127   : > { %1695 = vmatmul.mubr.bf16.gmra.mrb[52].mxu1 %v8262_v33  ;;  %v8339_v17 = vpack.c.bf16 %v7122_v59, %v7121_v19  ;;  %v8342_v24 = vsel %vm825_vm13, 1.0, %v9977_v35  ;;  %v1018_v10 = vrot.slane %v7122_v59, 7  ;;  %v579_v12 = vand.u32 15, %v411_v7  ;;  %v7124_v59 = vld [vmem:[%s7661_s21 + $0xb8] sm:$0xff] }
 0x128   : > { %2299 = vmatmul.mubr.bf16.gmra.mrb[52].mxu0 %v8262_v33  ;;  %1702 = vmatprep.mubr.bf16.mxu1 %v8266_v26  ;;  %v8336_v20 = vpack.c.bf16 %v1042_v31, %v1080_v15  ;;  %10005 = vst [vmem:[#allocation45_spill] sm:$0xff] %v8342_v24  ;;  %v1041_v43 = vsel %vm1029_vm3, %v1016_v55, %v1017_v42  ;;  %v7123_v31 = vld [vmem:[%s7661_s21 + $0xb0] sm:$0xff]  ;;  %v413_v55 = vadd.s32 192, %v7675_v3 }
 0x129   : > { %2306 = vmatprep.mubr.bf16.mxu0 %v8266_v26  ;;  %v1082_v18 = vmul.f32 %v8342_v24, %v1041_v43  ;;  %v1040_v15 = vsel %vm1029_vm3, %v1017_v42, %v1018_v10  ;;  %v1019_v19 = vrot.slane %v7123_v31, 7  ;;  %vm827_vm14 = vcmp.ne.s32.totalorder %v579_v12, 0 }
 0x12a   : > { %v8358_v30 = vpack.c.bf16 %v7124_v59, %v7123_v31  ;;  %v8361_v43 = vsel %vm827_vm14, 1.0, %v9977_v35  ;;  %v1020_v24 = vrot.slane %v7124_v59, 7  ;;  %v593_v56 = vand.u32 15, %v413_v55  ;;  %v7126_v59 = vld [vmem:[%s7661_s21 + $0xc8] sm:$0xff] }
 0x12b   : > { %v8355_v7 = vpack.c.bf16 %v1040_v15, %v1082_v18  ;;  %10007 = vst [vmem:[#allocation47_spill] sm:$0xff] %v8361_v43  ;;  %v1039_v42 = vsel %vm1029_vm3, %v1018_v10, %v1019_v19  ;;  %v7125_v15 = vld [vmem:[%s7661_s21 + $0xc0] sm:$0xff]  ;;  %v415_v10 = vadd.s32 208, %v7675_v3 }
 0x12c   : > { %10006 = vst [vmem:[#allocation46_spill] sm:$0xff] %v8358_v30  ;;  %v1084_v12 = vmul.f32 %v8361_v43, %v1039_v42  ;;  %v1038_v18 = vsel %vm1029_vm3, %v1019_v19, %v1020_v24  ;;  %v1021_v31 = vrot.slane %v7125_v15, 7  ;;  %vm829_vm15 = vcmp.ne.s32.totalorder %v593_v56, 0 }
 0x12d   : > { %v8377_v36 = vpack.c.bf16 %v7126_v59, %v7125_v15  ;;  %v8380_v42 = vsel %vm829_vm15, 1.0, %v9977_v35  ;;  %v1022_v43 = vrot.slane %v7126_v59, 7  ;;  %v607_v47 = vand.u32 15, %v415_v10 }
 0x12e   : > { %v8374_v55 = vpack.c.bf16 %v1038_v18, %v1084_v12  ;;  %10010 = vst [vmem:[#allocation50_spill] sm:$0xff] %v8380_v42  ;;  %v1037_v19 = vsel %vm1029_vm3, %v1020_v24, %v1021_v31  ;;  %v7127_v12 = vld [vmem:[%s7661_s21 + $0xd0] sm:$0xff]  ;;  %v417_v15 = vadd.s32 224, %v7675_v3 }
 0x12f   : > { %1703 = vmatmul.mubr.bf16.gmra.mrb[56].mxu1 %v8283_v23  ;;  %10009 = vst [vmem:[#allocation49_spill] sm:$0xff] %v8377_v36  ;;  %v1086_v34 = vmul.f32 %v8380_v42, %v1037_v19  ;;  %v1036_v56 = vsel %vm1029_vm3, %v1021_v31, %v1022_v43  ;;  %v1023_v18 = vrot.slane %v7127_v12, 7  ;;  %vm831_vm0 = vcmp.ne.s32.totalorder %v607_v47, 0 }
 0x130   : > { %2307 = vmatmul.mubr.bf16.gmra.mrb[56].mxu0 %v8283_v23  ;;  %1710 = vmatprep.mubr.bf16.mxu1 %v8285_v38  ;;  %10008 = vst [vmem:[#allocation48_spill] sm:$0xff] %v8374_v55  ;;  %v8396_v10 = vpack.c.bf16 %v8003_v11, %v7127_v12  ;;  %v8399_v59 = vsel %vm831_vm0, 1.0, %v9977_v35  ;;  %v1024_v19 = vrot.slane %v8003_v11, 7  ;;  %v621_v42 = vand.u32 15, %v417_v15 }
 0x131   : > { %2314 = vmatprep.mubr.bf16.mxu0 %v8285_v38  ;;  %v8393_v24 = vpack.c.bf16 %v1036_v56, %v1086_v34  ;;  %10013 = vst [vmem:[#allocation53_spill] sm:$0xff] %v8399_v59  ;;  %v1035_v31 = vsel %vm1029_vm3, %v1022_v43, %v1023_v18  ;;  %v1025_v56 = vrot.slane %v8015_v39, 7  ;;  %v419_v11 = vadd.s32 240, %v7675_v3 }
 0x132   : > { %10012 = vst [vmem:[#allocation52_spill] sm:$0xff] %v8396_v10  ;;  %v1088_v47 = vmul.f32 %v8399_v59, %v1035_v31  ;;  %v1034_v34 = vsel %vm1029_vm3, %v1023_v18, %v1024_v19  ;;  %vm833_vm2 = vcmp.ne.s32.totalorder %v621_v42, 0  ;;  %v8417_v12 = vpack.c.bf16 %v8027_v41, %v8015_v39 }
 0x133   : > { %10011 = vst [vmem:[#allocation51_spill] sm:$0xff] %v8393_v24  ;;  %v8420_v15 = vsel %vm833_vm2, 1.0, %v9977_v35  ;;  %v1026_v31 = vrot.slane %v8027_v41, 7  ;;  %v1033_v18 = vsel %vm1029_vm3, %v1024_v19, %v1025_v56  ;;  %v635_v59 = vand.u32 15, %v419_v11 }
 0x134   : > { %v8413_v43 = vpack.c.bf16 %v1034_v34, %v1088_v47  ;;  %10015 = vst [vmem:[#allocation55_spill] sm:$0xff] %v8417_v12  ;;  %10016 = vst [vmem:[#allocation56_spill] sm:$0xff] %v8420_v15  ;;  %v1090_v42 = vmul.f32 %v8420_v15, %v1033_v18  ;;  %v1027_v47 = vrot.slane %v8030_v32, 7  ;;  %v8437_v19 = vpack.c.bf16 %v8065_v57, %v8030_v32  ;;  %v7024_v18 = vld [vmem:[#allocation6 + $0x148] sm:$0xff]  }
 0x135   : > { %v1032_v39 = vsel %vm1029_vm3, %v1025_v56, %v1026_v31  ;;  %vm835_vm4 = vcmp.ne.s32.totalorder %v635_v59, 0  ;;  %v10020_v59 = vrot.slane %v8065_v57, 7  ;;  %v7025_v57 = vld [vmem:[#allocation6 + $0x108] sm:$0xff]  }
 0x136   : > { %10014 = vst [vmem:[#allocation54_spill] sm:$0xff] %v8413_v43  ;;  %v8433_v41 = vpack.c.bf16 %v1032_v39, %v1090_v42  ;;  %10018 = vst [vmem:[#allocation58_spill] sm:$0xff] %v8437_v19  ;;  %v8440_v34 = vsel %vm835_vm4, 1.0, %v9977_v35  ;;  %v1031_v11 = vsel %vm1029_vm3, %v1026_v31, %v1027_v47  ;;  %v7023_v31 = vld [vmem:[#allocation6 + $0x100] sm:$0xff]   ;;  %v7026_v42 = vld [vmem:[#allocation6 + $0x150] sm:$0xff]  }
 0x137   : > { %1711 = vmatmul.mubr.bf16.gmra.mrb[60].mxu1 %v8298_v37  ;;  %10019 = vst [vmem:[#allocation59_spill] sm:$0xff] %v8440_v34  ;;  %v1092_v56 = vmul.f32 %v8440_v34, %v1031_v11  ;;  %v1030_v32 = vsel %vm1029_vm3, %v1027_v47, %v10020_v59  ;;  %v7027_v39 = vld [vmem:[#allocation6 + $0x110] sm:$0xff]   ;;  %v7028_v47 = vld [vmem:[#allocation6 + $0x158] sm:$0xff]   ;;  %v7030_v11 = vld [vmem:[#allocation6 + $0x160] sm:$0xff]  }
 0x138   : > { %2315 = vmatmul.mubr.bf16.gmra.mrb[60].mxu0 %v8298_v37  ;;  %1718 = vmatprep.mubr.bf16.mxu1 %v8301_v60  ;;  %10017 = vst [vmem:[#allocation57_spill] sm:$0xff] %v8433_v41  ;;  %v7034_v59 = vld [vmem:[#allocation6 + $0x170] sm:$0xff]  }
 0x139   : > { %2322 = vmatprep.mubr.bf16.mxu0 %v8301_v60  ;;  %v8453_v35 = vpack.c.bf16 %v1030_v32, %v1092_v56  ;;  %v7032_v56 = vld [vmem:[#allocation6 + $0x168] sm:$0xff]  }
 0x13b   : > { %10021 = vst [vmem:[#allocation60_spill] sm:$0xff] %v8453_v35 }
 0x13f   : > { %1719 = vmatmul.mubr.bf16.gmra.mrb[64].mxu1 %v8317_v51 }
 0x140   : > { %2323 = vmatmul.mubr.bf16.gmra.mrb[64].mxu0 %v8317_v51  ;;  %1726 = vmatprep.mubr.bf16.mxu1 %v8320_v52 }
 0x141   : > { %2330 = vmatprep.mubr.bf16.mxu0 %v8320_v52 }
 0x147   : > { %1727 = vmatmul.mubr.bf16.gmra.mrb[68].mxu1 %v8336_v20 }
 0x148   : > { %2331 = vmatmul.mubr.bf16.gmra.mrb[68].mxu0 %v8336_v20  ;;  %1734 = vmatprep.mubr.bf16.mxu1 %v8339_v17 }
 0x149   : > { %2338 = vmatprep.mubr.bf16.mxu0 %v8339_v17 }
 0x14f   : > { %1735 = vmatmul.mubr.bf16.gmra.mrb[72].mxu1 %v8355_v7 }
 0x150   : > { %2339 = vmatmul.mubr.bf16.gmra.mrb[72].mxu0 %v8355_v7  ;;  %1742 = vmatprep.mubr.bf16.mxu1 %v8358_v30 }
 0x151   : > { %2346 = vmatprep.mubr.bf16.mxu0 %v8358_v30 }
 0x157   : > { %1743 = vmatmul.mubr.bf16.gmra.mrb[76].mxu1 %v8374_v55 }
 0x158   : > { %2347 = vmatmul.mubr.bf16.gmra.mrb[76].mxu0 %v8374_v55  ;;  %1750 = vmatprep.mubr.bf16.mxu1 %v8377_v36 }
 0x159   : > { %2354 = vmatprep.mubr.bf16.mxu0 %v8377_v36 }
 0x15f   : > { %1751 = vmatmul.mubr.bf16.gmra.mrb[80].mxu1 %v8393_v24 }
 0x160   : > { %2355 = vmatmul.mubr.bf16.gmra.mrb[80].mxu0 %v8393_v24  ;;  %1758 = vmatprep.mubr.bf16.mxu1 %v8396_v10 }
 0x161   : > { %2362 = vmatprep.mubr.bf16.mxu0 %v8396_v10 }
 0x167   : > { %1759 = vmatmul.mubr.bf16.gmra.mrb[84].mxu1 %v8413_v43 }
 0x168   : > { %2363 = vmatmul.mubr.bf16.gmra.mrb[84].mxu0 %v8413_v43  ;;  %1766 = vmatprep.mubr.bf16.mxu1 %v8417_v12 }
 0x169   : > { %2370 = vmatprep.mubr.bf16.mxu0 %v8417_v12 }
 0x16f   : > { %1767 = vmatmul.mubr.bf16.gmra.mrb[88].mxu1 %v8433_v41 }
 0x170   : > { %2371 = vmatmul.mubr.bf16.gmra.mrb[88].mxu0 %v8433_v41  ;;  %1774 = vmatprep.mubr.bf16.mxu1 %v8437_v19 }
 0x171   : > { %2378 = vmatprep.mubr.bf16.mxu0 %v8437_v19 }
 0x177   : > { %1775 = vmatmul.mubr.bf16.gmra.mrb[92].mxu1 %v8453_v35 }
 0x178   : > { %2379 = vmatmul.mubr.bf16.gmra.mrb[92].mxu0 %v8453_v35  ;;  %6696 = vmatprep.mubr.bf16.mxu1 %v7721_v44  ;;  %v7029_v44 = vld [vmem:[#allocation6 + $0x118] sm:$0xff]  }
 0x17f   : > { %6697 = vmatmul.mubr.bf16.vlgmr.msra.gmra.mrb[96].mxu1 %v7774_v9  ;;  %v7031_v9 = vld [vmem:[#allocation6 + $0x120] sm:$0xff]  }
 0x180   : > { %6065 = vmatpush3.bf16.msra.mxu1 %v7023_v31  ;;  %6700 = vmatprep.mubr.bf16.mxu1 %v7796_v22  ;;  %v7033_v22 = vld [vmem:[#allocation6 + $0x128] sm:$0xff]  }
 0x181   : > { %6066 = vmatprep.subr.bf16.mxu1 %v7024_v18  ;;  %v7035_v18 = vld [vmem:[#allocation6 + $0x130] sm:$0xff]  }
 0x184   : > { %6067 = vmatpush3.bf16.msra.mxu1 %v7025_v57 }
 0x185   : > { %6068 = vmatprep.subr.bf16.mxu1 %v7026_v42 }
 0x187   : > { %6701 = vmatmul.mubr.bf16.gmra.mrb[100].mxu1 %v7847_v58 }
 0x188   : > { %6704 = vmatprep.mubr.bf16.mxu1 %v7850_v63  ;;  %6069 = vmatpush3.bf16.msra.mxu1 %v7027_v39 }
 0x189   : > { %6070 = vmatprep.subr.bf16.mxu1 %v7028_v47  ;;  %v7037_v47 = vld [vmem:[#allocation6 + $0x138] sm:$0xff]  }
 0x18c   : > { %6071 = vmatpush3.bf16.msra.mxu1 %v7029_v44 }
 0x18d   : > { %6072 = vmatprep.subr.bf16.mxu1 %v7030_v11 }
 0x18f   : > { %6705 = vmatmul.mubr.bf16.gmra.mrb[104].mxu1 %v7890_v49  ;;  %v7036_v49 = vld [vmem:[#allocation6 + $0x178] sm:$0xff]  }
 0x190   : > { %6708 = vmatprep.mubr.bf16.mxu1 %v7899_v54  ;;  %6073 = vmatpush3.bf16.msra.mxu1 %v7031_v9 }
 0x191   : > { %6074 = vmatprep.subr.bf16.mxu1 %v7032_v56 }
 0x192   : > { %v8464_v32 = vpop.f32.mrb[0].mxu1 }
 0x193   : > { %v8466_v58 = vpop.f32.mrb[1].mxu1  ;;  %v8468_v63 = vpop.f32.mrb[0].mxu0 }
 0x194   : > { %v8470_v31 = vpop.f32.mrb[2].mxu1  ;;  %6075 = vmatpush3.bf16.msra.mxu1 %v7033_v22  ;;  %v8472_v57 = vpop.f32.mrb[1].mxu0 }
 0x195   : > { %v8474_v42 = vpop.f32.mrb[3].mxu1  ;;  %6076 = vmatprep.subr.bf16.mxu1 %v7034_v59  ;;  %v8476_v54 = vpop.f32.mrb[2].mxu0 }
 0x196   : > { %v8478_v39 = vpop.f32.mrb[3].mxu0 }
 0x197   : > { %6709 = vmatmul.mubr.bf16.gmra.mrb[108].mxu1 %v7942_v8 }
 0x198   : > { %6712 = vmatprep.mubr.bf16.mxu1 %v7950_v16  ;;  %6077 = vmatpush3.bf16.msra.mxu1 %v7035_v18 }
 0x199   : > { %6078 = vmatprep.subr.bf16.mxu1 %v7036_v49 }
 0x19a   : > { %v8482_v44 = vpop.f32.mrb[4].mxu1 }
 0x19b   : > { %v8484_v11 = vpop.f32.mrb[5].mxu1  ;;  %v8486_v9 = vpop.f32.mrb[4].mxu0 }
 0x19c   : > { %v8488_v56 = vpop.f32.mrb[6].mxu1  ;;  %6079 = vmatpush3.bf16.msra.mxu1 %v7037_v47  ;;  %v8490_v22 = vpop.f32.mrb[5].mxu0 }
 0x19d   : > { %v8492_v59 = vpop.f32.mrb[7].mxu1  ;;  %v8494_v34 = vpop.f32.mrb[6].mxu0 }
 0x19e   : > { %v8496_v8 = vpop.f32.mrb[7].mxu0 }
 0x19f   : > { %6713 = vmatmul.mubr.bf16.gmra.mrb[112].mxu1 %v8000_v62 }
 0x1a0   : > { %6716 = vmatprep.mubr.bf16.mxu1 %v8005_v5 }
 0x1a2   : > { %v8500_v16 = vpop.f32.mrb[8].mxu1 }
 0x1a3   : > { %v8502_v18 = vpop.f32.mrb[9].mxu1  ;;  %v8504_v49 = vpop.f32.mrb[8].mxu0 }
 0x1a4   : > { %v8506_v15 = vpop.f32.mrb[10].mxu1  ;;  %v8508_v47 = vpop.f32.mrb[9].mxu0 }
 0x1a5   : > { %v8510_v21 = vpop.f32.mrb[11].mxu1  ;;  %v8512_v4 = vpop.f32.mrb[10].mxu0 }
 0x1a6   : > { %v8514_v13 = vpop.f32.mrb[11].mxu0 }
 0x1a7   : > { %6717 = vmatmul.mubr.bf16.gmra.mrb[116].mxu1 %v8050_v50 }
 0x1a8   : > { %6720 = vmatprep.mubr.bf16.mxu1 %v8052_v27 }
 0x1aa   : > { %v8518_v62 = vpop.f32.mrb[12].mxu1 }
 0x1ab   : > { %v8520_v5 = vpop.f32.mrb[13].mxu1  ;;  %v8522_v3 = vpop.f32.mrb[12].mxu0 }
 0x1ac   : > { %v8524_v35 = vpop.f32.mrb[14].mxu1  ;;  %v8526_v19 = vpop.f32.mrb[13].mxu0 }
 0x1ad   : > { %v8528_v41 = vpop.f32.mrb[15].mxu1  ;;  %v8530_v12 = vpop.f32.mrb[14].mxu0 }
 0x1ae   : > { %10022 = vst [vmem:[#allocation61_spill] sm:$0xff] %v8530_v12  ;;  %v8532_v43 = vpop.f32.mrb[15].mxu0 }
 0x1af   : > { %6721 = vmatmul.mubr.bf16.gmra.mrb[120].mxu1 %v8078_v45 }
 0x1b0   : > { %6724 = vmatprep.mubr.bf16.mxu1 %v8080_v25 }
 0x1b2   : > { %v8536_v50 = vpop.f32.mrb[16].mxu1 }
 0x1b3   : > { %10023 = vst [vmem:[#allocation62_spill] sm:$0xff] %v8536_v50  ;;  %v8538_v27 = vpop.f32.mrb[17].mxu1  ;;  %v8540_v10 = vpop.f32.mrb[16].mxu0 }
 0x1b4   : > { %10024 = vst [vmem:[#allocation63_spill] sm:$0xff] %v8540_v10  ;;  %v8542_v24 = vpop.f32.mrb[18].mxu1  ;;  %v8544_v36 = vpop.f32.mrb[17].mxu0 }
 0x1b5   : > { %10025 = vst [vmem:[#allocation64_spill] sm:$0xff] %v8542_v24  ;;  %10026 = vst [vmem:[#allocation65_spill] sm:$0xff] %v8544_v36  ;;  %v8546_v55 = vpop.f32.mrb[19].mxu1  ;;  %v8548_v30 = vpop.f32.mrb[18].mxu0 }
 0x1b6   : > { %10027 = vst [vmem:[#allocation66_spill] sm:$0xff] %v8546_v55  ;;  %10028 = vst [vmem:[#allocation67_spill] sm:$0xff] %v8548_v30  ;;  %v8550_v12 = vpop.f32.mrb[19].mxu0 }
 0x1b7   : > { %6725 = vmatmul.mubr.bf16.gmra.mrb[124].mxu1 %v8101_v48 }
 0x1b8   : > { %2868 = vmatprep.mubr.bf16.mxu1 %v8106_v53 }
 0x1ba   : > { %v8554_v45 = vpop.f32.mrb[20].mxu1 }
 0x1bb   : > { %10029 = vst [vmem:[#allocation68_spill] sm:$0xff] %v8554_v45  ;;  %v8556_v25 = vpop.f32.mrb[21].mxu1  ;;  %v8558_v50 = vpop.f32.mrb[20].mxu0 }
 0x1bc   : > { %10030 = vst [vmem:[#allocation69_spill] sm:$0xff] %v8556_v25  ;;  %10031 = vst [vmem:[#allocation70_spill] sm:$0xff] %v8558_v50  ;;  %v8560_v10 = vpop.f32.mrb[22].mxu1  ;;  %v8562_v24 = vpop.f32.mrb[21].mxu0 }
 0x1bd   : > { %10032 = vst [vmem:[#allocation71_spill] sm:$0xff] %v8560_v10  ;;  %10033 = vst [vmem:[#allocation72_spill] sm:$0xff] %v8562_v24  ;;  %v8564_v36 = vpop.f32.mrb[23].mxu1  ;;  %v8566_v55 = vpop.f32.mrb[22].mxu0 }
 0x1be   : > { %10034 = vst [vmem:[#allocation73_spill] sm:$0xff] %v8564_v36  ;;  %10035 = vst [vmem:[#allocation74_spill] sm:$0xff] %v8566_v55  ;;  %v8568_v30 = vpop.f32.mrb[23].mxu0 }
 0x1bf   : > { %10036 = vst [vmem:[#allocation75_spill] sm:$0xff] %v8568_v30  ;;  %2869 = vmatmul.mubr.bf16.vlgmr.msra.gmra.mrb[128].mxu1 %v8127_v40 }
 0x1c0   : > { %2874 = vmatprep.mubr.bf16.mxu1 %v8137_v61 }
 0x1c2   : > { %v8572_v48 = vpop.f32.mrb[24].mxu1 }
 0x1c3   : > { %10037 = vst [vmem:[#allocation76_spill] sm:$0xff] %v8572_v48  ;;  %v8574_v53 = vpop.f32.mrb[25].mxu1  ;;  %v8576_v45 = vpop.f32.mrb[24].mxu0 }
 0x1c4   : > { %10038 = vst [vmem:[#allocation77_spill] sm:$0xff] %v8574_v53  ;;  %10039 = vst [vmem:[#allocation78_spill] sm:$0xff] %v8576_v45  ;;  %v8578_v50 = vpop.f32.mrb[26].mxu1  ;;  %v8580_v10 = vpop.f32.mrb[25].mxu0 }
 0x1c5   : > { %10040 = vst [vmem:[#allocation79_spill] sm:$0xff] %v8578_v50  ;;  %10041 = vst [vmem:[#allocation80_spill] sm:$0xff] %v8580_v10  ;;  %v8582_v24 = vpop.f32.mrb[27].mxu1  ;;  %v8584_v36 = vpop.f32.mrb[26].mxu0 }
 0x1c6   : > { %10042 = vst [vmem:[#allocation81_spill] sm:$0xff] %v8582_v24  ;;  %10043 = vst [vmem:[#allocation82_spill] sm:$0xff] %v8584_v36  ;;  %v8586_v55 = vpop.f32.mrb[27].mxu0 }
 0x1c7   : > { %10044 = vst [vmem:[#allocation83_spill] sm:$0xff] %v8586_v55  ;;  %2875 = vmatmul.mubr.bf16.gmra.mrb[132].mxu1 %v8159_v46 }
 0x1c8   : > { %2882 = vmatprep.mubr.bf16.mxu1 %v8166_v6 }
 0x1ca   : > { %v6630_v40 = vpop.f32.mrb[28].mxu1 }
 0x1cb   : > { %v8590_v61 = vpop.f32.mrb[29].mxu1  ;;  %v8592_v48 = vpop.f32.mrb[28].mxu0 }
 0x1cc   : > { %10045 = vst [vmem:[#allocation84_spill] sm:$0xff] %v8590_v61  ;;  %10046 = vst [vmem:[#allocation85_spill] sm:$0xff] %v8592_v48  ;;  %v6631_v45 = vpop.f32.mrb[30].mxu1  ;;  %v8594_v53 = vpop.f32.mrb[29].mxu0 }
 0x1cd   : > { %10047 = vst [vmem:[#allocation86_spill] sm:$0xff] %v8594_v53  ;;  %v8596_v50 = vpop.f32.mrb[31].mxu1  ;;  %v8598_v10 = vpop.f32.mrb[30].mxu0 }
 0x1ce   : > { %10048 = vst [vmem:[#allocation87_spill] sm:$0xff] %v8596_v50  ;;  %10049 = vst [vmem:[#allocation88_spill] sm:$0xff] %v8598_v10  ;;  %v8600_v24 = vpop.f32.mrb[31].mxu0 }
 0x1cf   : > { %10050 = vst [vmem:[#allocation89_spill] sm:$0xff] %v8600_v24  ;;  %2883 = vmatmul.mubr.bf16.gmra.mrb[136].mxu1 %v8180_v2 }
 0x1d0   : > { %2890 = vmatprep.mubr.bf16.mxu1 %v8186_v0 }
 0x1d2   : > { %v5808_v46 = vpop.f32.mrb[32].mxu1 }
 0x1d3   : > { %v5809_v6 = vpop.f32.mrb[33].mxu1  ;;  %v5944_v40 = vpop.f32.mrb[32].mxu0 }
 0x1d4   : > { %v5810_v36 = vadd.f32 %v5809_v6, %v5808_v46  ;;  %v5811_v61 = vpop.f32.mrb[34].mxu1  ;;  %v5945_v55 = vpop.f32.mrb[33].mxu0 }
 0x1d5   : > { %v5812_v48 = vpop.f32.mrb[35].mxu1  ;;  %v5946_v45 = vadd.f32 %v5945_v55, %v5944_v40  ;;  %v5947_v30 = vpop.f32.mrb[34].mxu0 }
 0x1d6   : > { %v1657_v53 = vadd.f32 %v5810_v36, %v8466_v58  ;;  %v5813_v50 = vadd.f32 %v5812_v48, %v5811_v61  ;;  %v5948_v25 = vpop.f32.mrb[35].mxu0 }
 0x1d7   : > { %v8606_v10 = vadd.f32 %v5946_v45, %v8472_v57  ;;  %2891 = vmatmul.mubr.bf16.gmra.mrb[140].mxu1 %v8201_v28  ;;  %v5949_v2 = vadd.f32 %v5948_v25, %v5947_v30 }
 0x1d8   : > { %v1660_v0 = vadd.f32 %v5813_v50, %v8474_v42  ;;  %2898 = vmatprep.mubr.bf16.mxu1 %v8209_v29 }
 0x1d9   : > { %v8612_v46 = vadd.f32 %v5949_v2, %v8478_v39 }
 0x1da   : > { %v5814_v6 = vpop.f32.mrb[36].mxu1 }
 0x1db   : > { %v5950_v55 = vpop.f32.mrb[36].mxu0  ;;  %v5815_v40 = vpop.f32.mrb[37].mxu1 }
 0x1dc   : > { %v5816_v24 = vadd.f32 %v5815_v40, %v5814_v6  ;;  %v5951_v36 = vpop.f32.mrb[37].mxu0  ;;  %v5817_v58 = vpop.f32.mrb[38].mxu1 }
 0x1dd   : > { %v5952_v48 = vadd.f32 %v5951_v36, %v5950_v55  ;;  %v5953_v61 = vpop.f32.mrb[38].mxu0  ;;  %v5818_v57 = vpop.f32.mrb[39].mxu1 }
 0x1de   : > { %v1665_v45 = vadd.f32 %v8464_v32, %v5816_v24  ;;  %v5819_v28 = vadd.f32 %v5818_v57, %v5817_v58  ;;  %v5954_v30 = vpop.f32.mrb[39].mxu0 }
 0x1df   : > { %v2269_v42 = vadd.f32 %v8468_v63, %v5952_v48  ;;  %v5955_v50 = vadd.f32 %v5954_v30, %v5953_v61  ;;  %2899 = vmatmul.mubr.bf16.gmra.mrb[144].mxu1 %v8232_v1 }
 0x1e0   : > { %v1668_v29 = vadd.f32 %v8470_v31, %v5819_v28  ;;  %2906 = vmatprep.mubr.bf16.mxu1 %v8242_v14 }
 0x1e1   : > { %v8619_v39 = vadd.f32 %v2269_v42, %v1657_v53  ;;  %v2272_v25 = vadd.f32 %v8476_v54, %v5955_v50 }
 0x1e2   : > { %v5820_v2 = vpop.f32.mrb[40].mxu1 }
 0x1e3   : > { %v8622_v6 = vadd.f32 %v2272_v25, %v1660_v0  ;;  %v5956_v55 = vpop.f32.mrb[40].mxu0  ;;  %v5821_v24 = vpop.f32.mrb[41].mxu1 }
 0x1e4   : > { %v5822_v32 = vadd.f32 %v5821_v24, %v5820_v2  ;;  %v5957_v40 = vpop.f32.mrb[41].mxu0  ;;  %v5823_v36 = vpop.f32.mrb[42].mxu1 }
 0x1e5   : > { %v5958_v63 = vadd.f32 %v5957_v40, %v5956_v55  ;;  %v5959_v58 = vpop.f32.mrb[42].mxu0  ;;  %v5824_v48 = vpop.f32.mrb[43].mxu1 }
 0x1e6   : > { %v1673_v1 = vadd.f32 %v5822_v32, %v8484_v11  ;;  %v5825_v31 = vadd.f32 %v5824_v48, %v5823_v36  ;;  %v5960_v61 = vpop.f32.mrb[43].mxu0 }
 0x1e7   : > { %v2277_v14 = vadd.f32 %v5958_v63, %v8490_v22  ;;  %v5961_v53 = vadd.f32 %v5960_v61, %v5959_v58  ;;  %2907 = vmatmul.mubr.bf16.gmra.mrb[148].mxu1 %v8262_v33  ;;  %v7038_v33 = vld [vmem:[#allocation11] sm:$0xff]  }
 0x1e8   : > { %v1676_v54 = vadd.f32 %v5825_v31, %v8492_v59  ;;  %2914 = vmatprep.mubr.bf16.mxu1 %v8266_v26  ;;  %6728 = vmatprep.subr.bf16.mxu0 %v7038_v33 }
 0x1e9   : > { %v8629_v0 = vadd.f32 %v2277_v14, %v1665_v45  ;;  %v2280_v57 = vadd.f32 %v5961_v53, %v8496_v8  ;;  %6729 = vmatpush3.bf16.msra.mxu0 %v7038_v33 }
 0x1ea   : > { %v5826_v28 = vpop.f32.mrb[44].mxu1 }
 0x1eb   : > { %v8632_v30 = vadd.f32 %v2280_v57, %v1668_v29  ;;  %v5962_v42 = vpop.f32.mrb[44].mxu0  ;;  %v5827_v11 = vpop.f32.mrb[45].mxu1 }
 0x1ec   : > { %v5828_v50 = vadd.f32 %v5827_v11, %v5826_v28  ;;  %v5963_v25 = vpop.f32.mrb[45].mxu0  ;;  %v5829_v2 = vpop.f32.mrb[46].mxu1 }
 0x1ed   : > { %v5964_v22 = vadd.f32 %v5963_v25, %v5962_v42  ;;  %v5965_v55 = vpop.f32.mrb[46].mxu0  ;;  %v5830_v24 = vpop.f32.mrb[47].mxu1 }
 0x1ee   : > { %v1681_v59 = vadd.f32 %v8482_v44, %v5828_v50  ;;  %v5831_v32 = vadd.f32 %v5830_v24, %v5829_v2  ;;  %v5966_v26 = vpop.f32.mrb[47].mxu0 }
 0x1ef   : > { %v2285_v45 = vadd.f32 %v8486_v9, %v5964_v22  ;;  %v5967_v40 = vadd.f32 %v5966_v26, %v5965_v55  ;;  %2915 = vmatmul.mubr.bf16.gmra.mrb[152].mxu1 %v8283_v23 }
 0x1f0   : > { %v1684_v8 = vadd.f32 %v8488_v56, %v5831_v32  ;;  %2922 = vmatprep.mubr.bf16.mxu1 %v8285_v38 }
 0x1f1   : > { %v8639_v29 = vadd.f32 %v2285_v45, %v1673_v1  ;;  %v2288_v36 = vadd.f32 %v8494_v34, %v5967_v40 }
 0x1f2   : > { %v5832_v63 = vpop.f32.mrb[48].mxu1 }
 0x1f3   : > { %v8642_v58 = vadd.f32 %v2288_v36, %v1676_v54  ;;  %v5968_v44 = vpop.f32.mrb[48].mxu0  ;;  %v5833_v48 = vpop.f32.mrb[49].mxu1 }
 0x1f4   : > { %v5834_v31 = vadd.f32 %v5833_v48, %v5832_v63  ;;  %v5969_v9 = vpop.f32.mrb[49].mxu0  ;;  %v5835_v61 = vpop.f32.mrb[50].mxu1 }
 0x1f5   : > { %v5970_v14 = vadd.f32 %v5969_v9, %v5968_v44  ;;  %v5971_v23 = vpop.f32.mrb[50].mxu0  ;;  %v5836_v53 = vpop.f32.mrb[51].mxu1 }
 0x1f6   : > { %v1689_v56 = vadd.f32 %v5834_v31, %v8502_v18  ;;  %v5837_v57 = vadd.f32 %v5836_v53, %v5835_v61  ;;  %v5972_v38 = vpop.f32.mrb[51].mxu0 }
 0x1f7   : > { %v2293_v1 = vadd.f32 %v5970_v14, %v8508_v47  ;;  %v5973_v28 = vadd.f32 %v5972_v38, %v5971_v23  ;;  %2923 = vmatmul.mubr.bf16.gmra.mrb[156].mxu1 %v8298_v37  ;;  %v7039_v37 = vld [vmem:[#allocation11 + $0x8] sm:$0xff]  }
 0x1f8   : > { %v1692_v34 = vadd.f32 %v5837_v57, %v8510_v21  ;;  %2930 = vmatprep.mubr.bf16.mxu1 %v8301_v60  ;;  %6730 = vmatprep.subr.bf16.mxu0 %v7039_v37 }
 0x1f9   : > { %v8649_v54 = vadd.f32 %v2293_v1, %v1681_v59  ;;  %v2296_v42 = vadd.f32 %v5973_v28, %v8514_v13  ;;  %6731 = vmatpush3.bf16.msra.mxu0 %v7039_v37 }
 0x1fa   : > { %v5838_v11 = vpop.f32.mrb[52].mxu1 }
 0x1fb   : > { %v8652_v50 = vadd.f32 %v2296_v42, %v1684_v8  ;;  %v5974_v25 = vpop.f32.mrb[52].mxu0  ;;  %v5839_v18 = vpop.f32.mrb[53].mxu1 }
 0x1fc   : > { %v5840_v2 = vadd.f32 %v5839_v18, %v5838_v11  ;;  %v5975_v22 = vpop.f32.mrb[53].mxu0  ;;  %v5841_v55 = vpop.f32.mrb[54].mxu1 }
 0x1fd   : > { %v5976_v47 = vadd.f32 %v5975_v22, %v5974_v25  ;;  %v5977_v24 = vpop.f32.mrb[54].mxu0  ;;  %v5842_v33 = vpop.f32.mrb[55].mxu1 }
 0x1fe   : > { %v1697_v21 = vadd.f32 %v8500_v16, %v5840_v2  ;;  %v5843_v32 = vadd.f32 %v5842_v33, %v5841_v55  ;;  %v5978_v60 = vpop.f32.mrb[55].mxu0  ;;  %v10051_v55 = vld [vmem:[#allocation46_spill] sm:$0xff] }
 0x1ff   : > { %v2301_v59 = vadd.f32 %v8504_v49, %v5976_v47  ;;  %v5979_v26 = vadd.f32 %v5978_v60, %v5977_v24  ;;  %2931 = vmatmul.mubr.bf16.gmra.mrb[160].mxu1 %v8317_v51  ;;  %v10052_v24 = vld [vmem:[#allocation61_spill] sm:$0xff] }
 0x200   : > { %v1700_v13 = vadd.f32 %v8506_v15, %v5843_v32  ;;  %2938 = vmatprep.mubr.bf16.mxu1 %v8320_v52 }
 0x201   : > { %v8659_v45 = vadd.f32 %v2301_v59, %v1689_v56  ;;  %v2304_v40 = vadd.f32 %v8512_v4, %v5979_v26 }
 0x202   : > { %v5844_v8 = vpop.f32.mrb[56].mxu1 }
 0x203   : > { %v8662_v36 = vadd.f32 %v2304_v40, %v1692_v34  ;;  %v5980_v16 = vpop.f32.mrb[56].mxu0  ;;  %v5845_v63 = vpop.f32.mrb[57].mxu1 }
 0x204   : > { %v5846_v44 = vadd.f32 %v5845_v63, %v5844_v8  ;;  %v5981_v49 = vpop.f32.mrb[57].mxu0  ;;  %v5847_v48 = vpop.f32.mrb[58].mxu1 }
 0x205   : > { %v5982_v31 = vadd.f32 %v5981_v49, %v5980_v16  ;;  %v5983_v51 = vpop.f32.mrb[58].mxu0  ;;  %v5848_v9 = vpop.f32.mrb[59].mxu1  ;;  %v10053_v16 = vld [vmem:[#allocation65_spill] sm:$0xff]  ;;  %v10054_v49 = vld [vmem:[#allocation48_spill] sm:$0xff] }
 0x206   : > { %v1705_v15 = vadd.f32 %v5846_v44, %v8520_v5  ;;  %v5849_v61 = vadd.f32 %v5848_v9, %v5847_v48  ;;  %v5984_v52 = vpop.f32.mrb[59].mxu0  ;;  %v10055_v48 = vld [vmem:[#allocation66_spill] sm:$0xff] }
 0x207   : > { %v2309_v14 = vadd.f32 %v5982_v31, %v8526_v19  ;;  %v5985_v23 = vadd.f32 %v5984_v52, %v5983_v51  ;;  %2939 = vmatmul.mubr.bf16.gmra.mrb[164].mxu1 %v8336_v20  ;;  %v7040_v20 = vld [vmem:[#allocation11 + $0x10] sm:$0xff]   ;;  %v10056_v51 = vld [vmem:[#allocation49_spill] sm:$0xff] }
 0x208   : > { %v1708_v4 = vadd.f32 %v5849_v61, %v8528_v41  ;;  %2946 = vmatprep.mubr.bf16.mxu1 %v8339_v17  ;;  %6732 = vmatprep.subr.bf16.mxu0 %v7040_v20 }
 0x209   : > { %v8669_v53 = vadd.f32 %v2309_v14, %v1697_v21  ;;  %v2312_v56 = vadd.f32 %v5985_v23, %v8532_v43  ;;  %6733 = vmatpush3.bf16.msra.mxu0 %v7040_v20 }
 0x20a   : > { %v5850_v57 = vpop.f32.mrb[60].mxu1 }
 0x20b   : > { %v8672_v38 = vadd.f32 %v2312_v56, %v1700_v13  ;;  %v5986_v1 = vpop.f32.mrb[60].mxu0  ;;  %v5851_v5 = vpop.f32.mrb[61].mxu1 }
 0x20c   : > { %v5852_v28 = vadd.f32 %v5851_v5, %v5850_v57  ;;  %v5987_v34 = vpop.f32.mrb[61].mxu0  ;;  %v5853_v42 = vpop.f32.mrb[62].mxu1  ;;  %v7042_v57 = vld [vmem:[#allocation11 + $0x40] sm:$0xff]  }
 0x20d   : > { %v5988_v19 = vadd.f32 %v5987_v34, %v5986_v1  ;;  %v5989_v11 = vpop.f32.mrb[62].mxu0  ;;  %v5854_v25 = vpop.f32.mrb[63].mxu1  ;;  %v10057_v34 = vld [vmem:[#allocation62_spill] sm:$0xff]  ;;  %6776 = vmatprep.subr.bf16.mxu1 %v7042_v57 }
 0x20e   : > { %v1713_v41 = vadd.f32 %v8518_v62, %v5852_v28  ;;  %v5855_v18 = vadd.f32 %v5854_v25, %v5853_v42  ;;  %v5990_v17 = vpop.f32.mrb[63].mxu0  ;;  %v10058_v25 = vld [vmem:[#allocation63_spill] sm:$0xff]  ;;  %6777 = vmatpush3.bf16.msra.mxu1 %v7042_v57 }
 0x20f   : > { %v2317_v2 = vadd.f32 %v8522_v3, %v5988_v19  ;;  %v5991_v22 = vadd.f32 %v5990_v17, %v5989_v11  ;;  %2947 = vmatmul.mubr.bf16.gmra.mrb[168].mxu1 %v8355_v7 }
 0x210   : > { %v1716_v43 = vadd.f32 %v8524_v35, %v5855_v18  ;;  %2954 = vmatprep.mubr.bf16.mxu1 %v10051_v55  ;;  %v10060_v18 = vld [vmem:[#allocation64_spill] sm:$0xff]  ;;  %v10062_v55 = vld [vmem:[#allocation67_spill] sm:$0xff] }
 0x211   : > { %v8679_v47 = vadd.f32 %v2317_v2, %v1705_v15  ;;  %v2320_v33 = vadd.f32 %v10052_v24, %v5991_v22  ;;  %v10061_v2 = vld [vmem:[#allocation52_spill] sm:$0xff]  ;;  %v7043_v22 = vld [vmem:[#allocation11 + $0x48] sm:$0xff]  }
 0x212   : > { %v5856_v37 = vpop.f32.mrb[64].mxu1  ;;  %6778 = vmatprep.subr.bf16.mxu1 %v7043_v22 }
 0x213   : > { %v8682_v21 = vadd.f32 %v2320_v33, %v1708_v4  ;;  %v5992_v62 = vpop.f32.mrb[64].mxu0  ;;  %v5857_v32 = vpop.f32.mrb[65].mxu1  ;;  %6779 = vmatpush3.bf16.msra.mxu1 %v7043_v22 }
 0x214   : > { %v5858_v60 = vadd.f32 %v5857_v32, %v5856_v37  ;;  %v5993_v3 = vpop.f32.mrb[65].mxu0  ;;  %v5859_v59 = vpop.f32.mrb[66].mxu1 }
 0x215   : > { %v5994_v26 = vadd.f32 %v5993_v3, %v5992_v62  ;;  %v5995_v7 = vpop.f32.mrb[66].mxu0  ;;  %v5860_v13 = vpop.f32.mrb[67].mxu1 }
 0x216   : > { %v1721_v35 = vadd.f32 %v5858_v60, %v8538_v27  ;;  %v5861_v40 = vadd.f32 %v5860_v13, %v5859_v59  ;;  %v5996_v8 = vpop.f32.mrb[67].mxu0 }
 0x217   : > { %v2325_v63 = vadd.f32 %v5994_v26, %v10053_v16  ;;  %v5997_v44 = vadd.f32 %v5996_v8, %v5995_v7  ;;  %2955 = vmatmul.mubr.bf16.gmra.mrb[172].mxu1 %v10054_v49  ;;  %v7044_v26 = vld [vmem:[#allocation11 + $0x50] sm:$0xff]   ;;  %v10063_v8 = vld [vmem:[#allocation69_spill] sm:$0xff] }
 0x218   : > { %v1724_v31 = vadd.f32 %v5861_v40, %v10055_v48  ;;  %2962 = vmatprep.mubr.bf16.mxu1 %v10056_v51  ;;  %6780 = vmatprep.subr.bf16.mxu1 %v7044_v26  ;;  %v10066_v51 = vld [vmem:[#allocation73_spill] sm:$0xff] }
 0x219   : > { %v8689_v9 = vadd.f32 %v2325_v63, %v1713_v41  ;;  %v2328_v15 = vadd.f32 %v5997_v44, %v8550_v12  ;;  %v10059_v41 = vld [vmem:[#allocation51_spill] sm:$0xff]  ;;  %v10064_v44 = vld [vmem:[#allocation72_spill] sm:$0xff]  ;;  %6781 = vmatpush3.bf16.msra.mxu1 %v7044_v26 }
 0x21a   : > { %v5862_v61 = vpop.f32.mrb[68].mxu1  ;;  %v7049_v26 = vld [vmem:[#allocation11 + $0x68] sm:$0xff]  }
 0x21b   : > { %v8692_v52 = vadd.f32 %v2328_v15, %v1716_v43  ;;  %v5998_v14 = vpop.f32.mrb[68].mxu0  ;;  %v5863_v27 = vpop.f32.mrb[69].mxu1 }
 0x21c   : > { %v5864_v23 = vadd.f32 %v5863_v27, %v5862_v61  ;;  %v5999_v4 = vpop.f32.mrb[69].mxu0  ;;  %v5865_v56 = vpop.f32.mrb[70].mxu1  ;;  %v10067_v61 = vld [vmem:[#allocation55_spill] sm:$0xff]  ;;  %v7045_v27 = vld [vmem:[#allocation11 + $0x58] sm:$0xff]  }
 0x21d   : > { %v6000_v1 = vadd.f32 %v5999_v4, %v5998_v14  ;;  %v6001_v5 = vpop.f32.mrb[70].mxu0  ;;  %v5866_v28 = vpop.f32.mrb[71].mxu1  ;;  %v7041_v14 = vld [vmem:[#allocation11 + $0x18] sm:$0xff]   ;;  %v10069_v4 = vld [vmem:[#allocation75_spill] sm:$0xff]  ;;  %6782 = vmatprep.subr.bf16.mxu1 %v7045_v27 }
 0x21e   : > { %v1729_v42 = vadd.f32 %v10057_v34, %v5864_v23  ;;  %v5867_v19 = vadd.f32 %v5866_v28, %v5865_v56  ;;  %v6002_v11 = vpop.f32.mrb[71].mxu0  ;;  %6734 = vmatprep.subr.bf16.mxu0 %v7041_v14  ;;  %6783 = vmatpush3.bf16.msra.mxu1 %v7045_v27 }
 0x21f   : > { %v2333_v20 = vadd.f32 %v10058_v25, %v6000_v1  ;;  %v6003_v12 = vadd.f32 %v6002_v11, %v6001_v5  ;;  %2963 = vmatmul.mubr.bf16.gmra.mrb[176].mxu1 %v10059_v41  ;;  %6735 = vmatpush3.bf16.msra.mxu0 %v7041_v14  ;;  %v7046_v25 = vld [vmem:[#allocation11 + $0x20] sm:$0xff]  }
 0x220   : > { %v1732_v17 = vadd.f32 %v10060_v18, %v5867_v19  ;;  %2970 = vmatprep.mubr.bf16.mxu1 %v10061_v2  ;;  %v10071_v18 = vld [vmem:[#allocation68_spill] sm:$0xff]  ;;  %6736 = vmatprep.subr.bf16.mxu0 %v7046_v25 }
 0x221   : > { %v8699_v43 = vadd.f32 %v2333_v20, %v1721_v35  ;;  %v2336_v24 = vadd.f32 %v10062_v55, %v6003_v12  ;;  %v7047_v20 = vld [vmem:[#allocation11 + $0x60] sm:$0xff]  }
 0x222   : > { %v5868_v33 = vpop.f32.mrb[72].mxu1  ;;  %6784 = vmatprep.subr.bf16.mxu1 %v7047_v20 }
 0x223   : > { %v8702_v37 = vadd.f32 %v2336_v24, %v1724_v31  ;;  %v6004_v62 = vpop.f32.mrb[72].mxu0  ;;  %v5869_v32 = vpop.f32.mrb[73].mxu1  ;;  %v10065_v31 = vld [vmem:[#allocation54_spill] sm:$0xff]  ;;  %6737 = vmatpush3.bf16.msra.mxu0 %v7046_v25  ;;  %6785 = vmatpush3.bf16.msra.mxu1 %v7047_v20  ;;  %v7052_v20 = vld [vmem:[#allocation11 + $0x38] sm:$0xff]  }
 0x224   : > { %v5870_v60 = vadd.f32 %v5869_v32, %v5868_v33  ;;  %v6005_v3 = vpop.f32.mrb[73].mxu0  ;;  %v5871_v59 = vpop.f32.mrb[74].mxu1  ;;  %v10074_v32 = vld [vmem:[#allocation71_spill] sm:$0xff]  ;;  %6786 = vmatprep.subr.bf16.mxu1 %v7049_v26 }
 0x225   : > { %v6006_v7 = vadd.f32 %v6005_v3, %v6004_v62  ;;  %v6007_v13 = vpop.f32.mrb[74].mxu0  ;;  %v5872_v40 = vpop.f32.mrb[75].mxu1  ;;  %v10073_v62 = vld [vmem:[#allocation57_spill] sm:$0xff]  ;;  %v10075_v3 = vld [vmem:[#allocation58_spill] sm:$0xff] }
 0x226   : > { %v1737_v16 = vadd.f32 %v5870_v60, %v10063_v8  ;;  %v5873_v35 = vadd.f32 %v5872_v40, %v5871_v59  ;;  %v6008_v63 = vpop.f32.mrb[75].mxu0  ;;  %v7048_v59 = vld [vmem:[#allocation11 + $0x28] sm:$0xff]  }
 0x227   : > { %v2341_v49 = vadd.f32 %v6006_v7, %v10064_v44  ;;  %v6009_v48 = vadd.f32 %v6008_v63, %v6007_v13  ;;  %2971 = vmatmul.mubr.bf16.gmra.mrb[180].mxu1 %v10065_v31  ;;  %v10077_v13 = vld [vmem:[#allocation74_spill] sm:$0xff]  ;;  %6738 = vmatprep.subr.bf16.mxu0 %v7048_v59 }
 0x228   : > { %v1740_v15 = vadd.f32 %v5873_v35, %v10066_v51  ;;  %2978 = vmatprep.mubr.bf16.mxu1 %v10067_v61  ;;  %6739 = vmatpush3.bf16.msra.mxu0 %v7048_v59  ;;  %v7050_v51 = vld [vmem:[#allocation11 + $0x30] sm:$0xff]  }
 0x229   : > { %v8709_v23 = vadd.f32 %v2341_v49, %v1729_v42  ;;  %v2344_v56 = vadd.f32 %v6009_v48, %v10069_v4  ;;  %6787 = vmatpush3.bf16.msra.mxu1 %v7049_v26  ;;  %v7051_v61 = vld [vmem:[#allocation11 + $0x70] sm:$0xff]   ;;  %v10079_v4 = vld [vmem:[#allocation77_spill] sm:$0xff]  ;;  %6740 = vmatprep.subr.bf16.mxu0 %v7050_v51 }
 0x22a   : > { %v5874_v57 = vpop.f32.mrb[76].mxu1  ;;  %6788 = vmatprep.subr.bf16.mxu1 %v7051_v61 }
 0x22b   : > { %10068 = vst [vmem:[#allocation46_spill] sm:$0xff] %v8709_v23  ;;  %v8712_v1 = vadd.f32 %v2344_v56, %v1732_v17  ;;  %v6010_v5 = vpop.f32.mrb[76].mxu0  ;;  %v5875_v28 = vpop.f32.mrb[77].mxu1  ;;  %v10072_v17 = vld [vmem:[#allocation70_spill] sm:$0xff] }
 0x22c   : > { %v5876_v34 = vadd.f32 %v5875_v28, %v5874_v57  ;;  %v6011_v19 = vpop.f32.mrb[77].mxu0  ;;  %v5877_v11 = vpop.f32.mrb[78].mxu1  ;;  %6741 = vmatpush3.bf16.msra.mxu0 %v7050_v51  ;;  %v10090_v51 = vld [vmem:[#allocation82_spill] sm:$0xff] }
 0x22d   : > { %10070 = vst [vmem:[#allocation61_spill] sm:$0xff] %v8712_v1  ;;  %v6012_v12 = vadd.f32 %v6011_v19, %v6010_v5  ;;  %v6013_v41 = vpop.f32.mrb[78].mxu0  ;;  %v5878_v42 = vpop.f32.mrb[79].mxu1  ;;  %v10081_v19 = vld [vmem:[#allocation60_spill] sm:$0xff]  ;;  %6789 = vmatpush3.bf16.msra.mxu1 %v7051_v61  ;;  %6742 = vmatprep.subr.bf16.mxu0 %v7052_v20 }
 0x22e   : > { %v1745_v2 = vadd.f32 %v10071_v18, %v5876_v34  ;;  %v5879_v22 = vadd.f32 %v5878_v42, %v5877_v11  ;;  %v6014_v55 = vpop.f32.mrb[79].mxu0  ;;  %v10082_v11 = vld [vmem:[#allocation81_spill] sm:$0xff]  ;;  %v10084_v42 = vld [vmem:[#allocation83_spill] sm:$0xff] }
 0x22f   : > { %v2349_v24 = vadd.f32 %v10072_v17, %v6012_v12  ;;  %v6015_v33 = vadd.f32 %v6014_v55, %v6013_v41  ;;  %2979 = vmatmul.mubr.bf16.gmra.mrb[184].mxu1 %v10073_v62  ;;  %v7053_v12 = vld [vmem:[#allocation11 + $0x78] sm:$0xff]  }
 0x230   : > { %v1748_v60 = vadd.f32 %v10074_v32, %v5879_v22  ;;  %2986 = vmatprep.mubr.bf16.mxu1 %v10075_v3  ;;  %6790 = vmatprep.subr.bf16.mxu1 %v7053_v12 }
 0x231   : > { %v8719_v7 = vadd.f32 %v2349_v24, %v1737_v16  ;;  %v2352_v40 = vadd.f32 %v10077_v13, %v6015_v33  ;;  %6743 = vmatpush3.bf16.msra.mxu0 %v7052_v20  ;;  %6791 = vmatpush3.bf16.msra.mxu1 %v7053_v12  ;;  %v10086_v13 = vld [vmem:[#allocation76_spill] sm:$0xff] }
 0x232   : > { %v5880_v8 = vpop.f32.mrb[80].mxu1 }
 0x233   : > { %10076 = vst [vmem:[#allocation65_spill] sm:$0xff] %v8719_v7  ;;  %v8722_v35 = vadd.f32 %v2352_v40, %v1740_v15  ;;  %v6016_v63 = vpop.f32.mrb[80].mxu0  ;;  %v5881_v44 = vpop.f32.mrb[81].mxu1  ;;  %v10080_v15 = vld [vmem:[#allocation80_spill] sm:$0xff] }
 0x234   : > { %v5882_v49 = vadd.f32 %v5881_v44, %v5880_v8  ;;  %v6017_v48 = vpop.f32.mrb[81].mxu0  ;;  %v5883_v31 = vpop.f32.mrb[82].mxu1 }
 0x235   : > { %10078 = vst [vmem:[#allocation48_spill] sm:$0xff] %v8722_v35  ;;  %v6018_v14 = vadd.f32 %v6017_v48, %v6016_v63  ;;  %v6019_v27 = vpop.f32.mrb[82].mxu0  ;;  %v5884_v16 = vpop.f32.mrb[83].mxu1  ;;  %v10087_v63 = vld [vmem:[#allocation78_spill] sm:$0xff]  ;;  %v10088_v48 = vld [vmem:[#allocation79_spill] sm:$0xff] }
 0x236   : > { %v1753_v56 = vadd.f32 %v5882_v49, %v10079_v4  ;;  %v5885_v57 = vadd.f32 %v5884_v16, %v5883_v31  ;;  %v6020_v5 = vpop.f32.mrb[83].mxu0 }
 0x237   : > { %v2357_v28 = vadd.f32 %v6018_v14, %v10080_v15  ;;  %v6021_v34 = vadd.f32 %v6020_v5, %v6019_v27  ;;  %2987 = vmatmul.mubr.bf16.gmra.mrb[188].mxu1 %v10081_v19 }
 0x238   : > { %v1756_v25 = vadd.f32 %v5885_v57, %v10082_v11  ;;  %v10092_v11 = vld [vmem:[#allocation84_spill] sm:$0xff] }
 0x239   : > { %v8728_v41 = vadd.f32 %v2357_v28, %v1745_v2  ;;  %v2360_v18 = vadd.f32 %v6021_v34, %v10084_v42 }
 0x23a   : > { %v5886_v22 = vpop.f32.mrb[84].mxu1 }
 0x23b   : > { %10083 = vst [vmem:[#allocation66_spill] sm:$0xff] %v8728_v41  ;;  %v8731_v55 = vadd.f32 %v2360_v18, %v1748_v60  ;;  %v6022_v17 = vpop.f32.mrb[84].mxu0  ;;  %v5887_v24 = vpop.f32.mrb[85].mxu1  ;;  %v10093_v18 = vld [vmem:[#allocation86_spill] sm:$0xff] }
 0x23c   : > { %v5888_v33 = vadd.f32 %v5887_v24, %v5886_v22  ;;  %v6023_v62 = vpop.f32.mrb[85].mxu0  ;;  %v5889_v32 = vpop.f32.mrb[86].mxu1 }
 0x23d   : > { %10085 = vst [vmem:[#allocation49_spill] sm:$0xff] %v8731_v55  ;;  %v6024_v3 = vadd.f32 %v6023_v62, %v6022_v17  ;;  %v6025_v59 = vpop.f32.mrb[86].mxu0  ;;  %v5890_v26 = vpop.f32.mrb[87].mxu1  ;;  %v10094_v17 = vld [vmem:[#allocation87_spill] sm:$0xff] }
 0x23e   : > { %v1761_v2 = vadd.f32 %v10086_v13, %v5888_v33  ;;  %v5891_v40 = vadd.f32 %v5890_v26, %v5889_v32  ;;  %v6026_v8 = vpop.f32.mrb[87].mxu0 }
 0x23f   : > { %v2365_v44 = vadd.f32 %v10087_v63, %v6024_v3  ;;  %v6027_v49 = vadd.f32 %v6026_v8, %v6025_v59 }
 0x240   : > { %v1764_v60 = vadd.f32 %v10088_v48, %v5891_v40  ;;  %v10098_v48 = vld [vmem:[#allocation85_spill] sm:$0xff] }
 0x241   : > { %v8736_v31 = vadd.f32 %v2365_v44, %v1753_v56  ;;  %v2368_v61 = vadd.f32 %v10090_v51, %v6027_v49 }
 0x242   : > { %v5892_v14 = vpop.f32.mrb[88].mxu1 }
 0x243   : > { %10089 = vst [vmem:[#allocation62_spill] sm:$0xff] %v8736_v31  ;;  %v8739_v27 = vadd.f32 %v2368_v61, %v1756_v25  ;;  %v6028_v16 = vpop.f32.mrb[88].mxu0  ;;  %v5893_v4 = vpop.f32.mrb[89].mxu1  ;;  %v10096_v25 = vld [vmem:[#allocation89_spill] sm:$0xff] }
 0x244   : > { %v5894_v57 = vadd.f32 %v5893_v4, %v5892_v14  ;;  %v6029_v5 = vpop.f32.mrb[89].mxu0  ;;  %v5895_v15 = vpop.f32.mrb[90].mxu1 }
 0x245   : > { %10091 = vst [vmem:[#allocation63_spill] sm:$0xff] %v8739_v27  ;;  %v6030_v28 = vadd.f32 %v6029_v5, %v6028_v16  ;;  %v6031_v34 = vpop.f32.mrb[90].mxu0  ;;  %v5896_v19 = vpop.f32.mrb[91].mxu1  ;;  %v10099_v16 = vld [vmem:[#allocation88_spill] sm:$0xff] }
 0x246   : > { %v1769_v20 = vadd.f32 %v5894_v57, %v10092_v11  ;;  %v5897_v12 = vadd.f32 %v5896_v19, %v5895_v15  ;;  %v6032_v42 = vpop.f32.mrb[91].mxu0 }
 0x247   : > { %v2373_v56 = vadd.f32 %v6030_v28, %v10093_v18  ;;  %v6033_v22 = vadd.f32 %v6032_v42, %v6031_v34 }
 0x248   : > { %v1772_v24 = vadd.f32 %v5897_v12, %v10094_v17  ;;  %v7089_v17 = vld [vmem:[#allocation11 + $0x98] sm:$0xff]  }
 0x249   : > { %v8744_v33 = vadd.f32 %v2373_v56, %v1761_v2  ;;  %v2376_v62 = vadd.f32 %v6033_v22, %v10096_v25  ;;  %v8753_v2 = vld [vmem:[%s9854_s3] ss:$0 sm:$0xff] }
 0x24a   : > { %v5898_v32 = vpop.f32.mrb[92].mxu1 }
 0x24b   : > { %10095 = vst [vmem:[#allocation51_spill] sm:$0xff] %v8744_v33  ;;  %v8747_v3 = vadd.f32 %v2376_v62, %v1764_v60  ;;  %v6034_v59 = vpop.f32.mrb[92].mxu0  ;;  %v5899_v26 = vpop.f32.mrb[93].mxu1 }
 0x24c   : > { %v6035_v13 = vpop.f32.mrb[93].mxu0  ;;  %v5901_v40 = vpop.f32.mrb[94].mxu1 }
 0x24d   : > { %10097 = vst [vmem:[#allocation64_spill] sm:$0xff] %v8747_v3  ;;  %v6036_v8 = vadd.f32 %v6035_v13, %v6034_v59  ;;  %v6037_v63 = vpop.f32.mrb[94].mxu0  ;;  %v5902_v44 = vpop.f32.mrb[95].mxu1 }
 0x24e   : > { %v6038_v49 = vpop.f32.mrb[95].mxu0 }
 0x24f   : > { %v2381_v51 = vadd.f32 %v10098_v48, %v6036_v8  ;;  %v6039_v61 = vadd.f32 %v6038_v49, %v6037_v63 }
 0x251   : > { %v2449_v14 = vadd.f32 %v2381_v51, %v1769_v20  ;;  %v2384_v60 = vadd.f32 %v10099_v16, %v6039_v61 }
 0x252   : > { %v6698_v4 = vpop.f32.mrb[96].mxu1 }
 0x253   : > { %v3154_v57 = vadd.f32 %v8753_v2, %v2449_v14  ;;  %v2450_v5 = vadd.f32 %v2384_v60, %v1772_v24  ;;  %v2615_v15 = vpop.f32.mrb[97].mxu1  ;;  %v7054_v14 = vld [vmem:[#allocation9 + $0x40] sm:$0xff]  }
 0x254   : > { %v6699_v28 = vpop.f32.mrb[98].mxu1  ;;  %6200 = vmatprep.subr.bf16.mxu0 %v7054_v14 }
 0x255   : > { %v8757_v34 = vmax.f32 %v3154_v57, 0.0  ;;  %v3155_v19 = vadd.f32 %v8753_v2, %v2450_v5  ;;  %v2617_v11 = vpop.f32.mrb[99].mxu1 }
 0x257   : > { %10100 = vst [vmem:[#allocation52_spill] sm:$0xff] %v8757_v34  ;;  %v8760_v12 = vmax.f32 %v3155_v19, 0.0  ;;  %v9912_v42 = vrot.slane %v8757_v34, 1 }
 0x259   : > { %v9913_v18 = vrot.slane %v8760_v12, 1  ;;  %v8766_v20 = vpack.c.bf16 %v8760_v12, %v8757_v34  ;;  %v7063_v34 = vld [vmem:[#allocation9 + $0xc0] sm:$0xff]  }
 0x25a   : > { %v8768_v56 = vpop.f32.mrb[100].mxu1  ;;  %6336 = vmatprep.subr.bf16.mxu1 %v7063_v34 }
 0x25b   : > { %10101 = vst [vmem:[#allocation67_spill] sm:$0xff] %v8766_v20  ;;  %v2629_v22 = vpop.f32.mrb[101].mxu1  ;;  %v8776_v24 = vsel %vm1158_vm1, %v9912_v42, %v9913_v18 }
 0x25c   : > { %v8778_v25 = vpop.f32.mrb[102].mxu1 }
 0x25d   : > { %v2632_v62 = vpop.f32.mrb[103].mxu1 }
 0x262   : > { %v8780_v32 = vpop.f32.mrb[104].mxu1 }
 0x263   : > { %v8782_v59 = vpop.f32.mrb[105].mxu1 }
 0x264   : > { %v8784_v26 = vpop.f32.mrb[106].mxu1 }
 0x265   : > { %v8786_v13 = vpop.f32.mrb[107].mxu1 }
 0x26a   : > { %v8788_v40 = vpop.f32.mrb[108].mxu1 }
 0x26b   : > { %v8790_v8 = vpop.f32.mrb[109].mxu1 }
 0x26c   : > { %v8792_v63 = vpop.f32.mrb[110].mxu1 }
 0x26d   : > { %v8794_v44 = vpop.f32.mrb[111].mxu1 }
 0x272   : > { %v8796_v49 = vpop.f32.mrb[112].mxu1 }
 0x273   : > { %v8798_v48 = vpop.f32.mrb[113].mxu1 }
 0x274   : > { %v8800_v51 = vpop.f32.mrb[114].mxu1 }
 0x275   : > { %v8802_v61 = vpop.f32.mrb[115].mxu1 }
 0x27a   : > { %v8804_v16 = vpop.f32.mrb[116].mxu1 }
 0x27b   : > { %v8806_v60 = vpop.f32.mrb[117].mxu1 }
 0x27c   : > { %v8808_v57 = vpop.f32.mrb[118].mxu1 }
 0x27d   : > { %10103 = vst [vmem:[#allocation69_spill] sm:$0xff] %v8808_v57  ;;  %v8810_v5 = vpop.f32.mrb[119].mxu1 }
 0x282   : > { %v8812_v15 = vpop.f32.mrb[120].mxu1 }
 0x283   : > { %10104 = vst [vmem:[#allocation72_spill] sm:$0xff] %v8812_v15  ;;  %v8814_v19 = vpop.f32.mrb[121].mxu1 }
 0x284   : > { %10105 = vst [vmem:[#allocation54_spill] sm:$0xff] %v8814_v19  ;;  %v8816_v11 = vpop.f32.mrb[122].mxu1 }
 0x285   : > { %10106 = vst [vmem:[#allocation73_spill] sm:$0xff] %v8816_v11  ;;  %v8818_v42 = vpop.f32.mrb[123].mxu1 }
 0x286   : > { %10107 = vst [vmem:[#allocation55_spill] sm:$0xff] %v8818_v42 }
 0x28a   : > { %v8820_v18 = vpop.f32.mrb[124].mxu1 }
 0x28b   : > { %10108 = vst [vmem:[#allocation75_spill] sm:$0xff] %v8820_v18  ;;  %v8822_v20 = vpop.f32.mrb[125].mxu1 }
 0x28c   : > { %10109 = vst [vmem:[#allocation68_spill] sm:$0xff] %v8822_v20  ;;  %v8824_v14 = vpop.f32.mrb[126].mxu1 }
 0x28d   : > { %10110 = vst [vmem:[#allocation70_spill] sm:$0xff] %v8824_v14  ;;  %v8826_v3 = vpop.f32.mrb[127].mxu1 }
 0x28e   : > { %10111 = vst [vmem:[#allocation57_spill] sm:$0xff] %v8826_v3 }
 0x292   : > { %v6080_v33 = vpop.f32.mrb[128].mxu1 }
 0x293   : > { %v6081_v27 = vpop.f32.mrb[129].mxu1 }
 0x294   : > { %v6083_v31 = vpop.f32.mrb[130].mxu1 }
 0x295   : > { %v6084_v55 = vpop.f32.mrb[131].mxu1 }
 0x29a   : > { %v6086_v41 = vpop.f32.mrb[132].mxu1 }
 0x29b   : > { %v6087_v15 = vpop.f32.mrb[133].mxu1 }
 0x29c   : > { %v6088_v35 = vadd.f32 %v6087_v15, %v6086_v41  ;;  %v6089_v11 = vpop.f32.mrb[134].mxu1 }
 0x29d   : > { %v6090_v7 = vpop.f32.mrb[135].mxu1 }
 0x29e   : > { %v2877_v42 = vadd.f32 %v6698_v4, %v6088_v35  ;;  %v6091_v19 = vadd.f32 %v6090_v7, %v6089_v11  ;;  %v9917_v7 = vrot.slane %v8760_v12, 7 }
 0x2a0   : > { %v3025_v18 = vadd.f32 %v2877_v42, %v8606_v10  ;;  %v2880_v20 = vadd.f32 %v6699_v28, %v6091_v19 }
 0x2a2   : > { %v3124_v14 = vadd.f32 %v8753_v2, %v3025_v18  ;;  %v3026_v1 = vadd.f32 %v2880_v20, %v8612_v46  ;;  %v6092_v3 = vpop.f32.mrb[136].mxu1  ;;  %v10112_v18 = vrot.slane %v8760_v12, 1 }
 0x2a3   : > { %v6093_v34 = vpop.f32.mrb[137].mxu1 }
 0x2a4   : > { %v3156_v33 = vmax.f32 %v3124_v14, 0.0  ;;  %v3125_v31 = vadd.f32 %v8753_v2, %v3026_v1  ;;  %v6094_v55 = vadd.f32 %v6093_v34, %v6092_v3  ;;  %v6095_v27 = vpop.f32.mrb[138].mxu1  ;;  %v10114_v34 = vld [vmem:[#allocation35_spill] sm:$0xff] }
 0x2a5   : > { %v6096_v57 = vpop.f32.mrb[139].mxu1 }
 0x2a6   : > { %v3188_v41 = vrot.slane %v3156_v33, 7  ;;  %v3157_v15 = vmax.f32 %v3125_v31, 0.0  ;;  %v2885_v23 = vadd.f32 %v6094_v55, %v2629_v22  ;;  %v6097_v35 = vadd.f32 %v6096_v57, %v6095_v27 }
 0x2a7   : > { %v3316_v10 = vrot.slane %v3156_v33, 1 }
 0x2a8   : > { %v3189_v4 = vrot.slane %v3157_v15, 7  ;;  %v3027_v28 = vadd.f32 %v2885_v23, %v8619_v39  ;;  %v2888_v42 = vadd.f32 %v6097_v35, %v2632_v62  ;;  %v3317_v46 = vrot.slane %v3157_v15, 1  ;;  %v10113_v23 = vld [vmem:[#allocation34_spill] sm:$0xff] }
 0x2a9   : > { %v3379_v1 = vsel %vm1158_vm1, %v10112_v18, %v3316_v10  ;;  %v8838_v3 = vpack.c.bf16 %v3157_v15, %v3156_v33  ;;  %v3251_v20 = vsel %vm1029_vm3, %v9917_v7, %v3188_v41 }
 0x2aa   : > { %v3126_v22 = vadd.f32 %v8753_v2, %v3027_v28  ;;  %v3028_v57 = vadd.f32 %v2888_v42, %v8622_v6  ;;  %v6098_v19 = vpop.f32.mrb[140].mxu1  ;;  %v3378_v39 = vsel %vm1158_vm1, %v3316_v10, %v3317_v46  ;;  %v3411_v62 = vmul.f32 %v10113_v23, %v3379_v1 }
 0x2ab   : > { %v6099_v11 = vpop.f32.mrb[141].mxu1  ;;  %v3250_v14 = vsel %vm1029_vm3, %v3188_v41, %v3189_v4  ;;  %v3252_v33 = vmul.f32 %v10114_v34, %v3251_v20 }
 0x2ac   : > { %v3158_v31 = vmax.f32 %v3126_v22, 0.0  ;;  %v3127_v55 = vadd.f32 %v8753_v2, %v3028_v57  ;;  %v6100_v27 = vadd.f32 %v6099_v11, %v6098_v19  ;;  %v6101_v15 = vpop.f32.mrb[142].mxu1  ;;  %v8854_v35 = vpack.c.bf16 %v3411_v62, %v8776_v24  ;;  %v10115_v19 = vld [vmem:[#allocation19_spill] sm:$0xff] }
 0x2ad   : > { %v6102_v6 = vpop.f32.mrb[143].mxu1  ;;  %v8856_v28 = vpack.c.bf16 %v3250_v14, %v3252_v33 }
 0x2ae   : > { %v3159_v10 = vmax.f32 %v3127_v55, 0.0  ;;  %v2893_v42 = vadd.f32 %v8768_v56, %v6100_v27  ;;  %v6103_v18 = vadd.f32 %v6102_v6, %v6101_v15  ;;  %v3318_v1 = vrot.slane %v3158_v31, 1 }
 0x2af   : > { %v3190_v23 = vrot.slane %v3158_v31, 7 }
 0x2b0   : > { %v3319_v41 = vrot.slane %v3159_v10, 1  ;;  %v3029_v20 = vadd.f32 %v2893_v42, %v8629_v0  ;;  %v2896_v22 = vadd.f32 %v8778_v25, %v6103_v18  ;;  %v3377_v57 = vsel %vm1158_vm1, %v3317_v46, %v3318_v1  ;;  %v10116_v25 = vld [vmem:[#allocation36_spill] sm:$0xff] }
 0x2b1   : > { %v3381_v24 = vmul.f32 %v10115_v19, %v3377_v57  ;;  %v8864_v62 = vpack.c.bf16 %v3159_v10, %v3158_v31  ;;  %v3191_v11 = vrot.slane %v3159_v10, 7  ;;  %v3249_v14 = vsel %vm1029_vm3, %v3189_v4, %v3190_v23 }
 0x2b2   : > { %v3128_v56 = vadd.f32 %v8753_v2, %v3029_v20  ;;  %v3030_v34 = vadd.f32 %v2896_v22, %v8632_v30  ;;  %v6104_v33 = vpop.f32.mrb[144].mxu1  ;;  %v3376_v0 = vsel %vm1158_vm1, %v3318_v1, %v3319_v41  ;;  %v3254_v55 = vmul.f32 %v10116_v25, %v3249_v14  ;;  %v10117_v14 = vld [vmem:[#allocation20_spill] sm:$0xff] }
 0x2b3   : > { %v6105_v27 = vpop.f32.mrb[145].mxu1  ;;  %v8873_v46 = vpack.c.bf16 %v3381_v24, %v3378_v39  ;;  %v3248_v31 = vsel %vm1029_vm3, %v3190_v23, %v3191_v11 }
 0x2b4   : > { %v3160_v15 = vmax.f32 %v3128_v56, 0.0  ;;  %v3129_v6 = vadd.f32 %v8753_v2, %v3030_v34  ;;  %v6106_v4 = vadd.f32 %v6105_v27, %v6104_v33  ;;  %v6107_v10 = vpop.f32.mrb[146].mxu1  ;;  %v8878_v42 = vpack.c.bf16 %v3248_v31, %v3254_v55  ;;  %v7065_v31 = vld [vmem:[#allocation9 + $0x80] sm:$0xff]  }
 0x2b5   : > { %v6108_v30 = vpop.f32.mrb[147].mxu1  ;;  %6744 = vmatprep.mubr.bf16.mxu0 %v8873_v46  ;;  %6792 = vmatprep.mubr.bf16.mxu1 %v8873_v46 }
 0x2b6   : > { %v3320_v18 = vrot.slane %v3160_v15, 1  ;;  %v3161_v1 = vmax.f32 %v3129_v6, 0.0  ;;  %v2901_v39 = vadd.f32 %v6106_v4, %v8782_v59  ;;  %v6109_v20 = vadd.f32 %v6108_v30, %v6107_v10  ;;  %v7066_v30 = vld [vmem:[#allocation9 + $0xc8] sm:$0xff]  }
 0x2b7   : > { %v3192_v22 = vrot.slane %v3160_v15, 7 }
 0x2b8   : > { %v3031_v23 = vadd.f32 %v2901_v39, %v8639_v29  ;;  %v2904_v57 = vadd.f32 %v6109_v20, %v8786_v13  ;;  %v3375_v19 = vsel %vm1158_vm1, %v3319_v41, %v3320_v18  ;;  %v3321_v24 = vrot.slane %v3161_v1, 1  ;;  %v7055_v13 = vld [vmem:[#allocation9] sm:$0xff]   ;;  %v10118_v41 = vld [vmem:[#allocation37_spill] sm:$0xff] }
 0x2b9   : > { %v3383_v56 = vmul.f32 %v10117_v14, %v3375_v19  ;;  %v8888_v34 = vpack.c.bf16 %v3161_v1, %v3160_v15  ;;  %v3193_v33 = vrot.slane %v3161_v1, 7  ;;  %v3247_v25 = vsel %vm1029_vm3, %v3191_v11, %v3192_v22  ;;  %v7056_v15 = vld [vmem:[#allocation9 + $0x48] sm:$0xff]  }
 0x2ba   : > { %v3130_v59 = vadd.f32 %v8753_v2, %v3031_v23  ;;  %v3032_v55 = vadd.f32 %v2904_v57, %v8642_v58  ;;  %v6110_v27 = vpop.f32.mrb[148].mxu1  ;;  %v3374_v29 = vsel %vm1158_vm1, %v3320_v18, %v3321_v24  ;;  %v3256_v6 = vmul.f32 %v10118_v41, %v3247_v25  ;;  %v7058_v25 = vld [vmem:[#allocation9 + $0x50] sm:$0xff]  }
 0x2bb   : > { %v6111_v4 = vpop.f32.mrb[149].mxu1  ;;  %v8897_v10 = vpack.c.bf16 %v3383_v56, %v3376_v0  ;;  %v3246_v11 = vsel %vm1029_vm3, %v3192_v22, %v3193_v33  ;;  %v7057_v22 = vld [vmem:[#allocation9 + $0x8] sm:$0xff]  }
 0x2bc   : > { %v3162_v1 = vmax.f32 %v3130_v59, 0.0  ;;  %v3131_v39 = vadd.f32 %v8753_v2, %v3032_v55  ;;  %v6112_v58 = vadd.f32 %v6111_v4, %v6110_v27  ;;  %v6113_v20 = vpop.f32.mrb[150].mxu1  ;;  %v8902_v23 = vpack.c.bf16 %v3246_v11, %v3256_v6  ;;  %v7067_v56 = vld [vmem:[#allocation9 + $0x88] sm:$0xff]   ;;  %v7069_v59 = vld [vmem:[#allocation9 + $0xd0] sm:$0xff]   ;;  %v10119_v4 = vld [vmem:[#allocation21_spill] sm:$0xff] }
 0x2bd   : > { %v6114_v18 = vpop.f32.mrb[151].mxu1  ;;  %6745 = vmatmul.mubr.bf16.vlgmr.msra.gmra.mrb[96].mxu0 %v8897_v10  ;;  %6793 = vmatmul.mubr.bf16.vlgmr.msra.gmra.mrb[192].mxu1 %v8897_v10 }
 0x2be   : > { %v8906_v57 = vmax.f32 %v3131_v39, 0.0  ;;  %v2909_v0 = vadd.f32 %v8780_v32, %v6112_v58  ;;  %v6115_v19 = vadd.f32 %v6114_v18, %v6113_v20  ;;  %v3322_v14 = vrot.slane %v3162_v1, 1  ;;  %6201 = vmatpush3.bf16.msra.mxu0 %v7055_v13  ;;  %6337 = vmatpush3.bf16.msra.mxu1 %v7065_v31  ;;  %v7059_v39 = vld [vmem:[#allocation9 + $0x10] sm:$0xff]   ;;  %v7060_v18 = vld [vmem:[#allocation9 + $0x58] sm:$0xff]  }
 0x2bf   : > { %6202 = vmatprep.subr.bf16.mxu0 %v7056_v15  ;;  %6338 = vmatprep.subr.bf16.mxu1 %v7066_v30  ;;  %v3194_v55 = vrot.slane %v3162_v1, 7  ;;  %v7071_v58 = vld [vmem:[#allocation9 + $0x90] sm:$0xff]  }
 0x2c0   : > { %v3033_v27 = vadd.f32 %v2909_v0, %v8649_v54  ;;  %v2912_v41 = vadd.f32 %v8784_v26, %v6115_v19  ;;  %v3373_v6 = vsel %vm1158_vm1, %v3321_v24, %v3322_v14  ;;  %v3323_v32 = vrot.slane %v8906_v57, 1  ;;  %v10120_v0 = vld [vmem:[#allocation38_spill] sm:$0xff] }
 0x2c1   : > { %v3385_v11 = vmul.f32 %v10119_v4, %v3373_v6  ;;  %v8916_v13 = vpack.c.bf16 %v8906_v57, %v3162_v1  ;;  %v3195_v31 = vrot.slane %v8906_v57, 7  ;;  %v3245_v15 = vsel %vm1029_vm3, %v3193_v33, %v3194_v55  ;;  %v7072_v57 = vld [vmem:[#allocation9 + $0xd8] sm:$0xff]  }
 0x2c2   : > { %v3132_v30 = vadd.f32 %v8753_v2, %v3033_v27  ;;  %v3034_v54 = vadd.f32 %v2912_v41, %v8652_v50  ;;  %v6116_v26 = vpop.f32.mrb[152].mxu1  ;;  %v3372_v24 = vsel %vm1158_vm1, %v3322_v14, %v3323_v32  ;;  %6203 = vmatpush3.bf16.msra.mxu0 %v7057_v22  ;;  %6339 = vmatpush3.bf16.msra.mxu1 %v7067_v56  ;;  %v7061_v6 = vld [vmem:[#allocation9 + $0x18] sm:$0xff]  }
 0x2c3   : > { %v6117_v20 = vpop.f32.mrb[153].mxu1  ;;  %v8925_v1 = vpack.c.bf16 %v3385_v11, %v3374_v29  ;;  %6204 = vmatprep.subr.bf16.mxu0 %v7058_v25  ;;  %6340 = vmatprep.subr.bf16.mxu1 %v7069_v59  ;;  %v3244_v33 = vsel %vm1029_vm3, %v3194_v55, %v3195_v31  ;;  %v3258_v50 = vmul.f32 %v10120_v0, %v3245_v15  ;;  %v7073_v4 = vld [vmem:[#allocation9 + $0x98] sm:$0xff]   ;;  %v7062_v11 = vld [vmem:[#allocation9 + $0x60] sm:$0xff]  }
 0x2c4   : > { %v3164_v19 = vmax.f32 %v3132_v30, 0.0  ;;  %v3133_v27 = vadd.f32 %v8753_v2, %v3034_v54  ;;  %v6118_v14 = vadd.f32 %v6117_v20, %v6116_v26  ;;  %v6119_v22 = vpop.f32.mrb[154].mxu1  ;;  %v7075_v15 = vld [vmem:[#allocation9 + $0xe0] sm:$0xff]  }
 0x2c5   : > { %v6120_v41 = vpop.f32.mrb[155].mxu1  ;;  %6748 = vmatprep.mubr.bf16.mxu0 %v8925_v1  ;;  %6796 = vmatprep.mubr.bf16.mxu1 %v8925_v1  ;;  %v8933_v29 = vpack.c.bf16 %v3244_v33, %v3258_v50  ;;  %v10121_v33 = vld [vmem:[#allocation22_spill] sm:$0xff] }
 0x2c6   : > { %v8935_v56 = vmax.f32 %v3133_v27, 0.0  ;;  %v2917_v25 = vadd.f32 %v6118_v14, %v8790_v8  ;;  %v6121_v59 = vadd.f32 %v6120_v41, %v6119_v22  ;;  %v3324_v55 = vrot.slane %v3164_v19, 1  ;;  %6205 = vmatpush3.bf16.msra.mxu0 %v7059_v39  ;;  %6341 = vmatpush3.bf16.msra.mxu1 %v7071_v58  ;;  %v7064_v50 = vld [vmem:[#allocation9 + $0x20] sm:$0xff]   ;;  %v7068_v22 = vld [vmem:[#allocation9 + $0x68] sm:$0xff]  }
 0x2c7   : > { %6206 = vmatprep.subr.bf16.mxu0 %v7060_v18  ;;  %6342 = vmatprep.subr.bf16.mxu1 %v7072_v57  ;;  %v3196_v30 = vrot.slane %v3164_v19, 7  ;;  %v7077_v27 = vld [vmem:[#allocation9 + $0xa0] sm:$0xff]   ;;  %v7078_v41 = vld [vmem:[#allocation9 + $0xe8] sm:$0xff]  }
 0x2c8   : > { %v3035_v54 = vadd.f32 %v2917_v25, %v8659_v45  ;;  %v2920_v26 = vadd.f32 %v6121_v59, %v8794_v44  ;;  %v3371_v20 = vsel %vm1158_vm1, %v3323_v32, %v3324_v55  ;;  %v3325_v8 = vrot.slane %v8935_v56, 1 }
 0x2c9   : > { %v3387_v0 = vmul.f32 %v10121_v33, %v3371_v20  ;;  %v8945_v39 = vpack.c.bf16 %v8935_v56, %v3164_v19  ;;  %v3197_v58 = vrot.slane %v8935_v56, 7  ;;  %v3243_v18 = vsel %vm1029_vm3, %v3195_v31, %v3196_v30  ;;  %v10122_v56 = vld [vmem:[#allocation39_spill] sm:$0xff]  ;;  %v7074_v33 = vld [vmem:[#allocation9 + $0x70] sm:$0xff]  }
 0x2ca   : > { %v3134_v57 = vadd.f32 %v8753_v2, %v3035_v54  ;;  %v3036_v45 = vadd.f32 %v2920_v26, %v8662_v36  ;;  %v6122_v44 = vpop.f32.mrb[156].mxu1  ;;  %v3370_v32 = vsel %vm1158_vm1, %v3324_v55, %v3325_v8  ;;  %6207 = vmatpush3.bf16.msra.mxu0 %v7061_v6  ;;  %6343 = vmatpush3.bf16.msra.mxu1 %v7073_v4  ;;  %v7070_v26 = vld [vmem:[#allocation9 + $0x28] sm:$0xff]  }
 0x2cb   : > { %v6123_v14 = vpop.f32.mrb[157].mxu1  ;;  %v8954_v19 = vpack.c.bf16 %v3387_v0, %v3372_v24  ;;  %6208 = vmatprep.subr.bf16.mxu0 %v7062_v11  ;;  %6344 = vmatprep.subr.bf16.mxu1 %v7075_v15  ;;  %v3242_v31 = vsel %vm1029_vm3, %v3196_v30, %v3197_v58  ;;  %v3260_v36 = vmul.f32 %v10122_v56, %v3243_v18  ;;  %v7079_v20 = vld [vmem:[#allocation9 + $0xa8] sm:$0xff]   ;;  %v7081_v0 = vld [vmem:[#allocation9 + $0xf0] sm:$0xff]  }
 0x2cc   : > { %v3166_v25 = vmax.f32 %v3134_v57, 0.0  ;;  %v3135_v59 = vadd.f32 %v8753_v2, %v3036_v45  ;;  %v6124_v55 = vadd.f32 %v6123_v14, %v6122_v44  ;;  %v6125_v6 = vpop.f32.mrb[158].mxu1  ;;  %v10123_v14 = vld [vmem:[#allocation23_spill] sm:$0xff]  ;;  %v7076_v56 = vld [vmem:[#allocation9 + $0x30] sm:$0xff]  }
 0x2cd   : > { %v6126_v54 = vpop.f32.mrb[159].mxu1  ;;  %6749 = vmatmul.mubr.bf16.gmra.mrb[100].mxu0 %v8954_v19  ;;  %6797 = vmatmul.mubr.bf16.gmra.mrb[196].mxu1 %v8954_v19  ;;  %v8962_v24 = vpack.c.bf16 %v3242_v31, %v3260_v36  ;;  %v7083_v36 = vld [vmem:[#allocation9 + $0xb0] sm:$0xff]  }
 0x2ce   : > { %v8964_v4 = vmax.f32 %v3135_v59, 0.0  ;;  %v2925_v11 = vadd.f32 %v8788_v40, %v6124_v55  ;;  %v6127_v15 = vadd.f32 %v6126_v54, %v6125_v6  ;;  %v3326_v30 = vrot.slane %v3166_v25, 1  ;;  %6209 = vmatpush3.bf16.msra.mxu0 %v7064_v50  ;;  %6345 = vmatpush3.bf16.msra.mxu1 %v7077_v27  ;;  %v7080_v55 = vld [vmem:[#allocation9 + $0x78] sm:$0xff]   ;;  %v10124_v54 = vld [vmem:[#allocation40_spill] sm:$0xff] }
 0x2cf   : > { %6210 = vmatprep.subr.bf16.mxu0 %v7068_v22  ;;  %6346 = vmatprep.subr.bf16.mxu1 %v7078_v41  ;;  %v3198_v18 = vrot.slane %v3166_v25, 7  ;;  %v7084_v6 = vld [vmem:[#allocation9 + $0xf8] sm:$0xff]  }
 0x2d0   : > { %v3037_v57 = vadd.f32 %v2925_v11, %v8669_v53  ;;  %v2928_v45 = vadd.f32 %v8792_v63, %v6127_v15  ;;  %v3369_v44 = vsel %vm1158_vm1, %v3325_v8, %v3326_v30  ;;  %v3327_v40 = vrot.slane %v8964_v4, 1 }
 0x2d1   : > { %v3389_v31 = vmul.f32 %v10123_v14, %v3369_v44  ;;  %v8974_v50 = vpack.c.bf16 %v8964_v4, %v3166_v25  ;;  %v3199_v27 = vrot.slane %v8964_v4, 7  ;;  %v3241_v22 = vsel %vm1029_vm3, %v3197_v58, %v3198_v18  ;;  %v8994_v44 = vld [vmem:[#allocation11 + $0x80] sm:$0xff]  }
 0x2d2   : > { %v3136_v41 = vadd.f32 %v8753_v2, %v3037_v57  ;;  %v3038_v53 = vadd.f32 %v2928_v45, %v8672_v38  ;;  %v6128_v63 = vpop.f32.mrb[160].mxu1  ;;  %v3368_v8 = vsel %vm1158_vm1, %v3326_v30, %v3327_v40  ;;  %6211 = vmatpush3.bf16.msra.mxu0 %v7070_v26  ;;  %6347 = vmatpush3.bf16.msra.mxu1 %v7079_v20  ;;  %v7085_v45 = vld [vmem:[#allocation9 + $0xb8] sm:$0xff]  }
 0x2d3   : > { %v6129_v59 = vpop.f32.mrb[161].mxu1  ;;  %v8983_v25 = vpack.c.bf16 %v3389_v31, %v3370_v32  ;;  %6212 = vmatprep.subr.bf16.mxu0 %v7074_v33  ;;  %6348 = vmatprep.subr.bf16.mxu1 %v7081_v0  ;;  %v3240_v58 = vsel %vm1029_vm3, %v3198_v18, %v3199_v27  ;;  %v3262_v38 = vmul.f32 %v10124_v54, %v3241_v22  ;;  %v7082_v18 = vld [vmem:[#allocation9 + $0x38] sm:$0xff]  }
 0x2d4   : > { %v3168_v4 = vmax.f32 %v3136_v41, 0.0  ;;  %v3137_v11 = vadd.f32 %v8753_v2, %v3038_v53  ;;  %v6130_v15 = vadd.f32 %v6129_v59, %v6128_v63  ;;  %v6131_v30 = vpop.f32.mrb[162].mxu1 }
 0x2d5   : > { %v6132_v26 = vpop.f32.mrb[163].mxu1  ;;  %6752 = vmatprep.mubr.bf16.mxu0 %v8983_v25  ;;  %6800 = vmatprep.mubr.bf16.mxu1 %v8983_v25  ;;  %v8991_v32 = vpack.c.bf16 %v3240_v58, %v3262_v38  ;;  %v10126_v38 = vld [vmem:[#allocation41_spill] sm:$0xff] }
 0x2d6   : > { %v3169_v20 = vmax.f32 %v3137_v11, 0.0  ;;  %v2933_v33 = vadd.f32 %v6130_v15, %v8798_v48  ;;  %v6133_v0 = vadd.f32 %v6132_v26, %v6131_v30  ;;  %v3328_v57 = vrot.slane %v3168_v4, 1  ;;  %6213 = vmatpush3.bf16.msra.mxu0 %v7076_v56  ;;  %6349 = vmatpush3.bf16.msra.mxu1 %v7083_v36  ;;  %v10125_v48 = vld [vmem:[#allocation24_spill] sm:$0xff] }
 0x2d7   : > { %6214 = vmatprep.subr.bf16.mxu0 %v7080_v55  ;;  %6350 = vmatprep.subr.bf16.mxu1 %v7084_v6  ;;  %v3200_v14 = vrot.slane %v3168_v4, 7 }
 0x2d8   : > { %v3039_v31 = vadd.f32 %v2933_v33, %v8679_v47  ;;  %v2936_v22 = vadd.f32 %v6133_v0, %v8802_v61  ;;  %v3367_v41 = vsel %vm1158_vm1, %v3327_v40, %v3328_v57  ;;  %v3329_v53 = vrot.slane %v3169_v20, 1 }
 0x2d9   : > { %v3391_v63 = vmul.f32 %v10125_v48, %v3367_v41  ;;  %v9001_v59 = vpack.c.bf16 %v3169_v20, %v3168_v4  ;;  %v3201_v56 = vrot.slane %v3169_v20, 7  ;;  %v3239_v36 = vsel %vm1029_vm3, %v3199_v27, %v3200_v14 }
 0x2da   : > { %v3138_v55 = vadd.f32 %v8753_v2, %v3039_v31  ;;  %v3040_v6 = vadd.f32 %v2936_v22, %v8682_v21  ;;  %v6134_v58 = vpop.f32.mrb[164].mxu1  ;;  %v3366_v47 = vsel %vm1158_vm1, %v3328_v57, %v3329_v53  ;;  %6215 = vmatpush3.bf16.msra.mxu0 %v7082_v18  ;;  %6351 = vmatpush3.bf16.msra.mxu1 %v7085_v45  ;;  %v10127_v22 = vld [vmem:[#allocation25_spill] sm:$0xff] }
 0x2db   : > { %v6135_v61 = vpop.f32.mrb[165].mxu1  ;;  %v9009_v40 = vpack.c.bf16 %v3391_v63, %v3368_v8  ;;  %6824 = vmatprep.subr.bf16.mxu0 %v8994_v44  ;;  %v3238_v54 = vsel %vm1029_vm3, %v3200_v14, %v3201_v56  ;;  %v3264_v27 = vmul.f32 %v10126_v38, %v3239_v36 }
 0x2dc   : > { %v3170_v4 = vmax.f32 %v3138_v55, 0.0  ;;  %v3139_v11 = vadd.f32 %v8753_v2, %v3040_v6  ;;  %v6136_v21 = vadd.f32 %v6135_v61, %v6134_v58  ;;  %v6137_v15 = vpop.f32.mrb[166].mxu1 }
 0x2dd   : > { %v6138_v30 = vpop.f32.mrb[167].mxu1  ;;  %6753 = vmatmul.mubr.bf16.gmra.mrb[104].mxu0 %v9009_v40  ;;  %6801 = vmatmul.mubr.bf16.gmra.mrb[200].mxu1 %v9009_v40  ;;  %v9018_v26 = vpack.c.bf16 %v3238_v54, %v3264_v27 }
 0x2de   : > { %v3171_v8 = vmax.f32 %v3139_v11, 0.0  ;;  %v2941_v20 = vadd.f32 %v8796_v49, %v6136_v21  ;;  %v6139_v33 = vadd.f32 %v6138_v30, %v6137_v15  ;;  %v3330_v0 = vrot.slane %v3170_v4, 1 }
 0x2df   : > { %v3202_v57 = vrot.slane %v3170_v4, 7 }
 0x2e0   : > { %v3041_v18 = vadd.f32 %v2941_v20, %v8689_v9  ;;  %v2944_v45 = vadd.f32 %v8800_v51, %v6139_v33  ;;  %v3365_v14 = vsel %vm1158_vm1, %v3329_v53, %v3330_v0  ;;  %v3331_v31 = vrot.slane %v3171_v8, 1  ;;  %v10128_v51 = vld [vmem:[#allocation42_spill] sm:$0xff] }
 0x2e1   : > { %v3393_v41 = vmul.f32 %v10127_v22, %v3365_v14  ;;  %v9026_v48 = vpack.c.bf16 %v3171_v8, %v3170_v4  ;;  %v3203_v63 = vrot.slane %v3171_v8, 7  ;;  %v3237_v36 = vsel %vm1029_vm3, %v3201_v56, %v3202_v57 }
 0x2e2   : > { %v3140_v49 = vadd.f32 %v8753_v2, %v3041_v18  ;;  %v3042_v55 = vadd.f32 %v2944_v45, %v8692_v52  ;;  %v6140_v6 = vpop.f32.mrb[168].mxu1  ;;  %v3364_v9 = vsel %vm1158_vm1, %v3330_v0, %v3331_v31  ;;  %v3266_v58 = vmul.f32 %v10128_v51, %v3237_v36  ;;  %v10129_v18 = vld [vmem:[#allocation26_spill] sm:$0xff] }
 0x2e3   : > { %v6141_v53 = vpop.f32.mrb[169].mxu1  ;;  %v9035_v61 = vpack.c.bf16 %v3393_v41, %v3366_v47  ;;  %v3236_v54 = vsel %vm1029_vm3, %v3202_v57, %v3203_v63 }
 0x2e4   : > { %v3172_v38 = vmax.f32 %v3140_v49, 0.0  ;;  %v3141_v27 = vadd.f32 %v8753_v2, %v3042_v55  ;;  %v6142_v56 = vadd.f32 %v6141_v53, %v6140_v6  ;;  %v6143_v4 = vpop.f32.mrb[170].mxu1  ;;  %v9040_v11 = vpack.c.bf16 %v3236_v54, %v3266_v58 }
 0x2e5   : > { %v6144_v52 = vpop.f32.mrb[171].mxu1  ;;  %6756 = vmatprep.mubr.bf16.mxu0 %v9035_v61  ;;  %6804 = vmatprep.mubr.bf16.mxu1 %v9035_v61 }
 0x2e6   : > { %v3173_v21 = vmax.f32 %v3141_v27, 0.0  ;;  %v2949_v15 = vadd.f32 %v6142_v56, %v8806_v60  ;;  %v6145_v47 = vadd.f32 %v6144_v52, %v6143_v4  ;;  %v3332_v30 = vrot.slane %v3172_v38, 1 }
 0x2e7   : > { %v3204_v8 = vrot.slane %v3172_v38, 7 }
 0x2e8   : > { %v3043_v20 = vadd.f32 %v2949_v15, %v8699_v43  ;;  %v2952_v33 = vadd.f32 %v6145_v47, %v8810_v5  ;;  %v3363_v0 = vsel %vm1158_vm1, %v3331_v31, %v3332_v30  ;;  %v3333_v57 = vrot.slane %v3173_v21, 1  ;;  %v10130_v5 = vld [vmem:[#allocation43_spill] sm:$0xff]  ;;  %v10132_v47 = vld [vmem:[#allocation69_spill] sm:$0xff] }
 0x2e9   : > { %v3395_v45 = vmul.f32 %v10129_v18, %v3363_v0  ;;  %v9050_v14 = vpack.c.bf16 %v3173_v21, %v3172_v38  ;;  %v3205_v22 = vrot.slane %v3173_v21, 7  ;;  %v3235_v41 = vsel %vm1029_vm3, %v3203_v63, %v3204_v8  ;;  %v10131_v21 = vld [vmem:[#allocation46_spill] sm:$0xff] }
 0x2ea   : > { %v3142_v60 = vadd.f32 %v8753_v2, %v3043_v20  ;;  %v3044_v36 = vadd.f32 %v2952_v33, %v8702_v37  ;;  %v6146_v49 = vpop.f32.mrb[172].mxu1  ;;  %v3362_v43 = vsel %vm1158_vm1, %v3332_v30, %v3333_v57  ;;  %v3268_v55 = vmul.f32 %v10130_v5, %v3235_v41  ;;  %v10133_v33 = vld [vmem:[#allocation27_spill] sm:$0xff] }
 0x2eb   : > { %v6147_v31 = vpop.f32.mrb[173].mxu1  ;;  %v9059_v6 = vpack.c.bf16 %v3395_v45, %v3364_v9  ;;  %v3234_v51 = vsel %vm1029_vm3, %v3204_v8, %v3205_v22 }
 0x2ec   : > { %v3174_v58 = vmax.f32 %v3142_v60, 0.0  ;;  %v3143_v53 = vadd.f32 %v8753_v2, %v3044_v36  ;;  %v6148_v63 = vadd.f32 %v6147_v31, %v6146_v49  ;;  %v6149_v54 = vpop.f32.mrb[174].mxu1  ;;  %v9064_v38 = vpack.c.bf16 %v3234_v51, %v3268_v55  ;;  %v10134_v60 = vld [vmem:[#allocation61_spill] sm:$0xff]  ;;  %v10135_v55 = vld [vmem:[#allocation44_spill] sm:$0xff] }
 0x2ed   : > { %v6150_v37 = vpop.f32.mrb[175].mxu1  ;;  %6757 = vmatmul.mubr.bf16.gmra.mrb[108].mxu0 %v9059_v6  ;;  %6805 = vmatmul.mubr.bf16.gmra.mrb[204].mxu1 %v9059_v6 }
 0x2ee   : > { %v3175_v27 = vmax.f32 %v3143_v53, 0.0  ;;  %v2957_v56 = vadd.f32 %v8804_v16, %v6148_v63  ;;  %v6151_v9 = vadd.f32 %v6150_v37, %v6149_v54  ;;  %v3334_v4 = vrot.slane %v3174_v58, 1 }
 0x2ef   : > { %v3206_v52 = vrot.slane %v3174_v58, 7 }
 0x2f0   : > { %v3045_v15 = vadd.f32 %v2957_v56, %v10131_v21  ;;  %v2960_v30 = vadd.f32 %v10132_v47, %v6151_v9  ;;  %v3361_v8 = vsel %vm1158_vm1, %v3333_v57, %v3334_v4  ;;  %v3335_v20 = vrot.slane %v3175_v27, 1  ;;  %v10136_v9 = vld [vmem:[#allocation54_spill] sm:$0xff]  ;;  %v10137_v47 = vld [vmem:[#allocation65_spill] sm:$0xff] }
 0x2f1   : > { %v3397_v0 = vmul.f32 %v10133_v33, %v3361_v8  ;;  %v9074_v18 = vpack.c.bf16 %v3175_v27, %v3174_v58  ;;  %v3207_v45 = vrot.slane %v3175_v27, 7  ;;  %v3233_v41 = vsel %vm1029_vm3, %v3205_v22, %v3206_v52 }
 0x2f2   : > { %v3144_v16 = vadd.f32 %v8753_v2, %v3045_v15  ;;  %v3046_v36 = vadd.f32 %v2960_v30, %v10134_v60  ;;  %v6152_v49 = vpop.f32.mrb[176].mxu1  ;;  %v3360_v5 = vsel %vm1158_vm1, %v3334_v4, %v3335_v20  ;;  %v3270_v31 = vmul.f32 %v10135_v55, %v3233_v41  ;;  %v10138_v30 = vld [vmem:[#allocation55_spill] sm:$0xff]  ;;  %v10139_v41 = vld [vmem:[#allocation28_spill] sm:$0xff] }
 0x2f3   : > { %v6153_v57 = vpop.f32.mrb[177].mxu1  ;;  %v9083_v51 = vpack.c.bf16 %v3397_v0, %v3362_v43  ;;  %v3232_v58 = vsel %vm1029_vm3, %v3206_v52, %v3207_v45 }
 0x2f4   : > { %v3176_v53 = vmax.f32 %v3144_v16, 0.0  ;;  %v3145_v63 = vadd.f32 %v8753_v2, %v3046_v36  ;;  %v6154_v22 = vadd.f32 %v6153_v57, %v6152_v49  ;;  %v6155_v54 = vpop.f32.mrb[178].mxu1  ;;  %v9088_v37 = vpack.c.bf16 %v3232_v58, %v3270_v31  ;;  %v10141_v31 = vld [vmem:[#allocation48_spill] sm:$0xff] }
 0x2f5   : > { %v6156_v27 = vpop.f32.mrb[179].mxu1  ;;  %6760 = vmatprep.mubr.bf16.mxu0 %v9083_v51  ;;  %6808 = vmatprep.mubr.bf16.mxu1 %v9083_v51 }
 0x2f6   : > { %v3177_v56 = vmax.f32 %v3145_v63, 0.0  ;;  %v2965_v4 = vadd.f32 %v6154_v22, %v10136_v9  ;;  %v6157_v43 = vadd.f32 %v6156_v27, %v6155_v54  ;;  %v3336_v21 = vrot.slane %v3176_v53, 1  ;;  %v10142_v22 = vld [vmem:[#allocation45_spill] sm:$0xff] }
 0x2f7   : > { %v3208_v15 = vrot.slane %v3176_v53, 7 }
 0x2f8   : > { %v3047_v52 = vadd.f32 %v2965_v4, %v10137_v47  ;;  %v2968_v8 = vadd.f32 %v6157_v43, %v10138_v30  ;;  %v3359_v33 = vsel %vm1158_vm1, %v3335_v20, %v3336_v21  ;;  %v3337_v0 = vrot.slane %v3177_v56, 1 }
 0x2f9   : > { %v3399_v16 = vmul.f32 %v10139_v41, %v3359_v33  ;;  %v9098_v60 = vpack.c.bf16 %v3177_v56, %v3176_v53  ;;  %v3209_v36 = vrot.slane %v3177_v56, 7  ;;  %v3231_v49 = vsel %vm1029_vm3, %v3207_v45, %v3208_v15  ;;  %v10146_v41 = vld [vmem:[#allocation66_spill] sm:$0xff] }
 0x2fa   : > { %v3146_v55 = vadd.f32 %v8753_v2, %v3047_v52  ;;  %v3048_v57 = vadd.f32 %v2968_v8, %v10141_v31  ;;  %v6158_v58 = vpop.f32.mrb[180].mxu1  ;;  %v3358_v63 = vsel %vm1158_vm1, %v3336_v21, %v3337_v0  ;;  %v3272_v54 = vmul.f32 %v10142_v22, %v3231_v49  ;;  %v10145_v52 = vld [vmem:[#allocation72_spill] sm:$0xff] }
 0x2fb   : > { %10140 = vst [vmem:[#allocation71_spill] sm:$0xff] %v9098_v60  ;;  %v6159_v20 = vpop.f32.mrb[181].mxu1  ;;  %v9107_v27 = vpack.c.bf16 %v3399_v16, %v3360_v5  ;;  %v3230_v53 = vsel %vm1029_vm3, %v3208_v15, %v3209_v36  ;;  %v10147_v16 = vld [vmem:[#allocation73_spill] sm:$0xff] }
 0x2fc   : > { %v3178_v56 = vmax.f32 %v3146_v55, 0.0  ;;  %v3147_v9 = vadd.f32 %v8753_v2, %v3048_v57  ;;  %v6160_v45 = vadd.f32 %v6159_v20, %v6158_v58  ;;  %v6161_v4 = vpop.f32.mrb[182].mxu1  ;;  %v9112_v43 = vpack.c.bf16 %v3230_v53, %v3272_v54  ;;  %v10148_v57 = vld [vmem:[#allocation29_spill] sm:$0xff] }
 0x2fd   : > { %10143 = vst [vmem:[#allocation58_spill] sm:$0xff] %v9107_v27  ;;  %v6162_v47 = vpop.f32.mrb[183].mxu1  ;;  %6761 = vmatmul.mubr.bf16.gmra.mrb[112].mxu0 %v9107_v27  ;;  %6809 = vmatmul.mubr.bf16.gmra.mrb[208].mxu1 %v9107_v27 }
 0x2fe   : > { %10144 = vst [vmem:[#allocation74_spill] sm:$0xff] %v9112_v43  ;;  %v3179_v21 = vmax.f32 %v3147_v9, 0.0  ;;  %v2973_v30 = vadd.f32 %v10145_v52, %v6160_v45  ;;  %v6163_v5 = vadd.f32 %v6162_v47, %v6161_v4  ;;  %v3338_v8 = vrot.slane %v3178_v56, 1  ;;  %v10150_v9 = vld [vmem:[#allocation49_spill] sm:$0xff]  ;;  %v10151_v52 = vld [vmem:[#allocation47_spill] sm:$0xff] }
 0x2ff   : > { %v3210_v33 = vrot.slane %v3178_v56, 7 }
 0x300   : > { %v3049_v15 = vadd.f32 %v2973_v30, %v10146_v41  ;;  %v2976_v49 = vadd.f32 %v10147_v16, %v6163_v5  ;;  %v3357_v55 = vsel %vm1158_vm1, %v3337_v0, %v3338_v8  ;;  %v3339_v31 = vrot.slane %v3179_v21, 1 }
 0x301   : > { %v3401_v58 = vmul.f32 %v10148_v57, %v3357_v55  ;;  %v9122_v22 = vpack.c.bf16 %v3179_v21, %v3178_v56  ;;  %v3211_v54 = vrot.slane %v3179_v21, 7  ;;  %v3229_v20 = vsel %vm1029_vm3, %v3209_v36, %v3210_v33  ;;  %v10154_v55 = vld [vmem:[#allocation68_spill] sm:$0xff] }
 0x302   : > { %v3148_v53 = vadd.f32 %v8753_v2, %v3049_v15  ;;  %v3050_v45 = vadd.f32 %v2976_v49, %v10150_v9  ;;  %v6164_v4 = vpop.f32.mrb[184].mxu1  ;;  %v3356_v47 = vsel %vm1158_vm1, %v3338_v8, %v3339_v31  ;;  %v3274_v30 = vmul.f32 %v10151_v52, %v3229_v20  ;;  %v10155_v9 = vld [vmem:[#allocation62_spill] sm:$0xff] }
 0x303   : > { %10149 = vst [vmem:[#allocation77_spill] sm:$0xff] %v9122_v22  ;;  %v6165_v0 = vpop.f32.mrb[185].mxu1  ;;  %v9131_v5 = vpack.c.bf16 %v3401_v58, %v3358_v63  ;;  %v3228_v56 = vsel %vm1029_vm3, %v3210_v33, %v3211_v54 }
 0x304   : > { %v3180_v21 = vmax.f32 %v3148_v53, 0.0  ;;  %v3149_v41 = vadd.f32 %v8753_v2, %v3050_v45  ;;  %v6166_v36 = vadd.f32 %v6165_v0, %v6164_v4  ;;  %v6167_v16 = vpop.f32.mrb[186].mxu1  ;;  %v9136_v15 = vpack.c.bf16 %v3228_v56, %v3274_v30  ;;  %v10156_v53 = vld [vmem:[#allocation57_spill] sm:$0xff]  ;;  %v10157_v30 = vld [vmem:[#allocation30_spill] sm:$0xff] }
 0x305   : > { %10152 = vst [vmem:[#allocation80_spill] sm:$0xff] %v9131_v5  ;;  %v6168_v49 = vpop.f32.mrb[187].mxu1  ;;  %6764 = vmatprep.mubr.bf16.mxu0 %v9131_v5  ;;  %6812 = vmatprep.mubr.bf16.mxu1 %v9131_v5  ;;  %v10163_v5 = vld [vmem:[#allocation51_spill] sm:$0xff] }
 0x306   : > { %10153 = vst [vmem:[#allocation60_spill] sm:$0xff] %v9136_v15  ;;  %v3181_v8 = vmax.f32 %v3149_v41, 0.0  ;;  %v2981_v57 = vadd.f32 %v6166_v36, %v10154_v55  ;;  %v6169_v63 = vadd.f32 %v6168_v49, %v6167_v16  ;;  %v3340_v58 = vrot.slane %v3180_v21, 1  ;;  %v10159_v16 = vld [vmem:[#allocation63_spill] sm:$0xff] }
 0x307   : > { %v3212_v20 = vrot.slane %v3180_v21, 7 }
 0x308   : > { %v3051_v33 = vadd.f32 %v2981_v57, %v10155_v9  ;;  %v2984_v52 = vadd.f32 %v6169_v63, %v10156_v53  ;;  %v3355_v45 = vsel %vm1158_vm1, %v3339_v31, %v3340_v58  ;;  %v3341_v4 = vrot.slane %v3181_v8, 1  ;;  %v10160_v63 = vld [vmem:[#allocation50_spill] sm:$0xff] }
 0x309   : > { %v3403_v0 = vmul.f32 %v10157_v30, %v3355_v45  ;;  %v9146_v56 = vpack.c.bf16 %v3181_v8, %v3180_v21  ;;  %v3213_v7 = vrot.slane %v3181_v8, 7  ;;  %v3227_v41 = vsel %vm1029_vm3, %v3211_v54, %v3212_v20 }
 0x30a   : > { %v3150_v36 = vadd.f32 %v8753_v2, %v3051_v33  ;;  %v3052_v49 = vadd.f32 %v2984_v52, %v10159_v16  ;;  %v6170_v55 = vpop.f32.mrb[188].mxu1  ;;  %v3354_v57 = vsel %vm1158_vm1, %v3340_v58, %v3341_v4  ;;  %v3276_v9 = vmul.f32 %v10160_v63, %v3227_v41  ;;  %v10162_v41 = vld [vmem:[#allocation75_spill] sm:$0xff] }
 0x30b   : > { %10158 = vst [vmem:[#allocation81_spill] sm:$0xff] %v9146_v56  ;;  %v6171_v31 = vpop.f32.mrb[189].mxu1  ;;  %v9155_v53 = vpack.c.bf16 %v3403_v0, %v3356_v47  ;;  %v3226_v21 = vsel %vm1029_vm3, %v3212_v20, %v3213_v7 }
 0x30c   : > { %v3182_v8 = vmax.f32 %v3150_v36, 0.0  ;;  %v3151_v45 = vadd.f32 %v8753_v2, %v3052_v49  ;;  %v6172_v54 = vadd.f32 %v6171_v31, %v6170_v55  ;;  %v6173_v30 = vpop.f32.mrb[190].mxu1  ;;  %v9160_v33 = vpack.c.bf16 %v3226_v21, %v3276_v9  ;;  %v10164_v36 = vld [vmem:[#allocation70_spill] sm:$0xff]  ;;  %v10165_v55 = vld [vmem:[#allocation31_spill] sm:$0xff] }
 0x30d   : > { %v6174_v52 = vpop.f32.mrb[191].mxu1  ;;  %6765 = vmatmul.mubr.bf16.gmra.mrb[116].mxu0 %v9155_v53  ;;  %6813 = vmatmul.mubr.bf16.gmra.mrb[212].mxu1 %v9155_v53 }
 0x30e   : > { %10161 = vst [vmem:[#allocation83_spill] sm:$0xff] %v9160_v33  ;;  %v3183_v58 = vmax.f32 %v3151_v45, 0.0  ;;  %v2989_v16 = vadd.f32 %v10162_v41, %v6172_v54  ;;  %v6175_v47 = vadd.f32 %v6174_v52, %v6173_v30  ;;  %v3342_v0 = vrot.slane %v3182_v8, 1  ;;  %v7128_v54 = vld [vmem:[%s9854_s3] ss:$0 sm:$0xff] }
 0x30f   : > { %v3214_v63 = vrot.slane %v3182_v8, 7 }
 0x310   : > { %v3053_v20 = vadd.f32 %v2989_v16, %v10163_v5  ;;  %v2992_v27 = vadd.f32 %v10164_v36, %v6175_v47  ;;  %v3353_v2 = vsel %vm1158_vm1, %v3341_v4, %v3342_v0  ;;  %v3343_v49 = vrot.slane %v3183_v58, 1  ;;  %v10167_v5 = vld [vmem:[#allocation64_spill] sm:$0xff]  ;;  %v10168_v4 = vld [vmem:[#allocation53_spill] sm:$0xff] }
 0x311   : > { %v3405_v9 = vmul.f32 %v10165_v55, %v3353_v2  ;;  %v9170_v31 = vpack.c.bf16 %v3183_v58, %v3182_v8  ;;  %v3215_v21 = vrot.slane %v3183_v58, 7  ;;  %v3225_v45 = vsel %vm1029_vm3, %v3213_v7, %v3214_v63 }
 0x312   : > { %v3152_v30 = vadd.f32 %v7128_v54, %v3053_v20  ;;  %v3054_v52 = vadd.f32 %v2992_v27, %v10167_v5  ;;  %v3352_v41 = vsel %vm1158_vm1, %v3342_v0, %v3343_v49  ;;  %v3278_v16 = vmul.f32 %v10168_v4, %v3225_v45  ;;  %v10172_v45 = vld [vmem:[#allocation32_spill] sm:$0xff] }
 0x313   : > { %10166 = vst [vmem:[#allocation76_spill] sm:$0xff] %v9170_v31  ;;  %v9181_v47 = vpack.c.bf16 %v3405_v9, %v3354_v57  ;;  %v3224_v8 = vsel %vm1029_vm3, %v3214_v63, %v3215_v21 }
 0x314   : > { %v3184_v58 = vmax.f32 %v3152_v30, 0.0  ;;  %v3153_v36 = vadd.f32 %v7128_v54, %v3054_v52  ;;  %v9185_v7 = vpack.c.bf16 %v3224_v8, %v3278_v16  ;;  %v10173_v30 = vld [vmem:[#allocation52_spill] sm:$0xff] }
 0x315   : > { %10169 = vst [vmem:[#allocation78_spill] sm:$0xff] %v9181_v47  ;;  %6768 = vmatprep.mubr.bf16.mxu0 %v9181_v47  ;;  %6816 = vmatprep.mubr.bf16.mxu1 %v9181_v47  ;;  %v3218_v5 = vrot.slane %v10173_v30, 7  ;;  %v10174_v52 = vrot.slane %v10173_v30, 1  ;;  %v10175_v8 = vld [vmem:[#allocation56_spill] sm:$0xff]  ;;  %v10178_v30 = vld [vmem:[#allocation59_spill] sm:$0xff] }
 0x316   : > { %10170 = vst [vmem:[#allocation79_spill] sm:$0xff] %v9185_v7  ;;  %v3185_v20 = vmax.f32 %v3153_v36, 0.0  ;;  %v3344_v27 = vrot.slane %v3184_v58, 1  ;;  %v3216_v2 = vrot.slane %v3184_v58, 7 }
 0x318   : > { %v3351_v0 = vsel %vm1158_vm1, %v3343_v49, %v3344_v27  ;;  %v3345_v55 = vrot.slane %v3185_v20, 1  ;;  %v9191_v57 = vpack.c.bf16 %v3185_v20, %v3184_v58  ;;  %v3217_v9 = vrot.slane %v3185_v20, 7  ;;  %v10176_v20 = vld [vmem:[#allocation33_spill] sm:$0xff] }
 0x319   : > { %v3407_v63 = vmul.f32 %v10172_v45, %v3351_v0  ;;  %v3223_v54 = vsel %vm1029_vm3, %v3215_v21, %v3216_v2 }
 0x31a   : > { %10171 = vst [vmem:[#allocation82_spill] sm:$0xff] %v9191_v57  ;;  %v3349_v4 = vsel %vm1158_vm1, %v3345_v55, %v10174_v52  ;;  %v3350_v16 = vsel %vm1158_vm1, %v3344_v27, %v3345_v55  ;;  %v3222_v49 = vsel %vm1029_vm3, %v3216_v2, %v3217_v9  ;;  %v3280_v58 = vmul.f32 %v10175_v8, %v3223_v54  ;;  %v7093_v54 = vld [vmem:[#allocation11 + $0xb8] sm:$0xff]  }
 0x31b   : > { %v9206_v36 = vpack.c.bf16 %v3407_v63, %v3352_v41  ;;  %v3409_v0 = vmul.f32 %v10176_v20, %v3349_v4  ;;  %v3221_v21 = vsel %vm1029_vm3, %v3217_v9, %v3218_v5  ;;  %v10179_v2 = vrot.slane %v8760_v12, 7  ;;  %v7087_v9 = vld [vmem:[#allocation11 + $0x88] sm:$0xff]   ;;  %v7088_v12 = vld [vmem:[#allocation11 + $0x90] sm:$0xff]  }
 0x31c   : > { %v9211_v45 = vpack.c.bf16 %v3222_v49, %v3280_v58  ;;  %v3282_v47 = vmul.f32 %v10178_v30, %v3221_v21  ;;  %v7091_v63 = vld [vmem:[#allocation11 + $0xa8] sm:$0xff]  }
 0x31d   : > { %6769 = vmatmul.mubr.bf16.gmra.mrb[120].mxu0 %v9206_v36  ;;  %6817 = vmatmul.mubr.bf16.gmra.mrb[216].mxu1 %v9206_v36  ;;  %v9216_v27 = vpack.c.bf16 %v3409_v0, %v3350_v16  ;;  %v3220_v41 = vsel %vm1029_vm3, %v3218_v5, %v10179_v2  ;;  %v7094_v5 = vld [vmem:[#allocation9 + $0x140] sm:$0xff]   ;;  %v10181_v21 = vld [vmem:[#allocation67_spill] sm:$0xff] }
 0x31e   : > { %10177 = vst [vmem:[#allocation84_spill] sm:$0xff] %v9211_v45  ;;  %v9222_v55 = vpack.c.bf16 %v3220_v41, %v3282_v47  ;;  %v7090_v47 = vld [vmem:[#allocation11 + $0xa0] sm:$0xff]  }
 0x31f   : > { %6772 = vmatprep.mubr.bf16.mxu0 %v9216_v27  ;;  %6820 = vmatprep.mubr.bf16.mxu1 %v9216_v27 }
 0x320   : > { %10180 = vst [vmem:[#allocation86_spill] sm:$0xff] %v9222_v55 }
 0x325   : > { %6773 = vmatmul.mubr.bf16.gmra.mrb[124].mxu0 %v8854_v35  ;;  %6821 = vmatmul.mubr.bf16.gmra.mrb[220].mxu1 %v8854_v35 }
 0x326   : > { %3843 = vmatprep.mubr.bf16.mxu0 %v8838_v3  ;;  %4447 = vmatprep.mubr.bf16.mxu1 %v8838_v3 }
 0x32d   : > { %3844 = vmatmul.mubr.bf16.vlgmr.msra.gmra.mrb[128].mxu0 %v8856_v28  ;;  %4448 = vmatmul.mubr.bf16.vlgmr.msra.gmra.mrb[224].mxu1 %v8856_v28 }
 0x32e   : > { %3851 = vmatprep.mubr.bf16.mxu0 %v8864_v62  ;;  %4455 = vmatprep.mubr.bf16.mxu1 %v8864_v62 }
 0x32f   : > { %6825 = vmatpush3.bf16.msra.mxu0 %v8994_v44  ;;  %v7092_v44 = vld [vmem:[#allocation11 + $0xb0] sm:$0xff]  }
 0x330   : > { %6826 = vmatprep.subr.bf16.mxu0 %v7087_v9 }
 0x333   : > { %6827 = vmatpush3.bf16.msra.mxu0 %v7087_v9 }
 0x334   : > { %6828 = vmatprep.subr.bf16.mxu0 %v7088_v12 }
 0x335   : > { %3852 = vmatmul.mubr.bf16.gmra.mrb[132].mxu0 %v8878_v42  ;;  %4456 = vmatmul.mubr.bf16.gmra.mrb[228].mxu1 %v8878_v42 }
 0x336   : > { %3859 = vmatprep.mubr.bf16.mxu0 %v8888_v34  ;;  %4463 = vmatprep.mubr.bf16.mxu1 %v8888_v34 }
 0x337   : > { %6829 = vmatpush3.bf16.msra.mxu0 %v7088_v12 }
 0x338   : > { %6830 = vmatprep.subr.bf16.mxu0 %v7089_v17 }
 0x33b   : > { %6831 = vmatpush3.bf16.msra.mxu0 %v7089_v17 }
 0x33c   : > { %6832 = vmatprep.subr.bf16.mxu0 %v7090_v47 }
 0x33d   : > { %3860 = vmatmul.mubr.bf16.gmra.mrb[136].mxu0 %v8902_v23  ;;  %4464 = vmatmul.mubr.bf16.gmra.mrb[232].mxu1 %v8902_v23 }
 0x33e   : > { %3867 = vmatprep.mubr.bf16.mxu0 %v8916_v13  ;;  %4471 = vmatprep.mubr.bf16.mxu1 %v8916_v13 }
 0x33f   : > { %6833 = vmatpush3.bf16.msra.mxu0 %v7090_v47 }
 0x340   : > { %6834 = vmatprep.subr.bf16.mxu0 %v7091_v63 }
 0x343   : > { %6835 = vmatpush3.bf16.msra.mxu0 %v7091_v63 }
 0x344   : > { %6836 = vmatprep.subr.bf16.mxu0 %v7092_v44 }
 0x345   : > { %3868 = vmatmul.mubr.bf16.gmra.mrb[140].mxu0 %v8933_v29  ;;  %4472 = vmatmul.mubr.bf16.gmra.mrb[236].mxu1 %v8933_v29 }
 0x346   : > { %3875 = vmatprep.mubr.bf16.mxu0 %v8945_v39  ;;  %4479 = vmatprep.mubr.bf16.mxu1 %v8945_v39 }
 0x347   : > { %6837 = vmatpush3.bf16.msra.mxu0 %v7092_v44  ;;  %v7095_v44 = vld [vmem:[#allocation9 + $0x100] sm:$0xff]  }
 0x348   : > { %6838 = vmatprep.subr.bf16.mxu0 %v7093_v54 }
 0x34b   : > { %6839 = vmatpush3.bf16.msra.mxu0 %v7093_v54  ;;  %v7096_v54 = vld [vmem:[#allocation9 + $0x148] sm:$0xff]  }
 0x34c   : > { %6472 = vmatprep.subr.bf16.mxu0 %v7094_v5  ;;  %v7097_v5 = vld [vmem:[#allocation9 + $0x108] sm:$0xff]  }
 0x34d   : > { %3876 = vmatmul.mubr.bf16.gmra.mrb[144].mxu0 %v8962_v24  ;;  %4480 = vmatmul.mubr.bf16.gmra.mrb[240].mxu1 %v8962_v24 }
 0x34e   : > { %3883 = vmatprep.mubr.bf16.mxu0 %v8974_v50  ;;  %4487 = vmatprep.mubr.bf16.mxu1 %v8974_v50 }
 0x355   : > { %3884 = vmatmul.mubr.bf16.gmra.mrb[148].mxu0 %v8991_v32  ;;  %4488 = vmatmul.mubr.bf16.gmra.mrb[244].mxu1 %v8991_v32 }
 0x356   : > { %3891 = vmatprep.mubr.bf16.mxu0 %v9001_v59  ;;  %4495 = vmatprep.mubr.bf16.mxu1 %v9001_v59 }
 0x35d   : > { %3892 = vmatmul.mubr.bf16.gmra.mrb[152].mxu0 %v9018_v26  ;;  %4496 = vmatmul.mubr.bf16.gmra.mrb[248].mxu1 %v9018_v26 }
 0x35e   : > { %3899 = vmatprep.mubr.bf16.mxu0 %v9026_v48  ;;  %4503 = vmatprep.mubr.bf16.mxu1 %v9026_v48 }
 0x365   : > { %3900 = vmatmul.mubr.bf16.gmra.mrb[156].mxu0 %v9040_v11  ;;  %4504 = vmatmul.mubr.bf16.gmra.mrb[252].mxu1 %v9040_v11 }
 0x366   : > { %3907 = vmatprep.mubr.bf16.mxu0 %v9050_v14  ;;  %4511 = vmatprep.mubr.bf16.mxu1 %v9050_v14 }
 0x36d   : > { %3908 = vmatmul.mubr.bf16.gmra.mrb[160].mxu0 %v9064_v38  ;;  %4512 = vmatmul.mubr.bf16.gmra.mrb[0].mxu1 %v9064_v38 }
 0x36e   : > { %3915 = vmatprep.mubr.bf16.mxu0 %v9074_v18  ;;  %4519 = vmatprep.mubr.bf16.mxu1 %v9074_v18 }
 0x375   : > { %3916 = vmatmul.mubr.bf16.gmra.mrb[164].mxu0 %v9088_v37  ;;  %4520 = vmatmul.mubr.bf16.gmra.mrb[4].mxu1 %v9088_v37 }
 0x376   : > { %3923 = vmatprep.mubr.bf16.mxu0 %v9098_v60  ;;  %4527 = vmatprep.mubr.bf16.mxu1 %v9098_v60 }
 0x37d   : > { %3924 = vmatmul.mubr.bf16.gmra.mrb[168].mxu0 %v9112_v43  ;;  %4528 = vmatmul.mubr.bf16.gmra.mrb[8].mxu1 %v9112_v43 }
 0x37e   : > { %3931 = vmatprep.mubr.bf16.mxu0 %v9122_v22  ;;  %4535 = vmatprep.mubr.bf16.mxu1 %v9122_v22  ;;  %v7104_v22 = vld [vmem:[#allocation9 + $0x168] sm:$0xff]  }
 0x385   : > { %3932 = vmatmul.mubr.bf16.gmra.mrb[172].mxu0 %v9136_v15  ;;  %4536 = vmatmul.mubr.bf16.gmra.mrb[12].mxu1 %v9136_v15  ;;  %v7103_v15 = vld [vmem:[#allocation9 + $0x120] sm:$0xff]  }
 0x386   : > { %3939 = vmatprep.mubr.bf16.mxu0 %v9146_v56  ;;  %4543 = vmatprep.mubr.bf16.mxu1 %v9146_v56  ;;  %v7102_v56 = vld [vmem:[#allocation9 + $0x160] sm:$0xff]  }
 0x38d   : > { %3940 = vmatmul.mubr.bf16.gmra.mrb[176].mxu0 %v9160_v33  ;;  %4544 = vmatmul.mubr.bf16.gmra.mrb[16].mxu1 %v9160_v33 }
 0x38e   : > { %3947 = vmatprep.mubr.bf16.mxu0 %v9170_v31  ;;  %4551 = vmatprep.mubr.bf16.mxu1 %v9170_v31 }
 0x390   : > { %v9283_v52 = vpop.f32.mrb[96].mxu0  ;;  %v9285_v4 = vpop.f32.mrb[192].mxu1 }
 0x391   : > { %v9287_v16 = vpop.f32.mrb[97].mxu0  ;;  %v9289_v49 = vpop.f32.mrb[193].mxu1 }
 0x392   : > { %v9291_v8 = vpop.f32.mrb[98].mxu0  ;;  %v9293_v58 = vpop.f32.mrb[194].mxu1 }
 0x393   : > { %v9295_v20 = vpop.f32.mrb[99].mxu0  ;;  %v9297_v0 = vpop.f32.mrb[195].mxu1 }
 0x395   : > { %3948 = vmatmul.mubr.bf16.gmra.mrb[180].mxu0 %v9185_v7  ;;  %4552 = vmatmul.mubr.bf16.gmra.mrb[20].mxu1 %v9185_v7 }
 0x396   : > { %3955 = vmatprep.mubr.bf16.mxu0 %v9191_v57  ;;  %4559 = vmatprep.mubr.bf16.mxu1 %v9191_v57 }
 0x39d   : > { %3956 = vmatmul.mubr.bf16.gmra.mrb[184].mxu0 %v9211_v45  ;;  %4560 = vmatmul.mubr.bf16.gmra.mrb[24].mxu1 %v9211_v45 }
 0x39e   : > { %3963 = vmatprep.mubr.bf16.mxu0 %v10181_v21  ;;  %4567 = vmatprep.mubr.bf16.mxu1 %v10181_v21  ;;  %v7098_v21 = vld [vmem:[#allocation9 + $0x150] sm:$0xff]  }
 0x3a0   : > { %v9307_v30 = vpop.f32.mrb[100].mxu0  ;;  %v9309_v2 = vpop.f32.mrb[196].mxu1 }
 0x3a1   : > { %v9311_v41 = vpop.f32.mrb[101].mxu0  ;;  %v9313_v9 = vpop.f32.mrb[197].mxu1 }
 0x3a2   : > { %v9315_v12 = vpop.f32.mrb[102].mxu0  ;;  %v9317_v17 = vpop.f32.mrb[198].mxu1 }
 0x3a3   : > { %v9319_v47 = vpop.f32.mrb[103].mxu0  ;;  %v9321_v63 = vpop.f32.mrb[199].mxu1 }
 0x3a5   : > { %3964 = vmatmul.mubr.bf16.gmra.mrb[188].mxu0 %v9222_v55  ;;  %4568 = vmatmul.mubr.bf16.gmra.mrb[28].mxu1 %v9222_v55 }
 0x3a6   : > { %6840 = vmatprep.mubr.bf16.mxu0 %v8873_v46 }
 0x3ad   : > { %6841 = vmatmul.mubr.bf16.vlgmr.msra.gmra.mrb[192].mxu0 %v8897_v10  ;;  %v7099_v10 = vld [vmem:[#allocation9 + $0x110] sm:$0xff]  }
 0x3ae   : > { %6844 = vmatprep.mubr.bf16.mxu0 %v8925_v1  ;;  %6473 = vmatpush3.bf16.msra.mxu0 %v7095_v44  ;;  %v7100_v44 = vld [vmem:[#allocation9 + $0x158] sm:$0xff]  }
 0x3af   : > { %6474 = vmatprep.subr.bf16.mxu0 %v7096_v54  ;;  %v7101_v54 = vld [vmem:[#allocation9 + $0x118] sm:$0xff]  }
 0x3b0   : > { %v9328_v45 = vpop.f32.mrb[104].mxu0  ;;  %v9330_v57 = vpop.f32.mrb[200].mxu1 }
 0x3b1   : > { %v9332_v7 = vpop.f32.mrb[105].mxu0  ;;  %v9334_v31 = vpop.f32.mrb[201].mxu1 }
 0x3b2   : > { %v9336_v55 = vpop.f32.mrb[106].mxu0  ;;  %v9338_v46 = vpop.f32.mrb[202].mxu1  ;;  %6475 = vmatpush3.bf16.msra.mxu0 %v7097_v5  ;;  %v7105_v5 = vld [vmem:[#allocation9 + $0x128] sm:$0xff]  }
 0x3b3   : > { %v9340_v33 = vpop.f32.mrb[107].mxu0  ;;  %v9342_v1 = vpop.f32.mrb[203].mxu1  ;;  %6476 = vmatprep.subr.bf16.mxu0 %v7098_v21  ;;  %v7106_v21 = vld [vmem:[#allocation9 + $0x170] sm:$0xff]  }
 0x3b5   : > { %6845 = vmatmul.mubr.bf16.gmra.mrb[196].mxu0 %v8954_v19 }
 0x3b6   : > { %6848 = vmatprep.mubr.bf16.mxu0 %v8983_v25  ;;  %6477 = vmatpush3.bf16.msra.mxu0 %v7099_v10 }
 0x3b7   : > { %6478 = vmatprep.subr.bf16.mxu0 %v7100_v44 }
 0x3ba   : > { %6479 = vmatpush3.bf16.msra.mxu0 %v7101_v54 }
 0x3bb   : > { %6480 = vmatprep.subr.bf16.mxu0 %v7102_v56 }
 0x3bd   : > { %6849 = vmatmul.mubr.bf16.gmra.mrb[200].mxu0 %v9009_v40  ;;  %v7107_v40 = vld [vmem:[#allocation9 + $0x130] sm:$0xff]  }
 0x3be   : > { %6852 = vmatprep.mubr.bf16.mxu0 %v9035_v61  ;;  %6481 = vmatpush3.bf16.msra.mxu0 %v7103_v15  ;;  %v7109_v15 = vld [vmem:[#allocation9 + $0x138] sm:$0xff]  }
 0x3bf   : > { %6482 = vmatprep.subr.bf16.mxu0 %v7104_v22  ;;  %v7108_v22 = vld [vmem:[#allocation9 + $0x178] sm:$0xff]  }
 0x3c0   : > { %v9348_v43 = vpop.f32.mrb[108].mxu0  ;;  %v9350_v19 = vpop.f32.mrb[204].mxu1 }
 0x3c1   : > { %10182 = vst [vmem:[#allocation87_spill] sm:$0xff] %v9348_v43  ;;  %10183 = vst [vmem:[#allocation89_spill] sm:$0xff] %v9350_v19  ;;  %v9352_v25 = vpop.f32.mrb[109].mxu0  ;;  %v9354_v10 = vpop.f32.mrb[205].mxu1  ;;  %v10186_v19 = vld [vmem:[#allocation58_spill] sm:$0xff] }
 0x3c2   : > { %v9356_v44 = vpop.f32.mrb[110].mxu0  ;;  %v9358_v56 = vpop.f32.mrb[206].mxu1  ;;  %6483 = vmatpush3.bf16.msra.mxu0 %v7105_v5 }
 0x3c3   : > { %10184 = vst [vmem:[#allocation85_spill] sm:$0xff] %v9356_v44  ;;  %10185 = vst [vmem:[#allocation88_spill] sm:$0xff] %v9358_v56  ;;  %v9360_v54 = vpop.f32.mrb[111].mxu0  ;;  %v9362_v61 = vpop.f32.mrb[207].mxu1  ;;  %6484 = vmatprep.subr.bf16.mxu0 %v7106_v21  ;;  %v10187_v44 = vld [vmem:[#allocation80_spill] sm:$0xff] }
 0x3c5   : > { %6853 = vmatmul.mubr.bf16.gmra.mrb[204].mxu0 %v9059_v6 }
 0x3c6   : > { %6856 = vmatprep.mubr.bf16.mxu0 %v9083_v51  ;;  %6485 = vmatpush3.bf16.msra.mxu0 %v7107_v40 }
 0x3c7   : > { %6486 = vmatprep.subr.bf16.mxu0 %v7108_v22 }
 0x3ca   : > { %6487 = vmatpush3.bf16.msra.mxu0 %v7109_v15 }
 0x3cd   : > { %6857 = vmatmul.mubr.bf16.gmra.mrb[208].mxu0 %v10186_v19  ;;  %v10192_v19 = vld [vmem:[#allocation78_spill] sm:$0xff] }
 0x3ce   : > { %6860 = vmatprep.mubr.bf16.mxu0 %v10187_v44 }
 0x3d0   : > { %v9368_v5 = vpop.f32.mrb[112].mxu0  ;;  %v9370_v56 = vpop.f32.mrb[208].mxu1 }
 0x3d1   : > { %10188 = vst [vmem:[#allocation18_spill] sm:$0xff] %v9368_v5  ;;  %10189 = vst [vmem:[#allocation34_spill] sm:$0xff] %v9370_v56  ;;  %v9372_v43 = vpop.f32.mrb[113].mxu0  ;;  %v9374_v21 = vpop.f32.mrb[209].mxu1 }
 0x3d2   : > { %v9376_v60 = vpop.f32.mrb[114].mxu0  ;;  %v9378_v6 = vpop.f32.mrb[210].mxu1 }
 0x3d3   : > { %10190 = vst [vmem:[#allocation35_spill] sm:$0xff] %v9376_v60  ;;  %10191 = vst [vmem:[#allocation19_spill] sm:$0xff] %v9378_v6  ;;  %v9380_v51 = vpop.f32.mrb[115].mxu0  ;;  %v9382_v40 = vpop.f32.mrb[211].mxu1 }
 0x3d5   : > { %6861 = vmatmul.mubr.bf16.gmra.mrb[212].mxu0 %v9155_v53 }
 0x3d6   : > { %6864 = vmatprep.mubr.bf16.mxu0 %v10192_v19 }
 0x3dd   : > { %6865 = vmatmul.mubr.bf16.gmra.mrb[216].mxu0 %v9206_v36 }
 0x3de   : > { %6868 = vmatprep.mubr.bf16.mxu0 %v9216_v27 }
 0x3e0   : > { %v9388_v44 = vpop.f32.mrb[116].mxu0  ;;  %v9390_v22 = vpop.f32.mrb[212].mxu1 }
 0x3e1   : > { %10193 = vst [vmem:[#allocation36_spill] sm:$0xff] %v9388_v44  ;;  %10194 = vst [vmem:[#allocation20_spill] sm:$0xff] %v9390_v22  ;;  %v9392_v15 = vpop.f32.mrb[117].mxu0  ;;  %v9394_v60 = vpop.f32.mrb[213].mxu1 }
 0x3e2   : > { %v9396_v6 = vpop.f32.mrb[118].mxu0  ;;  %v9398_v56 = vpop.f32.mrb[214].mxu1 }
 0x3e3   : > { %10195 = vst [vmem:[#allocation37_spill] sm:$0xff] %v9396_v6  ;;  %10196 = vst [vmem:[#allocation21_spill] sm:$0xff] %v9398_v56  ;;  %v9400_v5 = vpop.f32.mrb[119].mxu0  ;;  %v9402_v53 = vpop.f32.mrb[215].mxu1 }
 0x3e4   : > { %10197 = vst [vmem:[#allocation38_spill] sm:$0xff] %v9400_v5  ;;  %10198 = vst [vmem:[#allocation22_spill] sm:$0xff] %v9402_v53 }
 0x3e5   : > { %6869 = vmatmul.mubr.bf16.gmra.mrb[220].mxu0 %v8854_v35 }
 0x3e6   : > { %5057 = vmatprep.mubr.bf16.mxu0 %v8838_v3 }
 0x3ed   : > { %5058 = vmatmul.mubr.bf16.vlgmr.msra.gmra.mrb[224].mxu0 %v8856_v28 }
 0x3ee   : > { %5063 = vmatprep.mubr.bf16.mxu0 %v8864_v62 }
 0x3f0   : > { %v9408_v36 = vpop.f32.mrb[120].mxu0  ;;  %v9410_v27 = vpop.f32.mrb[216].mxu1 }
 0x3f1   : > { %10199 = vst [vmem:[#allocation39_spill] sm:$0xff] %v9408_v36  ;;  %10200 = vst [vmem:[#allocation23_spill] sm:$0xff] %v9410_v27  ;;  %v9412_v19 = vpop.f32.mrb[121].mxu0  ;;  %v9414_v6 = vpop.f32.mrb[217].mxu1 }
 0x3f2   : > { %10201 = vst [vmem:[#allocation40_spill] sm:$0xff] %v9412_v19  ;;  %10202 = vst [vmem:[#allocation24_spill] sm:$0xff] %v9414_v6  ;;  %v9416_v56 = vpop.f32.mrb[122].mxu0  ;;  %v9418_v22 = vpop.f32.mrb[218].mxu1 }
 0x3f3   : > { %10203 = vst [vmem:[#allocation41_spill] sm:$0xff] %v9416_v56  ;;  %10204 = vst [vmem:[#allocation25_spill] sm:$0xff] %v9418_v22  ;;  %v9420_v44 = vpop.f32.mrb[123].mxu0  ;;  %v9422_v35 = vpop.f32.mrb[219].mxu1 }
 0x3f4   : > { %10205 = vst [vmem:[#allocation42_spill] sm:$0xff] %v9420_v44  ;;  %10206 = vst [vmem:[#allocation26_spill] sm:$0xff] %v9422_v35 }
 0x3f5   : > { %5064 = vmatmul.mubr.bf16.gmra.mrb[228].mxu0 %v8878_v42 }
 0x3f6   : > { %5071 = vmatprep.mubr.bf16.mxu0 %v8888_v34 }
 0x3f8   : > { %v6774_v3 = vpop.f32.mrb[124].mxu0  ;;  %v9426_v28 = vpop.f32.mrb[220].mxu1 }
 0x3f9   : > { %10207 = vst [vmem:[#allocation43_spill] sm:$0xff] %v9426_v28  ;;  %v9428_v62 = vpop.f32.mrb[125].mxu0  ;;  %v9430_v27 = vpop.f32.mrb[221].mxu1 }
 0x3fa   : > { %10208 = vst [vmem:[#allocation46_spill] sm:$0xff] %v9428_v62  ;;  %10209 = vst [vmem:[#allocation69_spill] sm:$0xff] %v9430_v27  ;;  %v6775_v36 = vpop.f32.mrb[126].mxu0  ;;  %v9432_v6 = vpop.f32.mrb[222].mxu1 }
 0x3fb   : > { %10210 = vst [vmem:[#allocation27_spill] sm:$0xff] %v9432_v6  ;;  %v9434_v56 = vpop.f32.mrb[127].mxu0  ;;  %v9436_v22 = vpop.f32.mrb[223].mxu1 }
 0x3fc   : > { %10211 = vst [vmem:[#allocation61_spill] sm:$0xff] %v9434_v56  ;;  %10212 = vst [vmem:[#allocation44_spill] sm:$0xff] %v9436_v22 }
 0x3fd   : > { %5072 = vmatmul.mubr.bf16.gmra.mrb[232].mxu0 %v8902_v23 }
 0x3fe   : > { %5079 = vmatprep.mubr.bf16.mxu0 %v8916_v13 }
 0x400   : > { %v6216_v42 = vpop.f32.mrb[128].mxu0  ;;  %v6352_v34 = vpop.f32.mrb[224].mxu1 }
 0x401   : > { %v6217_v3 = vpop.f32.mrb[129].mxu0  ;;  %v6353_v35 = vpop.f32.mrb[225].mxu1 }
 0x402   : > { %v6218_v28 = vadd.f32 %v6217_v3, %v6216_v42  ;;  %v6354_v44 = vadd.f32 %v6353_v35, %v6352_v34  ;;  %v6219_v62 = vpop.f32.mrb[130].mxu0  ;;  %v6355_v19 = vpop.f32.mrb[226].mxu1 }
 0x403   : > { %v6220_v27 = vpop.f32.mrb[131].mxu0  ;;  %v6356_v36 = vpop.f32.mrb[227].mxu1 }
 0x404   : > { %v3846_v6 = vadd.f32 %v6218_v28, %v9287_v16  ;;  %v9442_v56 = vadd.f32 %v6354_v44, %v9289_v49  ;;  %v6221_v22 = vadd.f32 %v6220_v27, %v6219_v62  ;;  %v6357_v53 = vadd.f32 %v6356_v36, %v6355_v19 }
 0x405   : > { %5080 = vmatmul.mubr.bf16.gmra.mrb[236].mxu0 %v8933_v29 }
 0x406   : > { %v3849_v23 = vadd.f32 %v6221_v22, %v9295_v20  ;;  %v9447_v13 = vadd.f32 %v6357_v53, %v9297_v0  ;;  %5087 = vmatprep.mubr.bf16.mxu0 %v8945_v39 }
 0x408   : > { %v6222_v35 = vpop.f32.mrb[132].mxu0  ;;  %v6358_v42 = vpop.f32.mrb[228].mxu1 }
 0x409   : > { %v6223_v34 = vpop.f32.mrb[133].mxu0  ;;  %v6359_v3 = vpop.f32.mrb[229].mxu1 }
 0x40a   : > { %v6224_v5 = vadd.f32 %v6223_v34, %v6222_v35  ;;  %v6360_v16 = vadd.f32 %v6359_v3, %v6358_v42  ;;  %v6225_v28 = vpop.f32.mrb[134].mxu0  ;;  %v6361_v49 = vpop.f32.mrb[230].mxu1 }
 0x40b   : > { %v6226_v44 = vpop.f32.mrb[135].mxu0  ;;  %v6362_v27 = vpop.f32.mrb[231].mxu1 }
 0x40c   : > { %v3854_v19 = vadd.f32 %v9283_v52, %v6224_v5  ;;  %v4458_v29 = vadd.f32 %v9285_v4, %v6360_v16  ;;  %v6227_v20 = vadd.f32 %v6226_v44, %v6225_v28  ;;  %v6363_v22 = vadd.f32 %v6362_v27, %v6361_v49 }
 0x40d   : > { %5088 = vmatmul.mubr.bf16.gmra.mrb[240].mxu0 %v8962_v24 }
 0x40e   : > { %v9453_v0 = vadd.f32 %v4458_v29, %v3846_v6  ;;  %v3857_v39 = vadd.f32 %v9291_v8, %v6227_v20  ;;  %v4461_v53 = vadd.f32 %v9293_v58, %v6363_v22  ;;  %5095 = vmatprep.mubr.bf16.mxu0 %v8974_v50 }
 0x410   : > { %v9458_v62 = vadd.f32 %v4461_v53, %v3849_v23  ;;  %v6228_v36 = vpop.f32.mrb[136].mxu0  ;;  %v6364_v35 = vpop.f32.mrb[232].mxu1 }
 0x411   : > { %v6229_v42 = vpop.f32.mrb[137].mxu0  ;;  %v6365_v52 = vpop.f32.mrb[233].mxu1 }
 0x412   : > { %v6230_v5 = vadd.f32 %v6229_v42, %v6228_v36  ;;  %v6366_v4 = vadd.f32 %v6365_v52, %v6364_v35  ;;  %v6231_v34 = vpop.f32.mrb[138].mxu0  ;;  %v6367_v3 = vpop.f32.mrb[234].mxu1 }
 0x413   : > { %v6232_v16 = vpop.f32.mrb[139].mxu0  ;;  %v6368_v24 = vpop.f32.mrb[235].mxu1 }
 0x414   : > { %v3862_v6 = vadd.f32 %v6230_v5, %v9311_v41  ;;  %v4466_v8 = vadd.f32 %v6366_v4, %v9313_v9  ;;  %v6233_v28 = vadd.f32 %v6232_v16, %v6231_v34  ;;  %v6369_v58 = vadd.f32 %v6368_v24, %v6367_v3 }
 0x415   : > { %5096 = vmatmul.mubr.bf16.gmra.mrb[244].mxu0 %v8991_v32 }
 0x416   : > { %v9463_v50 = vadd.f32 %v4466_v8, %v3854_v19  ;;  %v3865_v23 = vadd.f32 %v6233_v28, %v9319_v47  ;;  %v4469_v49 = vadd.f32 %v6369_v58, %v9321_v63  ;;  %5103 = vmatprep.mubr.bf16.mxu0 %v9001_v59 }
 0x418   : > { %v9468_v44 = vadd.f32 %v4469_v49, %v3857_v39  ;;  %v6234_v27 = vpop.f32.mrb[140].mxu0  ;;  %v6370_v29 = vpop.f32.mrb[236].mxu1 }
 0x419   : > { %v6235_v20 = vpop.f32.mrb[141].mxu0  ;;  %v6371_v41 = vpop.f32.mrb[237].mxu1 }
 0x41a   : > { %v6236_v22 = vadd.f32 %v6235_v20, %v6234_v27  ;;  %v6372_v9 = vadd.f32 %v6371_v41, %v6370_v29  ;;  %v6237_v53 = vpop.f32.mrb[142].mxu0  ;;  %v6373_v36 = vpop.f32.mrb[238].mxu1 }
 0x41b   : > { %v6238_v35 = vpop.f32.mrb[143].mxu0  ;;  %v6374_v32 = vpop.f32.mrb[239].mxu1 }
 0x41c   : > { %v3870_v19 = vadd.f32 %v9307_v30, %v6236_v22  ;;  %v4474_v47 = vadd.f32 %v9309_v2, %v6372_v9  ;;  %v6239_v42 = vadd.f32 %v6238_v35, %v6237_v53  ;;  %v6375_v63 = vadd.f32 %v6374_v32, %v6373_v36 }
 0x41d   : > { %5104 = vmatmul.mubr.bf16.gmra.mrb[248].mxu0 %v9018_v26 }
 0x41e   : > { %v9473_v59 = vadd.f32 %v4474_v47, %v3862_v6  ;;  %v3873_v39 = vadd.f32 %v9315_v12, %v6239_v42  ;;  %v4477_v52 = vadd.f32 %v9317_v17, %v6375_v63  ;;  %5111 = vmatprep.mubr.bf16.mxu0 %v9026_v48 }
 0x420   : > { %v9478_v5 = vadd.f32 %v4477_v52, %v3865_v23  ;;  %v6240_v4 = vpop.f32.mrb[144].mxu0  ;;  %v6376_v34 = vpop.f32.mrb[240].mxu1 }
 0x421   : > { %v6241_v3 = vpop.f32.mrb[145].mxu0  ;;  %v6377_v30 = vpop.f32.mrb[241].mxu1 }
 0x422   : > { %v6242_v16 = vadd.f32 %v6241_v3, %v6240_v4  ;;  %v6378_v2 = vadd.f32 %v6377_v30, %v6376_v34  ;;  %v6243_v24 = vpop.f32.mrb[146].mxu0  ;;  %v6379_v8 = vpop.f32.mrb[242].mxu1 }
 0x423   : > { %v6244_v28 = vpop.f32.mrb[147].mxu0  ;;  %v6380_v26 = vpop.f32.mrb[243].mxu1 }
 0x424   : > { %v3878_v6 = vadd.f32 %v6242_v16, %v9332_v7  ;;  %v4482_v12 = vadd.f32 %v6378_v2, %v9334_v31  ;;  %v6245_v58 = vadd.f32 %v6244_v28, %v6243_v24  ;;  %v6381_v17 = vadd.f32 %v6380_v26, %v6379_v8  ;;  %v10213_v28 = vld [vmem:[#allocation71_spill] sm:$0xff] }
 0x425   : > { %5112 = vmatmul.mubr.bf16.gmra.mrb[252].mxu0 %v9040_v11 }
 0x426   : > { %v9483_v48 = vadd.f32 %v4482_v12, %v3870_v19  ;;  %v3881_v23 = vadd.f32 %v6245_v58, %v9340_v33  ;;  %v4485_v49 = vadd.f32 %v6381_v17, %v9342_v1  ;;  %5119 = vmatprep.mubr.bf16.mxu0 %v9050_v14 }
 0x428   : > { %v9488_v27 = vadd.f32 %v4485_v49, %v3873_v39  ;;  %v6246_v29 = vpop.f32.mrb[148].mxu0  ;;  %v6382_v20 = vpop.f32.mrb[244].mxu1 }
 0x429   : > { %v6247_v41 = vpop.f32.mrb[149].mxu0  ;;  %v6383_v7 = vpop.f32.mrb[245].mxu1 }
 0x42a   : > { %v6248_v22 = vadd.f32 %v6247_v41, %v6246_v29  ;;  %v6384_v31 = vadd.f32 %v6383_v7, %v6382_v20  ;;  %v6249_v9 = vpop.f32.mrb[150].mxu0  ;;  %v6385_v53 = vpop.f32.mrb[246].mxu1  ;;  %v10214_v20 = vld [vmem:[#allocation87_spill] sm:$0xff]  ;;  %v10215_v7 = vld [vmem:[#allocation89_spill] sm:$0xff] }
 0x42b   : > { %v6250_v36 = vpop.f32.mrb[151].mxu0  ;;  %v6386_v11 = vpop.f32.mrb[247].mxu1 }
 0x42c   : > { %v3886_v35 = vadd.f32 %v9328_v45, %v6248_v22  ;;  %v4490_v33 = vadd.f32 %v9330_v57, %v6384_v31  ;;  %v6251_v32 = vadd.f32 %v6250_v36, %v6249_v9  ;;  %v6387_v1 = vadd.f32 %v6386_v11, %v6385_v53  ;;  %v10216_v31 = vld [vmem:[#allocation74_spill] sm:$0xff]  ;;  %v10217_v53 = vld [vmem:[#allocation85_spill] sm:$0xff]  ;;  %v10218_v11 = vld [vmem:[#allocation88_spill] sm:$0xff] }
 0x42d   : > { %5120 = vmatmul.mubr.bf16.gmra.mrb[0].mxu0 %v9064_v38 }
 0x42e   : > { %v9493_v14 = vadd.f32 %v4490_v33, %v3878_v6  ;;  %v3889_v19 = vadd.f32 %v9336_v55, %v6251_v32  ;;  %v4493_v47 = vadd.f32 %v9338_v46, %v6387_v1  ;;  %5127 = vmatprep.mubr.bf16.mxu0 %v9074_v18  ;;  %v10219_v33 = vld [vmem:[#allocation77_spill] sm:$0xff] }
 0x430   : > { %v9498_v42 = vadd.f32 %v4493_v47, %v3881_v23  ;;  %v6252_v63 = vpop.f32.mrb[152].mxu0  ;;  %v6388_v39 = vpop.f32.mrb[248].mxu1 }
 0x431   : > { %v6253_v52 = vpop.f32.mrb[153].mxu0  ;;  %v6389_v45 = vpop.f32.mrb[249].mxu1 }
 0x432   : > { %v6254_v4 = vadd.f32 %v6253_v52, %v6252_v63  ;;  %v6390_v57 = vadd.f32 %v6389_v45, %v6388_v39  ;;  %v6255_v34 = vpop.f32.mrb[154].mxu0  ;;  %v6391_v3 = vpop.f32.mrb[250].mxu1 }
 0x433   : > { %v6256_v30 = vpop.f32.mrb[155].mxu0  ;;  %v6392_v38 = vpop.f32.mrb[251].mxu1 }
 0x434   : > { %v3894_v16 = vadd.f32 %v6254_v4, %v9352_v25  ;;  %v4498_v55 = vadd.f32 %v6390_v57, %v9354_v10  ;;  %v6257_v2 = vadd.f32 %v6256_v30, %v6255_v34  ;;  %v6393_v46 = vadd.f32 %v6392_v38, %v6391_v3 }
 0x435   : > { %5128 = vmatmul.mubr.bf16.gmra.mrb[4].mxu0 %v9088_v37 }
 0x436   : > { %v9503_v18 = vadd.f32 %v4498_v55, %v3886_v35  ;;  %v3897_v24 = vadd.f32 %v6257_v2, %v9360_v54  ;;  %v4501_v8 = vadd.f32 %v6393_v46, %v9362_v61  ;;  %5135 = vmatprep.mubr.bf16.mxu0 %v10213_v28  ;;  %v10220_v55 = vld [vmem:[#allocation60_spill] sm:$0xff] }
 0x438   : > { %v9508_v26 = vadd.f32 %v4501_v8, %v3889_v19  ;;  %v6258_v6 = vpop.f32.mrb[156].mxu0  ;;  %v6394_v12 = vpop.f32.mrb[252].mxu1  ;;  %v10221_v8 = vld [vmem:[#allocation81_spill] sm:$0xff] }
 0x439   : > { %v6259_v58 = vpop.f32.mrb[157].mxu0  ;;  %v6395_v25 = vpop.f32.mrb[253].mxu1 }
 0x43a   : > { %v6260_v17 = vadd.f32 %v6259_v58, %v6258_v6  ;;  %v6396_v10 = vadd.f32 %v6395_v25, %v6394_v12  ;;  %v6261_v23 = vpop.f32.mrb[158].mxu0  ;;  %v6397_v49 = vpop.f32.mrb[254].mxu1 }
 0x43b   : > { %v6262_v29 = vpop.f32.mrb[159].mxu0  ;;  %v6398_v37 = vpop.f32.mrb[255].mxu1 }
 0x43c   : > { %v3902_v41 = vadd.f32 %v10214_v20, %v6260_v17  ;;  %v4506_v54 = vadd.f32 %v10215_v7, %v6396_v10  ;;  %v6263_v22 = vadd.f32 %v6262_v29, %v6261_v23  ;;  %v6399_v61 = vadd.f32 %v6398_v37, %v6397_v49  ;;  %v10222_v29 = vld [vmem:[#allocation18_spill] sm:$0xff]  ;;  %v10224_v7 = vld [vmem:[#allocation83_spill] sm:$0xff] }
 0x43d   : > { %5136 = vmatmul.mubr.bf16.gmra.mrb[8].mxu0 %v10216_v31  ;;  %v10223_v20 = vld [vmem:[#allocation34_spill] sm:$0xff]  ;;  %v10226_v31 = vld [vmem:[#allocation19_spill] sm:$0xff] }
 0x43e   : > { %v9513_v9 = vadd.f32 %v4506_v54, %v3894_v16  ;;  %v3905_v36 = vadd.f32 %v10217_v53, %v6263_v22  ;;  %v4509_v35 = vadd.f32 %v10218_v11, %v6399_v61  ;;  %5143 = vmatprep.mubr.bf16.mxu0 %v10219_v33  ;;  %v10225_v22 = vld [vmem:[#allocation35_spill] sm:$0xff] }
 0x440   : > { %v9518_v32 = vadd.f32 %v4509_v35, %v3897_v24  ;;  %v6264_v1 = vpop.f32.mrb[160].mxu0  ;;  %v6400_v19 = vpop.f32.mrb[0].mxu1 }
 0x441   : > { %v6265_v47 = vpop.f32.mrb[161].mxu0  ;;  %v6401_v63 = vpop.f32.mrb[1].mxu1 }
 0x442   : > { %v6266_v39 = vadd.f32 %v6265_v47, %v6264_v1  ;;  %v6402_v52 = vadd.f32 %v6401_v63, %v6400_v19  ;;  %v6267_v45 = vpop.f32.mrb[162].mxu0  ;;  %v6403_v4 = vpop.f32.mrb[2].mxu1 }
 0x443   : > { %v6268_v57 = vpop.f32.mrb[163].mxu0  ;;  %v6404_v34 = vpop.f32.mrb[3].mxu1 }
 0x444   : > { %v3910_v3 = vadd.f32 %v6266_v39, %v9372_v43  ;;  %v4514_v30 = vadd.f32 %v6402_v52, %v9374_v21  ;;  %v6269_v38 = vadd.f32 %v6268_v57, %v6267_v45  ;;  %v6405_v16 = vadd.f32 %v6404_v34, %v6403_v4 }
 0x445   : > { %5144 = vmatmul.mubr.bf16.gmra.mrb[12].mxu0 %v10220_v55  ;;  %v10229_v55 = vld [vmem:[#allocation38_spill] sm:$0xff] }
 0x446   : > { %v9523_v2 = vadd.f32 %v4514_v30, %v3902_v41  ;;  %v3913_v46 = vadd.f32 %v6269_v38, %v9380_v51  ;;  %v4517_v24 = vadd.f32 %v6405_v16, %v9382_v40  ;;  %5151 = vmatprep.mubr.bf16.mxu0 %v10221_v8  ;;  %v10228_v38 = vld [vmem:[#allocation79_spill] sm:$0xff] }
 0x448   : > { %v9528_v28 = vadd.f32 %v4517_v24, %v3905_v36  ;;  %v6270_v6 = vpop.f32.mrb[164].mxu0  ;;  %v6406_v12 = vpop.f32.mrb[4].mxu1  ;;  %v10227_v36 = vld [vmem:[#allocation76_spill] sm:$0xff]  ;;  %v10230_v24 = vld [vmem:[#allocation22_spill] sm:$0xff] }
 0x449   : > { %v6271_v58 = vpop.f32.mrb[165].mxu0  ;;  %v6407_v43 = vpop.f32.mrb[5].mxu1 }
 0x44a   : > { %v6272_v25 = vadd.f32 %v6271_v58, %v6270_v6  ;;  %v6408_v21 = vadd.f32 %v6407_v43, %v6406_v12  ;;  %v6273_v17 = vpop.f32.mrb[166].mxu0  ;;  %v6409_v10 = vpop.f32.mrb[6].mxu1  ;;  %v10231_v6 = vld [vmem:[#allocation82_spill] sm:$0xff] }
 0x44b   : > { %v6274_v23 = vpop.f32.mrb[167].mxu0  ;;  %v6410_v49 = vpop.f32.mrb[7].mxu1 }
 0x44c   : > { %v3918_v37 = vadd.f32 %v10222_v29, %v6272_v25  ;;  %v4522_v51 = vadd.f32 %v10223_v20, %v6408_v21  ;;  %v6275_v41 = vadd.f32 %v6274_v23, %v6273_v17  ;;  %v6411_v40 = vadd.f32 %v6410_v49, %v6409_v10  ;;  %v10232_v29 = vld [vmem:[#allocation36_spill] sm:$0xff] }
 0x44d   : > { %5152 = vmatmul.mubr.bf16.gmra.mrb[16].mxu0 %v10224_v7  ;;  %v10233_v20 = vld [vmem:[#allocation20_spill] sm:$0xff] }
 0x44e   : > { %v9533_v54 = vadd.f32 %v4522_v51, %v3910_v3  ;;  %v3921_v61 = vadd.f32 %v10225_v22, %v6275_v41  ;;  %v4525_v53 = vadd.f32 %v10226_v31, %v6411_v40  ;;  %5159 = vmatprep.mubr.bf16.mxu0 %v10227_v36  ;;  %v10234_v7 = vld [vmem:[#allocation84_spill] sm:$0xff] }
 0x450   : > { %v9538_v11 = vadd.f32 %v4525_v53, %v3913_v46  ;;  %v6276_v35 = vpop.f32.mrb[168].mxu0  ;;  %v6412_v33 = vpop.f32.mrb[8].mxu1  ;;  %v10236_v53 = vld [vmem:[#allocation21_spill] sm:$0xff] }
 0x451   : > { %v6277_v1 = vpop.f32.mrb[169].mxu0  ;;  %v6413_v19 = vpop.f32.mrb[9].mxu1 }
 0x452   : > { %v6278_v47 = vadd.f32 %v6277_v1, %v6276_v35  ;;  %v6414_v63 = vadd.f32 %v6413_v19, %v6412_v33  ;;  %v6279_v39 = vpop.f32.mrb[170].mxu0  ;;  %v6415_v52 = vpop.f32.mrb[10].mxu1  ;;  %v10237_v35 = vld [vmem:[#allocation67_spill] sm:$0xff] }
 0x453   : > { %v6280_v45 = vpop.f32.mrb[171].mxu0  ;;  %v6416_v4 = vpop.f32.mrb[11].mxu1 }
 0x454   : > { %v3926_v57 = vadd.f32 %v6278_v47, %v9392_v15  ;;  %v4530_v34 = vadd.f32 %v6414_v63, %v9394_v60  ;;  %v6281_v3 = vadd.f32 %v6280_v45, %v6279_v39  ;;  %v6417_v30 = vadd.f32 %v6416_v4, %v6415_v52 }
 0x455   : > { %5160 = vmatmul.mubr.bf16.gmra.mrb[20].mxu0 %v10228_v38  ;;  %v10240_v38 = vld [vmem:[#allocation24_spill] sm:$0xff] }
 0x456   : > { %v9543_v16 = vadd.f32 %v4530_v34, %v3918_v37  ;;  %v3929_v46 = vadd.f32 %v6281_v3, %v10229_v55  ;;  %v4533_v8 = vadd.f32 %v6417_v30, %v10230_v24  ;;  %5167 = vmatprep.mubr.bf16.mxu0 %v10231_v6  ;;  %v10241_v6 = vld [vmem:[#allocation86_spill] sm:$0xff] }
 0x458   : > { %v9548_v12 = vadd.f32 %v4533_v8, %v3921_v61  ;;  %v6282_v58 = vpop.f32.mrb[172].mxu0  ;;  %v6418_v43 = vpop.f32.mrb[12].mxu1  ;;  %v10235_v61 = vld [vmem:[#allocation37_spill] sm:$0xff] }
 0x459   : > { %v6283_v25 = vpop.f32.mrb[173].mxu0  ;;  %v6419_v15 = vpop.f32.mrb[13].mxu1 }
 0x45a   : > { %v6284_v21 = vadd.f32 %v6283_v25, %v6282_v58  ;;  %v6420_v60 = vadd.f32 %v6419_v15, %v6418_v43  ;;  %v6285_v17 = vpop.f32.mrb[174].mxu0  ;;  %v6421_v10 = vpop.f32.mrb[14].mxu1  ;;  %v10243_v58 = vld [vmem:[#allocation42_spill] sm:$0xff] }
 0x45b   : > { %v6286_v23 = vpop.f32.mrb[175].mxu0  ;;  %v6422_v49 = vpop.f32.mrb[15].mxu1  ;;  %v10244_v25 = vld [vmem:[#allocation26_spill] sm:$0xff] }
 0x45c   : > { %v3934_v37 = vadd.f32 %v10232_v29, %v6284_v21  ;;  %v4538_v51 = vadd.f32 %v10233_v20, %v6420_v60  ;;  %v6287_v41 = vadd.f32 %v6286_v23, %v6285_v17  ;;  %v6423_v40 = vadd.f32 %v6422_v49, %v6421_v10 }
 0x45d   : > { %5168 = vmatmul.mubr.bf16.gmra.mrb[24].mxu0 %v10234_v7  ;;  %v10246_v7 = vld [vmem:[#allocation39_spill] sm:$0xff] }
 0x45e   : > { %v9553_v22 = vadd.f32 %v4538_v51, %v3926_v57  ;;  %v3937_v31 = vadd.f32 %v10235_v61, %v6287_v41  ;;  %v4541_v36 = vadd.f32 %v10236_v53, %v6423_v40  ;;  %5175 = vmatprep.mubr.bf16.mxu0 %v10237_v35  ;;  %v10239_v57 = vld [vmem:[#allocation40_spill] sm:$0xff] }
 0x460   : > { %v9558_v33 = vadd.f32 %v4541_v36, %v3929_v46  ;;  %v6288_v1 = vpop.f32.mrb[176].mxu0  ;;  %v6424_v19 = vpop.f32.mrb[16].mxu1 }
 0x461   : > { %v6289_v47 = vpop.f32.mrb[177].mxu0  ;;  %v6425_v63 = vpop.f32.mrb[17].mxu1 }
 0x462   : > { %10238 = vst [vmem:[#allocation54_spill] sm:$0xff] %v9558_v33  ;;  %v6290_v39 = vadd.f32 %v6289_v47, %v6288_v1  ;;  %v6426_v52 = vadd.f32 %v6425_v63, %v6424_v19  ;;  %v6291_v45 = vpop.f32.mrb[178].mxu0  ;;  %v6427_v4 = vpop.f32.mrb[18].mxu1  ;;  %v10250_v47 = vld [vmem:[#allocation25_spill] sm:$0xff] }
 0x463   : > { %v6292_v34 = vpop.f32.mrb[179].mxu0  ;;  %v6428_v3 = vpop.f32.mrb[19].mxu1 }
 0x464   : > { %v3942_v30 = vadd.f32 %v6290_v39, %v10239_v57  ;;  %v4546_v55 = vadd.f32 %v6426_v52, %v10240_v38  ;;  %v6293_v24 = vadd.f32 %v6292_v34, %v6291_v45  ;;  %v6429_v8 = vadd.f32 %v6428_v3, %v6427_v4 }
 0x465   : > { %5176 = vmatmul.mubr.bf16.gmra.mrb[28].mxu0 %v10241_v6  ;;  %v10252_v6 = vld [vmem:[#allocation46_spill] sm:$0xff] }
 0x466   : > { %v9563_v46 = vadd.f32 %v4546_v55, %v3934_v37  ;;  %v3945_v43 = vadd.f32 %v6293_v24, %v10243_v58  ;;  %v4549_v15 = vadd.f32 %v6429_v8, %v10244_v25  ;;  %v10247_v37 = vld [vmem:[#allocation23_spill] sm:$0xff] }
 0x468   : > { %10242 = vst [vmem:[#allocation65_spill] sm:$0xff] %v9563_v46  ;;  %v9567_v21 = vadd.f32 %v4549_v15, %v3937_v31  ;;  %v6294_v60 = vpop.f32.mrb[180].mxu0  ;;  %v6430_v17 = vpop.f32.mrb[20].mxu1  ;;  %v10249_v31 = vld [vmem:[#allocation41_spill] sm:$0xff] }
 0x469   : > { %v6295_v10 = vpop.f32.mrb[181].mxu0  ;;  %v6431_v23 = vpop.f32.mrb[21].mxu1 }
 0x46a   : > { %10245 = vst [vmem:[#allocation55_spill] sm:$0xff] %v9567_v21  ;;  %v6296_v49 = vadd.f32 %v6295_v10, %v6294_v60  ;;  %v6432_v29 = vadd.f32 %v6431_v23, %v6430_v17  ;;  %v6297_v20 = vpop.f32.mrb[182].mxu0  ;;  %v6433_v51 = vpop.f32.mrb[22].mxu1  ;;  %v10256_v23 = vld [vmem:[#allocation44_spill] sm:$0xff] }
 0x46b   : > { %v6298_v41 = vpop.f32.mrb[183].mxu0  ;;  %v6434_v40 = vpop.f32.mrb[23].mxu1 }
 0x46c   : > { %v3950_v61 = vadd.f32 %v10246_v7, %v6296_v49  ;;  %v4554_v53 = vadd.f32 %v10247_v37, %v6432_v29  ;;  %v6299_v36 = vadd.f32 %v6298_v41, %v6297_v20  ;;  %v6435_v35 = vadd.f32 %v6434_v40, %v6433_v51 }
 0x46e   : > { %v9571_v1 = vadd.f32 %v4554_v53, %v3942_v30  ;;  %v3953_v19 = vadd.f32 %v10249_v31, %v6299_v36  ;;  %v4557_v63 = vadd.f32 %v10250_v47, %v6435_v35  ;;  %v10253_v30 = vld [vmem:[#allocation69_spill] sm:$0xff]  ;;  %v10258_v31 = vld [vmem:[#allocation43_spill] sm:$0xff] }
 0x470   : > { %10248 = vst [vmem:[#allocation28_spill] sm:$0xff] %v9571_v1  ;;  %v9575_v39 = vadd.f32 %v4557_v63, %v3945_v43  ;;  %v6300_v52 = vpop.f32.mrb[184].mxu0  ;;  %v6436_v45 = vpop.f32.mrb[24].mxu1  ;;  %v10255_v43 = vld [vmem:[#allocation61_spill] sm:$0xff] }
 0x471   : > { %v6301_v4 = vpop.f32.mrb[185].mxu0  ;;  %v6437_v34 = vpop.f32.mrb[25].mxu1 }
 0x472   : > { %10251 = vst [vmem:[#allocation48_spill] sm:$0xff] %v9575_v39  ;;  %v6302_v3 = vadd.f32 %v6301_v4, %v6300_v52  ;;  %v6438_v57 = vadd.f32 %v6437_v34, %v6436_v45  ;;  %v6303_v38 = vpop.f32.mrb[186].mxu0  ;;  %v6439_v55 = vpop.f32.mrb[26].mxu1  ;;  %v10259_v52 = vld [vmem:[#allocation27_spill] sm:$0xff] }
 0x473   : > { %v6304_v24 = vpop.f32.mrb[187].mxu0  ;;  %v6440_v8 = vpop.f32.mrb[27].mxu1 }
 0x474   : > { %v3958_v58 = vadd.f32 %v6302_v3, %v10252_v6  ;;  %v4562_v25 = vadd.f32 %v6438_v57, %v10253_v30  ;;  %v6305_v15 = vadd.f32 %v6304_v24, %v6303_v38  ;;  %v6441_v60 = vadd.f32 %v6440_v8, %v6439_v55  ;;  %v7129_v38 = vld [vmem:[%s7661_s21 + $0xf0] sm:$0xff] }
 0x476   : > { %v9579_v17 = vadd.f32 %v4562_v25, %v3950_v61  ;;  %v3961_v10 = vadd.f32 %v6305_v15, %v10255_v43  ;;  %v4565_v49 = vadd.f32 %v6441_v60, %v10256_v23  ;;  %v7130_v25 = vld [vmem:[%s7661_s21 + $0xf8] sm:$0xff] }
 0x478   : > { %10254 = vst [vmem:[#allocation45_spill] sm:$0xff] %v9579_v17  ;;  %v9583_v29 = vadd.f32 %v4565_v49, %v3953_v19  ;;  %v6306_v20 = vpop.f32.mrb[188].mxu0  ;;  %v6442_v51 = vpop.f32.mrb[28].mxu1  ;;  %v9589_v19 = vld [vmem:[%s9857_s6] ss:$0 sm:$0xff] }
 0x479   : > { %v6307_v41 = vpop.f32.mrb[189].mxu0  ;;  %v6443_v40 = vpop.f32.mrb[29].mxu1 }
 0x47a   : > { %10257 = vst [vmem:[#allocation72_spill] sm:$0xff] %v9583_v29  ;;  %v6444_v7 = vadd.f32 %v6443_v40, %v6442_v51  ;;  %v6309_v37 = vpop.f32.mrb[190].mxu0  ;;  %v6445_v53 = vpop.f32.mrb[30].mxu1 }
 0x47b   : > { %v6310_v36 = vpop.f32.mrb[191].mxu0  ;;  %v6446_v35 = vpop.f32.mrb[31].mxu1 }
 0x47c   : > { %v4570_v61 = vadd.f32 %v10258_v31, %v6444_v7  ;;  %v6447_v47 = vadd.f32 %v6446_v35, %v6445_v53 }
 0x47e   : > { %v4638_v63 = vadd.f32 %v4570_v61, %v3958_v58  ;;  %v4573_v45 = vadd.f32 %v10259_v52, %v6447_v47 }
 0x480   : > { %v5343_v4 = vadd.f32 %v9589_v19, %v4638_v63  ;;  %v4639_v34 = vadd.f32 %v4573_v45, %v3961_v10  ;;  %v6842_v3 = vpop.f32.mrb[192].mxu0 }
 0x481   : > { %v4804_v57 = vpop.f32.mrb[193].mxu0 }
 0x482   : > { %v5375_v55 = vadd.f32 %v7129_v38, %v5343_v4  ;;  %v5344_v24 = vadd.f32 %v9589_v19, %v4639_v34  ;;  %v6843_v8 = vpop.f32.mrb[194].mxu0 }
 0x483   : > { %v4806_v6 = vpop.f32.mrb[195].mxu0 }
 0x484   : > { %v5407_v30 = vmax.f32 %v5375_v55, 0.0  ;;  %v5376_v15 = vadd.f32 %v7130_v25, %v5344_v24 }
 0x486   : > { %5439 = vst [vmem:[%s9598_s18 + $0xf0] sm:$0xff] %v5407_v30  ;;  %v5408_v58 = vmax.f32 %v5376_v15, 0.0 }
 0x488   : > { %5440 = vst [vmem:[%s9598_s18 + $0xf8] sm:$0xff] %v5408_v58  ;;  %v9602_v60 = vpop.f32.mrb[196].mxu0 }
 0x489   : > { %v4818_v43 = vpop.f32.mrb[197].mxu0 }
 0x48a   : > { %v9604_v10 = vpop.f32.mrb[198].mxu0 }
 0x48b   : > { %v4821_v23 = vpop.f32.mrb[199].mxu0 }
 0x490   : > { %v9606_v49 = vpop.f32.mrb[200].mxu0 }
 0x491   : > { %v9608_v20 = vpop.f32.mrb[201].mxu0 }
 0x492   : > { %v9610_v51 = vpop.f32.mrb[202].mxu0 }
 0x493   : > { %v9612_v41 = vpop.f32.mrb[203].mxu0 }
 0x498   : > { %v9614_v40 = vpop.f32.mrb[204].mxu0 }
 0x499   : > { %v9616_v7 = vpop.f32.mrb[205].mxu0 }
 0x49a   : > { %v9618_v37 = vpop.f32.mrb[206].mxu0 }
 0x49b   : > { %v9620_v53 = vpop.f32.mrb[207].mxu0 }
 0x4a0   : > { %v9622_v36 = vpop.f32.mrb[208].mxu0 }
 0x4a1   : > { %v9624_v35 = vpop.f32.mrb[209].mxu0 }
 0x4a2   : > { %v9626_v31 = vpop.f32.mrb[210].mxu0 }
 0x4a3   : > { %v9628_v61 = vpop.f32.mrb[211].mxu0 }
 0x4a8   : > { %v9630_v47 = vpop.f32.mrb[212].mxu0 }
 0x4a9   : > { %v9632_v63 = vpop.f32.mrb[213].mxu0 }
 0x4aa   : > { %v9634_v52 = vpop.f32.mrb[214].mxu0 }
 0x4ab   : > { %v9636_v45 = vpop.f32.mrb[215].mxu0 }
 0x4b0   : > { %v9638_v4 = vpop.f32.mrb[216].mxu0 }
 0x4b1   : > { %10260 = vst [vmem:[#allocation66_spill] sm:$0xff] %v9638_v4  ;;  %v9640_v34 = vpop.f32.mrb[217].mxu0 }
 0x4b2   : > { %v9642_v57 = vpop.f32.mrb[218].mxu0 }
 0x4b3   : > { %10261 = vst [vmem:[#allocation73_spill] sm:$0xff] %v9642_v57  ;;  %v9644_v38 = vpop.f32.mrb[219].mxu0 }
 0x4b8   : > { %v9646_v55 = vpop.f32.mrb[220].mxu0 }
 0x4b9   : > { %10262 = vst [vmem:[#allocation29_spill] sm:$0xff] %v9646_v55  ;;  %v9648_v24 = vpop.f32.mrb[221].mxu0 }
 0x4ba   : > { %10263 = vst [vmem:[#allocation49_spill] sm:$0xff] %v9648_v24  ;;  %v9650_v6 = vpop.f32.mrb[222].mxu0 }
 0x4bb   : > { %10264 = vst [vmem:[#allocation47_spill] sm:$0xff] %v9650_v6  ;;  %v9652_v30 = vpop.f32.mrb[223].mxu0 }
 0x4bc   : > { %10265 = vst [vmem:[#allocation68_spill] sm:$0xff] %v9652_v30 }
 0x4c0   : > { %v6488_v25 = vpop.f32.mrb[224].mxu0 }
 0x4c1   : > { %v6489_v15 = vpop.f32.mrb[225].mxu0 }
 0x4c2   : > { %v6491_v58 = vpop.f32.mrb[226].mxu0 }
 0x4c3   : > { %v6492_v29 = vpop.f32.mrb[227].mxu0 }
 0x4c4   : > { %v7131_v29 = vld [vmem:[%s7661_s21] sm:$0xff] }
 0x4c8   : > { %v6494_v17 = vpop.f32.mrb[228].mxu0 }
 0x4c9   : > { %v6495_v39 = vpop.f32.mrb[229].mxu0 }
 0x4ca   : > { %v6496_v1 = vadd.f32 %v6495_v39, %v6494_v17  ;;  %v6497_v21 = vpop.f32.mrb[230].mxu0 }
 0x4cb   : > { %v6498_v57 = vpop.f32.mrb[231].mxu0 }
 0x4cc   : > { %v5066_v46 = vadd.f32 %v6842_v3, %v6496_v1  ;;  %v6499_v4 = vadd.f32 %v6498_v57, %v6497_v21  ;;  %v7132_v3 = vld [vmem:[%s7661_s21 + $0x8] sm:$0xff] }
 0x4ce   : > { %v5214_v55 = vadd.f32 %v5066_v46, %v9442_v56  ;;  %v5069_v24 = vadd.f32 %v6843_v8, %v6499_v4 }
 0x4d0   : > { %v5313_v6 = vadd.f32 %v9589_v19, %v5214_v55  ;;  %v5215_v25 = vadd.f32 %v5069_v24, %v9447_v13  ;;  %v6500_v15 = vpop.f32.mrb[232].mxu0 }
 0x4d1   : > { %v6501_v30 = vpop.f32.mrb[233].mxu0 }
 0x4d2   : > { %v5345_v58 = vadd.f32 %v7131_v29, %v5313_v6  ;;  %v5314_v39 = vadd.f32 %v9589_v19, %v5215_v25  ;;  %v6502_v17 = vadd.f32 %v6501_v30, %v6500_v15  ;;  %v6503_v33 = vpop.f32.mrb[234].mxu0  ;;  %v7133_v25 = vld [vmem:[%s7661_s21 + $0x10] sm:$0xff] }
 0x4d3   : > { %v6504_v1 = vpop.f32.mrb[235].mxu0 }
 0x4d4   : > { %v5377_v21 = vmax.f32 %v5345_v58, 0.0  ;;  %v5346_v56 = vadd.f32 %v7132_v3, %v5314_v39  ;;  %v5074_v46 = vadd.f32 %v6502_v17, %v4818_v43  ;;  %v6505_v8 = vadd.f32 %v6504_v1, %v6503_v33 }
 0x4d6   : > { %5409 = vst [vmem:[%s9598_s18] sm:$0xff] %v5377_v21  ;;  %v5378_v4 = vmax.f32 %v5346_v56, 0.0  ;;  %v5216_v13 = vadd.f32 %v5074_v46, %v9453_v0  ;;  %v5077_v57 = vadd.f32 %v6505_v8, %v4821_v23  ;;  %v7134_v0 = vld [vmem:[%s7661_s21 + $0x18] sm:$0xff] }
 0x4d8   : > { %5410 = vst [vmem:[%s9598_s18 + $0x8] sm:$0xff] %v5378_v4  ;;  %v5315_v55 = vadd.f32 %v9589_v19, %v5216_v13  ;;  %v5217_v24 = vadd.f32 %v5077_v57, %v9458_v62  ;;  %v6506_v6 = vpop.f32.mrb[236].mxu0  ;;  %v7135_v13 = vld [vmem:[%s7661_s21 + $0x20] sm:$0xff] }
 0x4d9   : > { %v6507_v30 = vpop.f32.mrb[237].mxu0 }
 0x4da   : > { %v5347_v15 = vadd.f32 %v7133_v25, %v5315_v55  ;;  %v5316_v43 = vadd.f32 %v9589_v19, %v5217_v24  ;;  %v6508_v33 = vadd.f32 %v6507_v30, %v6506_v6  ;;  %v6509_v29 = vpop.f32.mrb[238].mxu0  ;;  %v7136_v30 = vld [vmem:[%s7661_s21 + $0x28] sm:$0xff] }
 0x4db   : > { %v6510_v58 = vpop.f32.mrb[239].mxu0 }
 0x4dc   : > { %v5379_v39 = vmax.f32 %v5347_v15, 0.0  ;;  %v5348_v23 = vadd.f32 %v7134_v0, %v5316_v43  ;;  %v5082_v17 = vadd.f32 %v9602_v60, %v6508_v33  ;;  %v6511_v1 = vadd.f32 %v6510_v58, %v6509_v29 }
 0x4de   : > { %5411 = vst [vmem:[%s9598_s18 + $0x10] sm:$0xff] %v5379_v39  ;;  %v5380_v62 = vmax.f32 %v5348_v23, 0.0  ;;  %v5218_v21 = vadd.f32 %v5082_v17, %v9463_v50  ;;  %v5085_v3 = vadd.f32 %v9604_v10, %v6511_v1  ;;  %v7137_v23 = vld [vmem:[%s7661_s21 + $0x30] sm:$0xff] }
 0x4e0   : > { %5412 = vst [vmem:[%s9598_s18 + $0x18] sm:$0xff] %v5380_v62  ;;  %v5317_v56 = vadd.f32 %v9589_v19, %v5218_v21  ;;  %v5219_v46 = vadd.f32 %v5085_v3, %v9468_v44  ;;  %v6512_v8 = vpop.f32.mrb[240].mxu0  ;;  %v7138_v3 = vld [vmem:[%s7661_s21 + $0x38] sm:$0xff] }
 0x4e1   : > { %v6513_v4 = vpop.f32.mrb[241].mxu0 }
 0x4e2   : > { %v5349_v57 = vadd.f32 %v7135_v13, %v5317_v56  ;;  %v5318_v60 = vadd.f32 %v9589_v19, %v5219_v46  ;;  %v6514_v55 = vadd.f32 %v6513_v4, %v6512_v8  ;;  %v6515_v24 = vpop.f32.mrb[242].mxu0 }
 0x4e3   : > { %v6516_v6 = vpop.f32.mrb[243].mxu0 }
 0x4e4   : > { %v5381_v50 = vmax.f32 %v5349_v57, 0.0  ;;  %v5350_v10 = vadd.f32 %v7136_v30, %v5318_v60  ;;  %v5090_v25 = vadd.f32 %v6514_v55, %v9608_v20  ;;  %v6517_v15 = vadd.f32 %v6516_v6, %v6515_v24  ;;  %v7139_v24 = vld [vmem:[%s7661_s21 + $0x40] sm:$0xff] }
 0x4e6   : > { %5413 = vst [vmem:[%s9598_s18 + $0x20] sm:$0xff] %v5381_v50  ;;  %v5382_v44 = vmax.f32 %v5350_v10, 0.0  ;;  %v5220_v43 = vadd.f32 %v5090_v25, %v9473_v59  ;;  %v5093_v33 = vadd.f32 %v6517_v15, %v9612_v41  ;;  %v7140_v25 = vld [vmem:[%s7661_s21 + $0x48] sm:$0xff] }
 0x4e8   : > { %5414 = vst [vmem:[%s9598_s18 + $0x28] sm:$0xff] %v5382_v44  ;;  %v5319_v29 = vadd.f32 %v9589_v19, %v5220_v43  ;;  %v5221_v58 = vadd.f32 %v5093_v33, %v9478_v5  ;;  %v6518_v39 = vpop.f32.mrb[244].mxu0 }
 0x4e9   : > { %v6519_v0 = vpop.f32.mrb[245].mxu0 }
 0x4ea   : > { %v5351_v17 = vadd.f32 %v7137_v23, %v5319_v29  ;;  %v5320_v20 = vadd.f32 %v9589_v19, %v5221_v58  ;;  %v6520_v1 = vadd.f32 %v6519_v0, %v6518_v39  ;;  %v6521_v62 = vpop.f32.mrb[246].mxu0  ;;  %v7141_v23 = vld [vmem:[%s7661_s21 + $0x50] sm:$0xff] }
 0x4eb   : > { %v6522_v21 = vpop.f32.mrb[247].mxu0 }
 0x4ec   : > { %v5383_v59 = vmax.f32 %v5351_v17, 0.0  ;;  %v5352_v41 = vadd.f32 %v7138_v3, %v5320_v20  ;;  %v5098_v56 = vadd.f32 %v9606_v49, %v6520_v1  ;;  %v6523_v46 = vadd.f32 %v6522_v21, %v6521_v62  ;;  %v7142_v21 = vld [vmem:[%s7661_s21 + $0x58] sm:$0xff] }
 0x4ee   : > { %5415 = vst [vmem:[%s9598_s18 + $0x30] sm:$0xff] %v5383_v59  ;;  %v5384_v5 = vmax.f32 %v5352_v41, 0.0  ;;  %v5222_v8 = vadd.f32 %v5098_v56, %v9483_v48  ;;  %v5101_v4 = vadd.f32 %v9610_v51, %v6523_v46 }
 0x4f0   : > { %5416 = vst [vmem:[%s9598_s18 + $0x38] sm:$0xff] %v5384_v5  ;;  %v5321_v13 = vadd.f32 %v9589_v19, %v5222_v8  ;;  %v5223_v57 = vadd.f32 %v5101_v4, %v9488_v27  ;;  %v6524_v60 = vpop.f32.mrb[248].mxu0 }
 0x4f1   : > { %v6525_v55 = vpop.f32.mrb[249].mxu0 }
 0x4f2   : > { %v5353_v6 = vadd.f32 %v7139_v24, %v5321_v13  ;;  %v5322_v49 = vadd.f32 %v9589_v19, %v5223_v57  ;;  %v6526_v50 = vadd.f32 %v6525_v55, %v6524_v60  ;;  %v6527_v30 = vpop.f32.mrb[250].mxu0  ;;  %v7143_v13 = vld [vmem:[%s7661_s21 + $0x60] sm:$0xff] }
 0x4f3   : > { %v6528_v10 = vpop.f32.mrb[251].mxu0 }
 0x4f4   : > { %v5385_v48 = vmax.f32 %v5353_v6, 0.0  ;;  %v5354_v51 = vadd.f32 %v7140_v25, %v5322_v49  ;;  %v5106_v15 = vadd.f32 %v6526_v50, %v9616_v7  ;;  %v6529_v44 = vadd.f32 %v6528_v10, %v6527_v30  ;;  %v7144_v6 = vld [vmem:[%s7661_s21 + $0x68] sm:$0xff] }
 0x4f6   : > { %5417 = vst [vmem:[%s9598_s18 + $0x40] sm:$0xff] %v5385_v48  ;;  %v5386_v27 = vmax.f32 %v5354_v51, 0.0  ;;  %v5224_v43 = vadd.f32 %v5106_v15, %v9493_v14  ;;  %v5109_v33 = vadd.f32 %v6529_v44, %v9620_v53  ;;  %v7145_v44 = vld [vmem:[%s7661_s21 + $0x70] sm:$0xff] }
 0x4f8   : > { %5418 = vst [vmem:[%s9598_s18 + $0x48] sm:$0xff] %v5386_v27  ;;  %v5323_v29 = vadd.f32 %v9589_v19, %v5224_v43  ;;  %v5225_v58 = vadd.f32 %v5109_v33, %v9498_v42  ;;  %v6530_v39 = vpop.f32.mrb[252].mxu0 }
 0x4f9   : > { %v6531_v0 = vpop.f32.mrb[253].mxu0 }
 0x4fa   : > { %v5355_v17 = vadd.f32 %v7141_v23, %v5323_v29  ;;  %v5324_v7 = vadd.f32 %v9589_v19, %v5225_v58  ;;  %v6532_v20 = vadd.f32 %v6531_v0, %v6530_v39  ;;  %v6533_v1 = vpop.f32.mrb[254].mxu0  ;;  %v7146_v58 = vld [vmem:[%s7661_s21 + $0x78] sm:$0xff] }
 0x4fb   : > { %v6534_v62 = vpop.f32.mrb[255].mxu0 }
 0x4fc   : > { %v5387_v14 = vmax.f32 %v5355_v17, 0.0  ;;  %v5356_v53 = vadd.f32 %v7142_v21, %v5324_v7  ;;  %v5114_v59 = vadd.f32 %v9614_v40, %v6532_v20  ;;  %v6535_v3 = vadd.f32 %v6534_v62, %v6533_v1 }
 0x4fe   : > { %5419 = vst [vmem:[%s9598_s18 + $0x50] sm:$0xff] %v5387_v14  ;;  %v5388_v42 = vmax.f32 %v5356_v53, 0.0  ;;  %v5226_v41 = vadd.f32 %v5114_v59, %v9503_v18  ;;  %v5117_v56 = vadd.f32 %v9618_v37, %v6535_v3  ;;  %v7147_v14 = vld [vmem:[%s7661_s21 + $0x80] sm:$0xff] }
 0x500   : > { %5420 = vst [vmem:[%s9598_s18 + $0x58] sm:$0xff] %v5388_v42  ;;  %v5325_v46 = vadd.f32 %v9589_v19, %v5226_v41  ;;  %v5227_v5 = vadd.f32 %v5117_v56, %v9508_v26  ;;  %v6536_v8 = vpop.f32.mrb[0].mxu0  ;;  %v7148_v42 = vld [vmem:[%s7661_s21 + $0x88] sm:$0xff] }
 0x501   : > { %v6537_v4 = vpop.f32.mrb[1].mxu0 }
 0x502   : > { %v5357_v57 = vadd.f32 %v7143_v13, %v5325_v46  ;;  %v5326_v40 = vadd.f32 %v9589_v19, %v5227_v5  ;;  %v6538_v60 = vadd.f32 %v6537_v4, %v6536_v8  ;;  %v6539_v55 = vpop.f32.mrb[2].mxu0 }
 0x503   : > { %v6540_v24 = vpop.f32.mrb[3].mxu0 }
 0x504   : > { %v5389_v18 = vmax.f32 %v5357_v57, 0.0  ;;  %v5358_v37 = vadd.f32 %v7144_v6, %v5326_v40  ;;  %v5122_v49 = vadd.f32 %v6538_v60, %v9624_v35  ;;  %v6541_v50 = vadd.f32 %v6540_v24, %v6539_v55  ;;  %v7149_v40 = vld [vmem:[%s7661_s21 + $0x90] sm:$0xff]  ;;  %v7150_v6 = vld [vmem:[%s7661_s21 + $0x98] sm:$0xff] }
 0x506   : > { %5421 = vst [vmem:[%s9598_s18 + $0x60] sm:$0xff] %v5389_v18  ;;  %v5390_v26 = vmax.f32 %v5358_v37, 0.0  ;;  %v5228_v30 = vadd.f32 %v5122_v49, %v9513_v9  ;;  %v5125_v10 = vadd.f32 %v6541_v50, %v9628_v61 }
 0x508   : > { %5422 = vst [vmem:[%s9598_s18 + $0x68] sm:$0xff] %v5390_v26  ;;  %v5327_v48 = vadd.f32 %v9589_v19, %v5228_v30  ;;  %v5229_v25 = vadd.f32 %v5125_v10, %v9518_v32  ;;  %v6542_v51 = vpop.f32.mrb[4].mxu0 }
 0x509   : > { %v6543_v15 = vpop.f32.mrb[5].mxu0 }
 0x50a   : > { %v5359_v27 = vadd.f32 %v7145_v44, %v5327_v48  ;;  %v5328_v35 = vadd.f32 %v9589_v19, %v5229_v25  ;;  %v6544_v43 = vadd.f32 %v6543_v15, %v6542_v51  ;;  %v6545_v33 = vpop.f32.mrb[6].mxu0  ;;  %v7151_v51 = vld [vmem:[%s7661_s21 + $0xa0] sm:$0xff] }
 0x50b   : > { %v6546_v29 = vpop.f32.mrb[7].mxu0 }
 0x50c   : > { %v5391_v9 = vmax.f32 %v5359_v27, 0.0  ;;  %v5360_v61 = vadd.f32 %v7146_v58, %v5328_v35  ;;  %v5130_v39 = vadd.f32 %v9622_v36, %v6544_v43  ;;  %v6547_v0 = vadd.f32 %v6546_v29, %v6545_v33  ;;  %v7152_v43 = vld [vmem:[%s7661_s21 + $0xa8] sm:$0xff] }
 0x50e   : > { %5423 = vst [vmem:[%s9598_s18 + $0x70] sm:$0xff] %v5391_v9  ;;  %v5392_v32 = vmax.f32 %v5360_v61, 0.0  ;;  %v5230_v23 = vadd.f32 %v5130_v39, %v9523_v2  ;;  %v5133_v17 = vadd.f32 %v9626_v31, %v6547_v0  ;;  %v10266_v39 = vld [vmem:[#allocation54_spill] sm:$0xff] }
 0x510   : > { %5424 = vst [vmem:[%s9598_s18 + $0x78] sm:$0xff] %v5392_v32  ;;  %v5329_v7 = vadd.f32 %v9589_v19, %v5230_v23  ;;  %v5231_v20 = vadd.f32 %v5133_v17, %v9528_v28  ;;  %v6548_v1 = vpop.f32.mrb[8].mxu0  ;;  %v7153_v17 = vld [vmem:[%s7661_s21 + $0xb0] sm:$0xff] }
 0x511   : > { %v6549_v62 = vpop.f32.mrb[9].mxu0 }
 0x512   : > { %v5361_v21 = vadd.f32 %v7147_v14, %v5329_v7  ;;  %v5330_v36 = vadd.f32 %v9589_v19, %v5231_v20  ;;  %v6550_v53 = vadd.f32 %v6549_v62, %v6548_v1  ;;  %v6551_v59 = vpop.f32.mrb[10].mxu0  ;;  %v7154_v14 = vld [vmem:[%s7661_s21 + $0xb8] sm:$0xff] }
 0x513   : > { %v6552_v3 = vpop.f32.mrb[11].mxu0 }
 0x514   : > { %v5393_v2 = vmax.f32 %v5361_v21, 0.0  ;;  %v5362_v31 = vadd.f32 %v7148_v42, %v5330_v36  ;;  %v5138_v41 = vadd.f32 %v6550_v53, %v9632_v63  ;;  %v6553_v56 = vadd.f32 %v6552_v3, %v6551_v59  ;;  %v10267_v21 = vld [vmem:[#allocation66_spill] sm:$0xff]  ;;  %v10268_v3 = vld [vmem:[#allocation65_spill] sm:$0xff] }
 0x515   : > { %v10269_v42 = vld [vmem:[#allocation73_spill] sm:$0xff] }
 0x516   : > { %5425 = vst [vmem:[%s9598_s18 + $0x80] sm:$0xff] %v5393_v2  ;;  %v5394_v28 = vmax.f32 %v5362_v31, 0.0  ;;  %v5232_v46 = vadd.f32 %v5138_v41, %v9533_v54  ;;  %v5141_v5 = vadd.f32 %v6553_v56, %v9636_v45  ;;  %v10270_v56 = vld [vmem:[#allocation55_spill] sm:$0xff] }
 0x518   : > { %5426 = vst [vmem:[%s9598_s18 + $0x88] sm:$0xff] %v5394_v28  ;;  %v5331_v8 = vadd.f32 %v9589_v19, %v5232_v46  ;;  %v5233_v4 = vadd.f32 %v5141_v5, %v9538_v11  ;;  %v6554_v13 = vpop.f32.mrb[12].mxu0 }
 0x519   : > { %v6555_v57 = vpop.f32.mrb[13].mxu0 }
 0x51a   : > { %v5363_v60 = vadd.f32 %v7149_v40, %v5331_v8  ;;  %v5332_v63 = vadd.f32 %v9589_v19, %v5233_v4  ;;  %v6556_v55 = vadd.f32 %v6555_v57, %v6554_v13  ;;  %v6557_v24 = vpop.f32.mrb[14].mxu0  ;;  %v7155_v8 = vld [vmem:[%s7661_s21 + $0xc0] sm:$0xff] }
 0x51b   : > { %v6558_v18 = vpop.f32.mrb[15].mxu0 }
 0x51c   : > { %v5395_v54 = vmax.f32 %v5363_v60, 0.0  ;;  %v5364_v45 = vadd.f32 %v7150_v6, %v5332_v63  ;;  %v5146_v37 = vadd.f32 %v9630_v47, %v6556_v55  ;;  %v6559_v49 = vadd.f32 %v6558_v18, %v6557_v24  ;;  %v7156_v55 = vld [vmem:[%s7661_s21 + $0xc8] sm:$0xff]  ;;  %v10271_v18 = vld [vmem:[#allocation49_spill] sm:$0xff] }
 0x51e   : > { %5427 = vst [vmem:[%s9598_s18 + $0x90] sm:$0xff] %v5395_v54  ;;  %v5396_v11 = vmax.f32 %v5364_v45, 0.0  ;;  %v5234_v50 = vadd.f32 %v5146_v37, %v9543_v16  ;;  %v5149_v26 = vadd.f32 %v9634_v52, %v6559_v49  ;;  %v10272_v37 = vld [vmem:[#allocation28_spill] sm:$0xff] }
 0x520   : > { %5428 = vst [vmem:[%s9598_s18 + $0x98] sm:$0xff] %v5396_v11  ;;  %v5333_v30 = vadd.f32 %v9589_v19, %v5234_v50  ;;  %v5235_v10 = vadd.f32 %v5149_v26, %v9548_v12  ;;  %v6560_v48 = vpop.f32.mrb[16].mxu0  ;;  %v10273_v11 = vld [vmem:[#allocation68_spill] sm:$0xff] }
 0x521   : > { %v6561_v25 = vpop.f32.mrb[17].mxu0 }
 0x522   : > { %v5365_v15 = vadd.f32 %v7151_v51, %v5333_v30  ;;  %v5334_v47 = vadd.f32 %v9589_v19, %v5235_v10  ;;  %v6562_v44 = vadd.f32 %v6561_v25, %v6560_v48  ;;  %v6563_v27 = vpop.f32.mrb[18].mxu0  ;;  %v10274_v30 = vld [vmem:[#allocation48_spill] sm:$0xff] }
 0x523   : > { %v6564_v35 = vpop.f32.mrb[19].mxu0  ;;  %v7157_v51 = vld [vmem:[%s7661_s21 + $0xd0] sm:$0xff] }
 0x524   : > { %v5397_v16 = vmax.f32 %v5365_v15, 0.0  ;;  %v5366_v52 = vadd.f32 %v7152_v43, %v5334_v47  ;;  %v5154_v33 = vadd.f32 %v6562_v44, %v9640_v34  ;;  %v6565_v29 = vadd.f32 %v6564_v35, %v6563_v27  ;;  %v7158_v43 = vld [vmem:[%s7661_s21 + $0xd8] sm:$0xff] }
 0x526   : > { %5429 = vst [vmem:[%s9598_s18 + $0xa0] sm:$0xff] %v5397_v16  ;;  %v5398_v12 = vmax.f32 %v5366_v52, 0.0  ;;  %v5236_v9 = vadd.f32 %v5154_v33, %v9553_v22  ;;  %v5157_v58 = vadd.f32 %v6565_v29, %v9644_v38  ;;  %v10275_v33 = vld [vmem:[#allocation29_spill] sm:$0xff] }
 0x528   : > { %5430 = vst [vmem:[%s9598_s18 + $0xa8] sm:$0xff] %v5398_v12  ;;  %v5335_v61 = vadd.f32 %v9589_v19, %v5236_v9  ;;  %v5237_v0 = vadd.f32 %v5157_v58, %v10266_v39  ;;  %v6566_v32 = vpop.f32.mrb[20].mxu0  ;;  %v10276_v58 = vld [vmem:[#allocation45_spill] sm:$0xff]  ;;  %v10277_v39 = vld [vmem:[#allocation47_spill] sm:$0xff] }
 0x529   : > { %v6567_v23 = vpop.f32.mrb[21].mxu0 }
 0x52a   : > { %v5367_v7 = vadd.f32 %v7153_v17, %v5335_v61  ;;  %v5336_v34 = vadd.f32 %v9589_v19, %v5237_v0  ;;  %v6568_v20 = vadd.f32 %v6567_v23, %v6566_v32  ;;  %v6569_v1 = vpop.f32.mrb[22].mxu0  ;;  %v10278_v23 = vld [vmem:[#allocation72_spill] sm:$0xff] }
 0x52b   : > { %v6570_v62 = vpop.f32.mrb[23].mxu0 }
 0x52c   : > { %v5399_v22 = vmax.f32 %v5367_v7, 0.0  ;;  %v5368_v38 = vadd.f32 %v7154_v14, %v5336_v34  ;;  %v5162_v36 = vadd.f32 %v10267_v21, %v6568_v20  ;;  %v6571_v53 = vadd.f32 %v6570_v62, %v6569_v1  ;;  %v7159_v7 = vld [vmem:[%s7661_s21 + $0xe0] sm:$0xff]  ;;  %v7160_v62 = vld [vmem:[%s7661_s21 + $0xe8] sm:$0xff]  ;;  %s7307_s21 = sshll.u32 %s7389_s28, 4  ;;  %s7308_s21 = int_to_ptr.vmem [resolvable:$false] %s7307_s21 }
 0x52d   : > { %s7309_s9 = scalar_lea.vmem %s7308_s21, 8192  ;;  %p7310_p12 = scmp.lt.s32.totalorder %s9805_s12, %s7308_s21 }
 0x52e   : > { %5431 = vst [vmem:[%s9598_s18 + $0xb0] sm:$0xff] %v5399_v22  ;;  %v5400_v59 = vmax.f32 %v5368_v38, 0.0  ;;  %v5238_v2 = vadd.f32 %v5162_v36, %v10268_v3  ;;  %v5165_v31 = vadd.f32 %v10269_v42, %v6571_v53  ;;  %p7311_p1 = scmp.lt.s32.totalorder %s7309_s9, %s7303_s30 }
 0x530   : > { %5432 = vst [vmem:[%s9598_s18 + $0xb8] sm:$0xff] %v5400_v59  ;;  %v5337_v41 = vadd.f32 %v9589_v19, %v5238_v2  ;;  %v5239_v28 = vadd.f32 %v5165_v31, %v10270_v56  ;;  %v6572_v46 = vpop.f32.mrb[24].mxu0  ;;  %p7312_p2 = por %p7311_p1, %p7310_p12 }
 0x531   : > { %v6573_v5 = vpop.f32.mrb[25].mxu0 }
 0x532   : > { %v5369_v4 = vadd.f32 %v7155_v8, %v5337_v41  ;;  %v5338_v13 = vadd.f32 %v9589_v19, %v5239_v28  ;;  %v6574_v57 = vadd.f32 %v6573_v5, %v6572_v46  ;;  %v6575_v40 = vpop.f32.mrb[26].mxu0  ;;  %p7313_p13 = pnand %p7312_p2, %p7306_p7 }
 0x533   : > { %v6576_v60 = vpop.f32.mrb[27].mxu0 }
 0x534   : > { %v5401_v63 = vmax.f32 %v5369_v4, 0.0  ;;  %v5370_v24 = vadd.f32 %v7156_v55, %v5338_v13  ;;  %v5170_v54 = vadd.f32 %v6574_v57, %v10271_v18  ;;  %v6577_v6 = vadd.f32 %v6576_v60, %v6575_v40 }
 0x536   : > { %5433 = vst [vmem:[%s9598_s18 + $0xc0] sm:$0xff] %v5401_v63  ;;  %v5402_v45 = vmax.f32 %v5370_v24, 0.0  ;;  %v5240_v49 = vadd.f32 %v5170_v54, %v10272_v37  ;;  %v5173_v50 = vadd.f32 %v6577_v6, %v10273_v11 }
 0x538   : > { %5434 = vst [vmem:[%s9598_s18 + $0xc8] sm:$0xff] %v5402_v45  ;;  %v5339_v26 = vadd.f32 %v9589_v19, %v5240_v49  ;;  %v5241_v10 = vadd.f32 %v5173_v50, %v10274_v30  ;;  %v6578_v48 = vpop.f32.mrb[28].mxu0 }
 0x539   : > { %v6579_v25 = vpop.f32.mrb[29].mxu0 }
 0x53a   : > { %v5371_v15 = vadd.f32 %v7157_v51, %v5339_v26  ;;  %v5340_v47 = vadd.f32 %v9589_v19, %v5241_v10  ;;  %v6580_v44 = vadd.f32 %v6579_v25, %v6578_v48  ;;  %v6581_v27 = vpop.f32.mrb[30].mxu0 }
 0x53b   : > { %v6582_v35 = vpop.f32.mrb[31].mxu0 }
 0x53c   : > { %v5403_v16 = vmax.f32 %v5371_v15, 0.0  ;;  %v5372_v52 = vadd.f32 %v7158_v43, %v5340_v47  ;;  %v5178_v29 = vadd.f32 %v10275_v33, %v6580_v44  ;;  %v6583_v12 = vadd.f32 %v6582_v35, %v6581_v27 }
 0x53e   : > { %5435 = vst [vmem:[%s9598_s18 + $0xd0] sm:$0xff] %v5403_v16  ;;  %v5404_v9 = vmax.f32 %v5372_v52, 0.0  ;;  %v5242_v61 = vadd.f32 %v5178_v29, %v10276_v58  ;;  %v5181_v0 = vadd.f32 %v10277_v39, %v6583_v12 }
 0x540   : > { %5436 = vst [vmem:[%s9598_s18 + $0xd8] sm:$0xff] %v5404_v9  ;;  %v5341_v32 = vadd.f32 %v9589_v19, %v5242_v61  ;;  %v5243_v17 = vadd.f32 %v5181_v0, %v10278_v23 }
 0x542   : > { %v5373_v34 = vadd.f32 %v7159_v7, %v5341_v32  ;;  %v5342_v20 = vadd.f32 %v9589_v19, %v5243_v17 }
 0x544   : > { %v5405_v1 = vmax.f32 %v5373_v34, 0.0  ;;  %v5374_v22 = vadd.f32 %v7160_v62, %v5342_v20 }
 0x546   : > { %5437 = vst [vmem:[%s9598_s18 + $0xe0] sm:$0xff] %v5405_v1  ;;  %v5406_v14 = vmax.f32 %v5374_v22, 0.0 }
 0x548   : > { %5438 = vst [vmem:[%s9598_s18 + $0xe8] sm:$0xff] %v5406_v14 }
 0x549   : > { %7316 = shalt.err (!%p7313_p13)
}
 0x54a   : > { %s7317_s29 = scalar_lea.hbm %s9803_s13, 4096  ;;  %s7321_s14 = scalar_lea.hbm %s9858_s7, 8192 }
 0x54b   : > { %p7318_p9 = scmp.ne.s32.totalorder %s9803_s13, %s7317_s29  ;;  %p7322_p4 = scmp.lt.u32.totalorder %s9803_s13, %s9858_s7 }
 0x54c   : > { %p7323_p8 = scmp.lt.u32.totalorder %s7321_s14, %s7317_s29  ;;  %p7325_p3 = scmp.lt.u32.totalorder %s7317_s29, %s9803_s13 }
 0x54d   : > { %p7319_p0 = pnand %p7318_p9, %p7603_p10 }
 0x54e   : > { %p7324_p6 = por %p7323_p8, %p7322_p4 }
 0x54f   : > { %p7320_p11 = pneg %p7319_p0 }
 0x550   : > { %p7326_p5 = por %p7325_p3, %p7324_p6 }
 0x552   : > { %p7327_p7 = pnand %p7326_p5, %p7320_p11 }
 0x554   : > { %7330 = shalt.err (!%p7327_p7)
}
 0x555   : > { %s7390_s8 = smov 128   ;;  %s7391_s17 = smov 8  }
 0x556   : > { %6890 = dma.vmem_to_hbm [thread:$0]  (%p7603_p10), %s9805_s12, 4096, %s9803_s13, %s5442_s15, %s7390_s8, %s7390_s8, %s7391_s17  }
 0x557 PF: > { %s10279_s30 = sld [smem:[#allocation17_spill]]  ;;  %s5470_s28 = sand.u32 1, %s7365_s24  }
 0x558   : > { %p10281_p1 = scmp.ge.s32.totalorder %s7377_s27, 2  ;;  %s5471_s21 = scalar_lea.sflag [#allocation5], %s5470_s28 }
 0x55d   : > { %p10280_p12 = scmp.ne.s32.totalorder %s10279_s30, 0 }
 0x55f   : > { %p6910_p2 = pnand %p10281_p1, %p10280_p12 }
 0x561   : > { %7360 = dma.done.wait (!%p6910_p2), %s5471_s21, 4096  }
 0x562   : > { %7362 = vsyncadd (!%p6910_p2), %s5471_s21, 4294963200  ;;  %p22_p13 = scmp.ge.s32.totalorder %s7593_s22, 4   ;;  %s10282_s24 = smov %s7369_s25 }
 0x563   : > { %s10283_s25 = smov %s7373_s26  ;;  %s10284_s26 = smov %s7609_s20 }
 0x564   : > { %s10285_s27 = smov %s7593_s22  ;;  %24 = sbr.rel (!%p22_p13) target bundleno = 7 (0x7), region = 117 }
 0x56b   :  { %5476 = vsyncpa [#allocation4], 1 }
 0x56c   :  { %5478 = vsyncpa [#allocation4 + $0x1], 1 }
 0x56d   :  { %5479 = vsyncpa [#allocation7], 1 }
 0x56e   :  { %5480 = vsyncpa [#allocation10], 1 }
 0x56f   :  { %5481 = vsyncpa [#allocation5], 1 }
 0x570   :  { %5483 = vsyncpa [#allocation5 + $0x1], 1 }

</bundles_post_ra>
